<compile_context>
chip_gen: v5e
topology: v5e:2x2
jax: 0.10.0
libtpu: 0.0.40
codegen_flags: <defaults>
</compile_context>

<pallas_src>
import functools

import jax
import jax.numpy as jnp
from jax.experimental import pallas as pl
from jax.experimental.pallas import tpu as pltpu


def _self_att_kernel(x_ref, o_ref, *, gamma_pam, gamma_cam, matmul_dtype):
    # x_ref, o_ref: (Bb, C, N) blocks resident in VMEM.
    x = x_ref[...].astype(jnp.float32)            # (Bb, C, N), f32 math
    xm = x.astype(matmul_dtype)                   # matmul operands

    # -------- CAM: channel attention --------
    # energy[b] = X_b @ X_b^T  (contract the shared last axis N directly).
    e_c = jnp.einsum('bcn,bdn->bcd', xm, xm,
                     preferred_element_type=jnp.float32)        # (Bb, C, C)
    # softmax(rowmax(E) - E) == softmax(-E); stable form with a single reduce:
    p_c = jnp.exp(jnp.min(e_c, axis=-1, keepdims=True) - e_c)
    attn_c = p_c / jnp.sum(p_c, axis=-1, keepdims=True)
    out_c = jnp.einsum('bcd,bdn->bcn', attn_c.astype(matmul_dtype), xm,
                       preferred_element_type=jnp.float32)      # (Bb, C, N)

    # -------- PAM: position attention --------
    # energy[b,i,j] = sum_c x[b,c,i] * x[b,c,j]  (contract the channel axis).
    e_p = jnp.einsum('bcn,bcm->bnm', xm, xm,
                     preferred_element_type=jnp.float32)        # (Bb, N, N)
    m_p = jnp.max(e_p, axis=-1, keepdims=True)
    q_p = jnp.exp(e_p - m_p)
    attn_p = q_p / jnp.sum(q_p, axis=-1, keepdims=True)
    # out_p[b,c,i] = sum_j x[b,c,j] * attn_p[b,i,j]
    out_p = jnp.einsum('bcm,bnm->bcn', xm, attn_p.astype(matmul_dtype),
                       preferred_element_type=jnp.float32)      # (Bb, C, N)

    # Self_Att (teacher): Identity convs -> PAM(x) + CAM(x)
    o_ref[...] = (gamma_pam * out_p + gamma_cam * out_c + 2.0 * x
                  ).astype(o_ref.dtype)


def _batches_per_block(B, C):
    """Group enough batch elements per grid step to avoid few-KiB blocks when
    C is tiny (>= ~8 channel rows per block), while keeping per-batch steps at
    production C so the parallel grid axis can shard across TensorCores."""
    bb = min(B, max(1, -(-8 // C)))   # min(B, ceil(8 / C))
    while B % bb:                     # keep the grid evenly tiled
        bb -= 1
    return bb


def self_att_forward(x, *, gamma_pam=1.0, gamma_cam=1.0, use_bf16_matmul=False):
    """x: (B, C, H, W). Returns (B, C, H, W) = PAM(x) + CAM(x) (teacher branch)."""
    B, C, H, W = x.shape
    N = H * W
    x_flat = x.reshape(B, C, N)

    bb = _batches_per_block(B, C)
    grid = (B // bb,)

    kernel = functools.partial(
        _self_att_kernel,
        gamma_pam=float(gamma_pam),
        gamma_cam=float(gamma_cam),
        matmul_dtype=jnp.bfloat16 if use_bf16_matmul else jnp.float32,
    )

    out_flat = pl.pallas_call(
        kernel,
        out_shape=jax.ShapeDtypeStruct((B, C, N), x.dtype),
        grid_spec=pltpu.PrefetchScalarGridSpec(
            num_scalar_prefetch=0,
            grid=grid,
            in_specs=[pl.BlockSpec((bb, C, N), lambda g: (g, 0, 0))],
            out_specs=pl.BlockSpec((bb, C, N), lambda g: (g, 0, 0)),
        ),
        compiler_params=pltpu.CompilerParams(
            dimension_semantics=("parallel",)),
    )(x_flat)

    return out_flat.reshape(B, C, H, W)


def self_att_ref(x, gamma_pam=1.0, gamma_cam=1.0):
    """Pure-JAX reference mirroring the PyTorch Self_Att (teacher) forward."""
    B, C, H, W = x.shape
    N = H * W
    v = x.reshape(B, C, N).astype(jnp.float32)

    # CAM
    e_c = jnp.einsum('bcn,bdn->bcd', v, v)
    e_c_new = jnp.max(e_c, axis=-1, keepdims=True) - e_c
    a_c = jax.nn.softmax(e_c_new, axis=-1)
    cam = gamma_cam * jnp.einsum('bcd,bdn->bcn', a_c, v) + v

    # PAM
    e_p = jnp.einsum('bcn,bcm->bnm', v, v)
    a_p = jax.nn.softmax(e_p, axis=-1)
    pam = gamma_pam * jnp.einsum('bcm,bnm->bcn', v, a_p) + v

    return (pam + cam).reshape(B, C, H, W).astype(x.dtype)


if __name__ == "__main__":
    key = jax.random.PRNGKey(0)
    B, C, H, W = 2, 4, 16, 16
    x = jax.random.normal(key, (B, C, H, W), dtype=jnp.float32)

    # Deterministic 'teacher' branch: gamma_pam = gamma_cam = 1.0, Identity convs.
    out = self_att_forward(x, gamma_pam=1.0, gamma_cam=1.0)
    out = jax.block_until_ready(out)

    ref = self_att_ref(x, 1.0, 1.0)
    assert out.shape == (B, C, H, W)
    max_err = float(jnp.max(jnp.abs(out - ref)))
    assert jnp.allclose(out, ref, atol=2e-3, rtol=2e-3), (
        f"mismatch vs reference, max abs err {max_err}")

    print("KERNEL_OK")
</pallas_src>

<mosaic_0001>
module attributes {stable_mosaic.version = 11 : i64} {
  func.func @_self_att_kernel(%arg0: i32, %arg1: memref<2x4x256xf32, #tpu.memory_space<vmem>>, %arg2: memref<2x4x256xf32, #tpu.memory_space<vmem>>) attributes {dimension_semantics = [#tpu.dimension_semantics<parallel>], iteration_bounds = array<i64: 1>, scalar_prefetch = 0 : i64, scratch_operands = 0 : i64, tpu.core_type = #tpu.core_type<tc>, window_params = [{transform_indices = @transform_0, window_bounds = array<i64: 2, 4, 256>}, {transform_indices = @transform_1, window_bounds = array<i64: 2, 4, 256>}]} {
    %c0 = arith.constant 0 : index
    %c0_0 = arith.constant 0 : index
    %c0_1 = arith.constant 0 : index
    %0 = vector.load %arg1[%c0, %c0_0, %c0_1] : memref<2x4x256xf32, #tpu.memory_space<vmem>>, vector<2x4x256xf32>
    "tpu.trace_start"() <{level = 10 : i32, message = "bcn,bdn->bcd"}> : () -> ()
    %cst = arith.constant dense<0.000000e+00> : vector<2x4x4xf32>
    %1 = tpu.matmul %0, %0, %cst {dimension_numbers = #tpu.dot_dimension_numbers<[2], [2], [1], [1], [0, 0, 0, 1, 1, 1], [0], [0]>} : vector<2x4x256xf32>, vector<2x4x256xf32>, vector<2x4x4xf32> -> vector<2x4x4xf32>
    "tpu.trace_stop"() : () -> ()
    %cst_2 = arith.constant dense<0x7F800000> : vector<2x4xf32>
    %2 = vector.multi_reduction <minimumf>, %1, %cst_2 [2] : vector<2x4x4xf32> to vector<2x4xf32>
    %3 = vector.shape_cast %2 : vector<2x4xf32> to vector<2x4x1xf32>
    %4 = vector.broadcast %3 : vector<2x4x1xf32> to vector<2x4x4xf32>
    %5 = arith.subf %4, %1 : vector<2x4x4xf32>
    %6 = math.exp %5 : vector<2x4x4xf32>
    %cst_3 = arith.constant dense<0.000000e+00> : vector<2x4xf32>
    %7 = vector.multi_reduction <add>, %6, %cst_3 [2] : vector<2x4x4xf32> to vector<2x4xf32>
    %8 = vector.shape_cast %7 : vector<2x4xf32> to vector<2x4x1xf32>
    %9 = vector.broadcast %8 : vector<2x4x1xf32> to vector<2x4x4xf32>
    %10 = arith.divf %6, %9 : vector<2x4x4xf32>
    "tpu.trace_start"() <{level = 10 : i32, message = "bcd,bdn->bcn"}> : () -> ()
    %cst_4 = arith.constant dense<0.000000e+00> : vector<2x4x256xf32>
    %11 = tpu.matmul %10, %0, %cst_4 {dimension_numbers = #tpu.dot_dimension_numbers<[2], [1], [1], [2], [0, 0, 0, 1, 1, 2], [0], [0]>} : vector<2x4x4xf32>, vector<2x4x256xf32>, vector<2x4x256xf32> -> vector<2x4x256xf32>
    "tpu.trace_stop"() : () -> ()
    "tpu.trace_start"() <{level = 10 : i32, message = "bcn,bcm->bnm"}> : () -> ()
    %cst_5 = arith.constant dense<0.000000e+00> : vector<2x256x256xf32>
    %12 = tpu.matmul %0, %0, %cst_5 {dimension_numbers = #tpu.dot_dimension_numbers<[1], [1], [2], [2], [0, 0, 0, 2, 1, 2], [0], [0]>} : vector<2x4x256xf32>, vector<2x4x256xf32>, vector<2x256x256xf32> -> vector<2x256x256xf32>
    "tpu.trace_stop"() : () -> ()
    %cst_6 = arith.constant dense<0xFF800000> : vector<2x256xf32>
    %13 = vector.multi_reduction <maximumf>, %12, %cst_6 [2] : vector<2x256x256xf32> to vector<2x256xf32>
    %14 = vector.shape_cast %13 : vector<2x256xf32> to vector<2x256x1xf32>
    %15 = vector.broadcast %14 : vector<2x256x1xf32> to vector<2x256x256xf32>
    %16 = arith.subf %12, %15 : vector<2x256x256xf32>
    %17 = math.exp %16 : vector<2x256x256xf32>
    %cst_7 = arith.constant dense<0.000000e+00> : vector<2x256xf32>
    %18 = vector.multi_reduction <add>, %17, %cst_7 [2] : vector<2x256x256xf32> to vector<2x256xf32>
    %19 = vector.shape_cast %18 : vector<2x256xf32> to vector<2x256x1xf32>
    %20 = vector.broadcast %19 : vector<2x256x1xf32> to vector<2x256x256xf32>
    %21 = arith.divf %17, %20 : vector<2x256x256xf32>
    "tpu.trace_start"() <{level = 10 : i32, message = "bcm,bnm->bcn"}> : () -> ()
    %cst_8 = arith.constant dense<0.000000e+00> : vector<2x4x256xf32>
    %22 = tpu.matmul %0, %21, %cst_8 {dimension_numbers = #tpu.dot_dimension_numbers<[2], [2], [1], [1], [0, 0, 0, 1, 1, 1], [0], [0]>} : vector<2x4x256xf32>, vector<2x256x256xf32>, vector<2x4x256xf32> -> vector<2x4x256xf32>
    "tpu.trace_stop"() : () -> ()
    %cst_9 = arith.constant 1.000000e+00 : f32
    %23 = vector.broadcast %cst_9 : f32 to vector<2x4x256xf32>
    %24 = arith.mulf %23, %22 : vector<2x4x256xf32>
    %cst_10 = arith.constant 1.000000e+00 : f32
    %25 = vector.broadcast %cst_10 : f32 to vector<2x4x256xf32>
    %26 = arith.mulf %25, %11 : vector<2x4x256xf32>
    %27 = arith.addf %24, %26 : vector<2x4x256xf32>
    %cst_11 = arith.constant 2.000000e+00 : f32
    %28 = vector.broadcast %cst_11 : f32 to vector<2x4x256xf32>
    %29 = arith.mulf %28, %0 : vector<2x4x256xf32>
    %30 = arith.addf %27, %29 : vector<2x4x256xf32>
    %c0_12 = arith.constant 0 : index
    %c0_13 = arith.constant 0 : index
    %c0_14 = arith.constant 0 : index
    %31 = vector.load %arg2[%c0_12, %c0_13, %c0_14] : memref<2x4x256xf32, #tpu.memory_space<vmem>>, vector<2x4x256xf32>
    tpu.vector_store %arg2[%c0_12, %c0_13, %c0_14], %30 {strides = array<i32>} : memref<2x4x256xf32, #tpu.memory_space<vmem>>, vector<2x4x256xf32>,
    return
  }
  func.func @transform_0(%arg0: i32) -> (i32, i32, i32) {
    %c0_i32 = arith.constant 0 : i32
    %c0_i32_0 = arith.constant 0 : i32
    %c0_i32_1 = arith.constant 0 : i32
    return %arg0, %c0_i32, %c0_i32_0 : i32, i32, i32
  }
  func.func @transform_1(%arg0: i32) -> (i32, i32, i32) {
    %c0_i32 = arith.constant 0 : i32
    %c0_i32_0 = arith.constant 0 : i32
    %c0_i32_1 = arith.constant 0 : i32
    return %arg0, %c0_i32, %c0_i32_0 : i32, i32, i32
  }
}

</mosaic_0001>

<bundles_post_ra>
// kernel: tpu_custom_call.1
= control target key start
LH: loop header
LB: loop body
LE: loop exit
PB: predicated region body
PF: predicated region fallthrough
CT: control target
= control target key end

     0   :  { %6 = vsyncpa [#allocation3], 0  ;;  %s6959_s0 = inlined_call_operand.hbm [shape: f32[2,4,256], index: 0, kind: input, shape index: {}]   ;;  %s6960_s1 = inlined_call_operand.hbm [shape: f32[2,4,256], index: 1, kind: output, shape index: {}]  }
   0x1   :  { %7 = vsyncpa [#allocation4], 0  ;;  %s12_s8 = sshll.u32 %s6959_s0, 4  ;;  %s3677_s9 = smov [#allocation2]   ;;  %s13_s8 = int_to_ptr.hbm [resolvable:$true] %s12_s8 }
   0x2   :  { %s14_s10 = sshll.u32 %s3677_s9, 4  ;;  %s3678_s11 = smov 128   ;;  %s15_s10 = int_to_ptr.vmem [resolvable:$true] %s14_s10 }
   0x3   :  { %s3679_s12 = smov 8  }
   0x4   :  { %20 = dma.hbm_to_vmem [thread:$0]  %s13_s8, 256, %s15_s10, [#allocation3], %s3678_s11, %s3678_s11, %s3679_s12  }
   0x5   :  { %3673 = dma.done.wait [#allocation3], 256  }
   0x6   :  { %3674 = vsyncadd [#allocation3], 4294967040  ;;  %v3697_v0 = vld [vmem:[#allocation2] sm:$0xff]  ;;  %v3701_v3 = vld [vmem:[#allocation2 + $0x8] sm:$0xff]  ;;  %vm129_vm0 = vcmask 27648   ;;  %vm185_vm1 = vcmask 1043456  }
   0x7   :  { %7186 = vst [vmem:[#allocation8_spill] sm:$0xff] %v3697_v0  ;;  %vm181_vm6 = vcmask 31744   ;;  %s3680_s0 = smov [#allocation5]   ;;  %s3075_s16 = sshll.u32 %s6960_s1, 4  ;;  %s3076_s16 = int_to_ptr.hbm [resolvable:$true] %s3075_s16 }
   0x8   :  { %28 = vst [vmem:[#allocation1] ss:$2 sm:$0xff] %v3697_v0  ;;  %s3073_s13 = sshll.u32 %s3680_s0, 4  ;;  %s3074_s13 = int_to_ptr.vmem [resolvable:$true] %s3073_s13 }
   0x9   :  { %7187 = vst [vmem:[#allocation9_spill] sm:$0xff] %v3701_v3 }
   0xf   :  { %v29_v1 = vld.sshfl [vmem:[#allocation1] sm:$0xff pattern:$0x75316420]  ;;  %v30_v2 = vld.sshfl [vmem:[#allocation1 + $0x8] sm:$0xff pattern:$0x75316420] }
  0x10   :  { %33 = vst [vmem:[#allocation1] ss:$2 sm:$0xff] %v3697_v0 }
  0x17   :  { %v34_v4 = vld.sshfl [vmem:[#allocation1] sm:$0xff pattern:$0x75316420]  ;;  %v35_v5 = vld.sshfl [vmem:[#allocation1 + $0x8] sm:$0xff pattern:$0x75316420] }
  0x18   :  { %53 = vmatpush.xpose.msra.mxu0 %v34_v4  ;;  %73 = vmatpush.xpose.msra.mxu1 %v35_v5  ;;  %79 = vst [vmem:[#allocation1] ss:$2 sm:$0xff] %v3701_v3 }
  0x1b   :  { %54 = vmatmul.f32.vlgmr.msra.gmra.mxu0 %v29_v1  ;;  %74 = vmatmul.f32.vlgmr.msra.gmra.mxu1 %v30_v2 }
  0x1f   :  { %v80_v6 = vld.sshfl [vmem:[#allocation1] sm:$0xff pattern:$0x75316420]  ;;  %v81_v7 = vld.sshfl [vmem:[#allocation1 + $0x8] sm:$0xff pattern:$0x75316420] }
  0x20   :  { %84 = vst [vmem:[#allocation1] ss:$2 sm:$0xff] %v3701_v3 }
  0x27   :  { %v85_v8 = vld.sshfl [vmem:[#allocation1] sm:$0xff pattern:$0x75316420]  ;;  %v86_v9 = vld.sshfl [vmem:[#allocation1 + $0x8] sm:$0xff pattern:$0x75316420] }
  0x28   :  { %104 = vmatpush.xpose.msra.mxu2 %v85_v8  ;;  %124 = vmatpush.xpose.msra.mxu3 %v86_v9  ;;  %178 = vst [vmem:[#allocation1] ss:$2 sm:$0xff] %v3697_v0 }
  0x2b   :  { %105 = vmatmul.f32.vlgmr.msra.gmra.mxu2 %v80_v6  ;;  %125 = vmatmul.f32.vlgmr.msra.gmra.mxu3 %v81_v7 }
  0x2f   :  { %v179_v10 = vld.sshfl [vmem:[#allocation1] sm:$0xff pattern:$0x75316420]  ;;  %v180_v11 = vld.sshfl [vmem:[#allocation1 + $0x8] sm:$0xff pattern:$0x75316420] }
  0x30   :  { %230 = vst [vmem:[#allocation1] ss:$2 sm:$0xff] %v3701_v3  ;;  %3088 = vmatpush.msk.msrb.mxu0 %vm185_vm1, %v179_v10  ;;  %3090 = vmatpush.msk.msrb.mxu1 %vm185_vm1, %v180_v11 }
  0x37   :  { %v231_v12 = vld.sshfl [vmem:[#allocation1] sm:$0xff pattern:$0x75316420]  ;;  %v232_v13 = vld.sshfl [vmem:[#allocation1 + $0x8] sm:$0xff pattern:$0x75316420] }
  0x38   :  { %280 = vst [vmem:[#allocation1] ss:$2 sm:$0xff] %v3697_v0  ;;  %3094 = vmatpush.msk.msrb.mxu3 %vm185_vm1, %v232_v13  ;;  %3092 = vmatpush.msk.msrb.mxu2 %vm185_vm1, %v231_v12 }
  0x3f   :  { %v281_v14 = vld.sshfl [vmem:[#allocation1] sm:$0xff pattern:$0x75316420]  ;;  %v282_v15 = vld.sshfl [vmem:[#allocation1 + $0x8] sm:$0xff pattern:$0x75316420] }
  0x40   :  { %285 = vxpose.xlu2.b32.start.end [1/1] (short) %v281_v14, 128  ;;  %349 = vst [vmem:[#allocation1] ss:$2 sm:$0xff] %v3697_v0 }
  0x47   :  { %v350_v16 = vld.sshfl [vmem:[#allocation1] sm:$0xff pattern:$0x75316420]  ;;  %v351_v17 = vld.sshfl [vmem:[#allocation1 + $0x8] sm:$0xff pattern:$0x75316420] }
  0x48   :  { %678 = vst [vmem:[#allocation1] ss:$2 sm:$0xff] %v3701_v3  ;;  %3096 = vmatpush.msk.msra.mxu0 %vm185_vm1, %v350_v16  ;;  %3129 = vmatpush.msk.msra.mxu1 %vm185_vm1, %v351_v17 }
  0x4f   :  { %v679_v26 = vld.sshfl [vmem:[#allocation1] sm:$0xff pattern:$0x75316420]  ;;  %v680_v34 = vld.sshfl [vmem:[#allocation1 + $0x8] sm:$0xff pattern:$0x75316420] }
  0x50   :  { %747 = vst [vmem:[#allocation1] ss:$2 sm:$0xff] %v3701_v3 }
  0x57   :  { %v748_v61 = vld.sshfl [vmem:[#allocation1] sm:$0xff pattern:$0x75316420]  ;;  %v749_v62 = vld.sshfl [vmem:[#allocation1 + $0x8] sm:$0xff pattern:$0x75316420] }
  0x58   :  { %3162 = vmatpush.msk.msra.mxu2 %vm185_vm1, %v748_v61  ;;  %3195 = vmatpush.msk.msra.mxu3 %vm185_vm1, %v749_v62  ;;  %2868 = vst [vmem:[#allocation1] ss:$2 sm:$0xff] %v3697_v0 }
  0x98   :  { %v55_v18 = vpop.f32.mrf.mxu0  ;;  %v75_v19 = vpop.f32.mrf.mxu1 }
  0x99   :  { %v76_v20 = vadd.f32 %v75_v19, %v55_v18 }
  0x9b   :  { %v130_v21 = vsel %vm129_vm0, %v76_v20, inf }
  0x9c   :  { %131 = vmin.xlane.f32.xlu0 %v130_v21 }
  0xae   :  { %v106_v22 = vpop.f32.mrf.mxu2  ;;  %v126_v23 = vpop.f32.mrf.mxu3 }
  0xaf   :  { %v127_v24 = vadd.f32 %v126_v23, %v106_v22 }
  0xb1   :  { %v133_v25 = vsel %vm129_vm0, %v127_v24, inf }
  0xb2   :  { %134 = vmin.xlane.f32.xlu0 %v133_v25 }
  0xc0   :  { %683 = vxpose.xlu2.b32.start.end [1/1] (short) %v679_v26, 128 }
  0xd9   :  { %v3712_v30 = vpop.trf.xlu2 }
  0xdb   :  { %317 = vxpose.xlu0.b32.start.end [1/1] (short) %v282_v15, 128 }
  0xe1   :  { %v3715_v33 = vpop.trf.xlu2 }
  0xe9   :  { %v3718_v37 = vpop.trf.xlu2 }
  0xf1   :  { %v3720_v39 = vpop.trf.xlu2 }
  0xf9   :  { %v3726_v42 = vpop.trf.xlu2 }
 0x101   :  { %v3728_v43 = vpop.trf.xlu2 }
 0x109   :  { %v3730_v44 = vpop.trf.xlu2 }
 0x10f   :  { %v132_v27 = vpop.xlane.xlu0 %131 }
 0x110   :  { %v136_v28 = vsub.f32 %v132_v27, %v76_v20 }
 0x111   :  { %v3732_v45 = vpop.trf.xlu2 }
 0x112   :  { %v138_v29 = vmul.f32 1.442695, %v136_v28 }
 0x114   :  { %3233 = vpow2.f32 %v138_v29 }
 0x119   :  { %v3734_v46 = vpop.trf.xlu2 }
 0x11a   :  { %v3234_v31 = vpop.eup %3233 }
 0x11b   :  { %v142_v32 = vsel %vm129_vm0, %v3234_v31, 0.0 }
 0x11c   :  { %143 = vadd.xlane.f32.xlu1 %v142_v32 }
 0x121   :  { %v3736_v47 = vpop.trf.xlu2 }
 0x125   :  { %v135_v35 = vpop.xlane.xlu0 %134 }
 0x126   :  { %v137_v36 = vsub.f32 %v135_v35, %v127_v24 }
 0x128   :  { %v140_v38 = vmul.f32 1.442695, %v137_v36 }
 0x129   :  { %v3738_v48 = vpop.trf.xlu2 }
 0x12a   :  { %3235 = vpow2.f32 %v140_v38 }
 0x130   :  { %v3722_v40 = vpop.eup %3235 }
 0x131   :  { %v145_v41 = vsel %vm129_vm0, %v3722_v40, 0.0  ;;  %v3740_v49 = vpop.trf.xlu2 }
 0x132   :  { %146 = vadd.xlane.f32.xlu1 %v145_v41 }
 0x139   :  { %v3748_v50 = vpop.trf.xlu2 }
 0x141   :  { %v3750_v51 = vpop.trf.xlu2 }
 0x149   :  { %v3752_v53 = vpop.trf.xlu2 }
 0x151   :  { %v3754_v56 = vpop.trf.xlu2 }
 0x159   :  { %v699_v5 = vpop.trf.xlu2 }
 0x161   :  { %v700_v8 = vpop.trf.xlu2 }
 0x169   :  { %v701_v17 = vpop.trf.xlu2 }
 0x16c   :  { %715 = vxpose.xlu1.b32.start.end [1/1] (short) %v680_v34, 128 }
 0x171   :  { %v702_v21 = vpop.trf.xlu2 }
 0x179   :  { %v703_v22 = vpop.trf.xlu2 }
 0x17f   :  { %v333_v29 = vpop.trf.xlu0 }
 0x181   :  { %v704_v23 = vpop.trf.xlu2 }
 0x189   :  { %v705_v24 = vpop.trf.xlu2 }
 0x18f   :  { %v144_v52 = vpop.xlane.xlu1 %143 }
 0x190   :  { %3237 = vrcp.f32 %v144_v52  ;;  %v159_v58 = vand.u32 2147483648, %v144_v52  ;;  %v157_v59 = vand.u32 2147483647, %v144_v52  ;;  %vm153_vm3 = vweird.f32 %v144_v52 }
 0x191   :  { %v706_v25 = vpop.trf.xlu2 }
 0x192   :  { %v160_v1 = vor.u32 1.1754944e-38, %v159_v58  ;;  %vm158_vm5 = vcmp.eq.f32.partialorder %v157_v59, 8.507059e+37 }
 0x196   :  { %v3238_v54 = vpop.eup %3237 }
 0x197   :  { %v149_v55 = vmul.f32 %v3238_v54, %v144_v52  ;;  %vm154_vm2 = vweird.f32 %v3238_v54 }
 0x198   :  { %vm155_vm4 = vmor %vm153_vm3, %vm154_vm2 }
 0x199   :  { %v150_v57 = vsub.f32 1.0, %v149_v55  ;;  %v707_v26 = vpop.trf.xlu2 }
 0x19b   :  { %v151_v60 = vmul.f32 %v3238_v54, %v150_v57 }
 0x19d   :  { %v152_v63 = vadd.f32 %v3238_v54, %v151_v60 }
 0x19f   :  { %v156_v2 = vsel %vm155_vm4, %v3238_v54, %v152_v63 }
 0x1a0   :  { %v161_v4 = vsel %vm158_vm5, %v160_v1, %v156_v2 }
 0x1a1   :  { %v162_v6 = vmul.f32 %v3234_v31, %v161_v4  ;;  %v708_v27 = vpop.trf.xlu2  ;;  %v334_v31 = vpop.trf.xlu0 }
 0x1a3   :  { %3089 = vmatmul.msk.f32.vlgmr.msrb.gmra.mxu0 %vm181_vm6, %v162_v6  ;;  %3091 = vmatmul.msk.f32.vlgmr.msrb.gmra.mxu1 %vm181_vm6, %v162_v6 }
 0x1a5   :  { %v147_v7 = vpop.xlane.xlu1 %146 }
 0x1a6   :  { %3239 = vrcp.f32 %v147_v7  ;;  %v174_v12 = vand.u32 2147483648, %v147_v7  ;;  %v172_v14 = vand.u32 2147483647, %v147_v7  ;;  %vm168_vm8 = vweird.f32 %v147_v7 }
 0x1a8   :  { %v175_v16 = vor.u32 1.1754944e-38, %v174_v12  ;;  %vm173_vm10 = vcmp.eq.f32.partialorder %v172_v14, 8.507059e+37 }
 0x1a9   :  { %v709_v28 = vpop.trf.xlu2  ;;  %v335_v34 = vpop.trf.xlu0 }
 0x1ab   :  { %3097 = vmatmul.msk.f32.vlgmr.msra.gmra.mxu0 %vm181_vm6, %v3712_v30  ;;  %3130 = vmatmul.msk.f32.vlgmr.msra.gmra.mxu1 %vm181_vm6, %v3712_v30 }
 0x1ac   :  { %v3240_v9 = vpop.eup %3239 }
 0x1ad   :  { %v164_v10 = vmul.f32 %v3240_v9, %v147_v7  ;;  %vm169_vm7 = vweird.f32 %v3240_v9 }
 0x1ae   :  { %vm170_vm9 = vmor %vm168_vm8, %vm169_vm7 }
 0x1af   :  { %v165_v11 = vsub.f32 1.0, %v164_v10 }
 0x1b1   :  { %v166_v13 = vmul.f32 %v3240_v9, %v165_v11  ;;  %v710_v30 = vpop.trf.xlu2 }
 0x1b3   :  { %3098 = vmatmul.msk.f32.gmra.mxu0 %vm181_vm6, %v3715_v33  ;;  %3131 = vmatmul.msk.f32.gmra.mxu1 %vm181_vm6, %v3715_v33  ;;  %v167_v15 = vadd.f32 %v3240_v9, %v166_v13 }
 0x1b5   :  { %v171_v18 = vsel %vm170_vm9, %v3240_v9, %v167_v15 }
 0x1b6   :  { %v176_v19 = vsel %vm173_vm10, %v175_v16, %v171_v18 }
 0x1b7   :  { %v177_v20 = vmul.f32 %v3722_v40, %v176_v19 }
 0x1b9   :  { %3093 = vmatmul.msk.f32.vlgmr.msrb.gmra.mxu2 %vm181_vm6, %v177_v20  ;;  %3095 = vmatmul.msk.f32.vlgmr.msrb.gmra.mxu3 %vm181_vm6, %v177_v20  ;;  %v711_v33 = vpop.trf.xlu2 }
 0x1bb   :  { %3099 = vmatmul.msk.f32.gmra.mxu0 %vm181_vm6, %v3718_v37  ;;  %3132 = vmatmul.msk.f32.gmra.mxu1 %vm181_vm6, %v3718_v37 }
 0x1c1   :  { %3163 = vmatmul.msk.f32.vlgmr.msra.gmra.mxu2 %vm181_vm6, %v699_v5  ;;  %3196 = vmatmul.msk.f32.vlgmr.msra.gmra.mxu3 %vm181_vm6, %v699_v5  ;;  %v712_v38 = vpop.trf.xlu2 }
 0x1c3   :  { %3100 = vmatmul.msk.f32.gmra.mxu0 %vm181_vm6, %v3720_v39  ;;  %3133 = vmatmul.msk.f32.gmra.mxu1 %vm181_vm6, %v3720_v39 }
 0x1c9   :  { %3164 = vmatmul.msk.f32.gmra.mxu2 %vm181_vm6, %v700_v8  ;;  %3197 = vmatmul.msk.f32.gmra.mxu3 %vm181_vm6, %v700_v8 }
 0x1cb   :  { %3101 = vmatmul.msk.f32.gmra.mxu0 %vm181_vm6, %v3726_v42  ;;  %3134 = vmatmul.msk.f32.gmra.mxu1 %vm181_vm6, %v3726_v42  ;;  %v336_v42 = vpop.trf.xlu0 }
 0x1d1   :  { %3165 = vmatmul.msk.f32.gmra.mxu2 %vm181_vm6, %v701_v17  ;;  %3198 = vmatmul.msk.f32.gmra.mxu3 %vm181_vm6, %v701_v17 }
 0x1d3   :  { %3102 = vmatmul.msk.f32.gmra.mxu0 %vm181_vm6, %v3728_v43  ;;  %3135 = vmatmul.msk.f32.gmra.mxu1 %vm181_vm6, %v3728_v43 }
 0x1d9   :  { %3166 = vmatmul.msk.f32.gmra.mxu2 %vm181_vm6, %v702_v21  ;;  %3199 = vmatmul.msk.f32.gmra.mxu3 %vm181_vm6, %v702_v21 }
 0x1db   :  { %3103 = vmatmul.msk.f32.gmra.mxu0 %vm181_vm6, %v3730_v44  ;;  %3136 = vmatmul.msk.f32.gmra.mxu1 %vm181_vm6, %v3730_v44  ;;  %v713_v44 = vpop.trf.xlu2 }
 0x1e1   :  { %3167 = vmatmul.msk.f32.gmra.mxu2 %vm181_vm6, %v703_v22  ;;  %3200 = vmatmul.msk.f32.gmra.mxu3 %vm181_vm6, %v703_v22 }
 0x1e3   :  { %3104 = vmatmul.msk.f32.gmra.mxu0 %vm181_vm6, %v3732_v45  ;;  %3137 = vmatmul.msk.f32.gmra.mxu1 %vm181_vm6, %v3732_v45 }
 0x1e9   :  { %3168 = vmatmul.msk.f32.gmra.mxu2 %vm181_vm6, %v704_v23  ;;  %3201 = vmatmul.msk.f32.gmra.mxu3 %vm181_vm6, %v704_v23 }
 0x1eb   :  { %3105 = vmatmul.msk.f32.gmra.mxu0 %vm181_vm6, %v3734_v46  ;;  %3138 = vmatmul.msk.f32.gmra.mxu1 %vm181_vm6, %v3734_v46 }
 0x1f1   :  { %3169 = vmatmul.msk.f32.gmra.mxu2 %vm181_vm6, %v705_v24  ;;  %3202 = vmatmul.msk.f32.gmra.mxu3 %vm181_vm6, %v705_v24 }
 0x1f3   :  { %3106 = vmatmul.msk.f32.gmra.mxu0 %vm181_vm6, %v3736_v47  ;;  %3139 = vmatmul.msk.f32.gmra.mxu1 %vm181_vm6, %v3736_v47  ;;  %v337_v47 = vpop.trf.xlu0 }
 0x1f9   :  { %3170 = vmatmul.msk.f32.gmra.mxu2 %vm181_vm6, %v706_v25  ;;  %3203 = vmatmul.msk.f32.gmra.mxu3 %vm181_vm6, %v706_v25 }
 0x1fb   :  { %3107 = vmatmul.msk.f32.gmra.mxu0 %vm181_vm6, %v3738_v48  ;;  %3140 = vmatmul.msk.f32.gmra.mxu1 %vm181_vm6, %v3738_v48  ;;  %v338_v55 = vpop.trf.xlu0 }
 0x201   :  { %3171 = vmatmul.msk.f32.gmra.mxu2 %vm181_vm6, %v707_v26  ;;  %3204 = vmatmul.msk.f32.gmra.mxu3 %vm181_vm6, %v707_v26 }
 0x203   :  { %3108 = vmatmul.msk.f32.gmra.mxu0 %vm181_vm6, %v3740_v49  ;;  %3141 = vmatmul.msk.f32.gmra.mxu1 %vm181_vm6, %v3740_v49  ;;  %v714_v49 = vpop.trf.xlu2  ;;  %v339_v63 = vpop.trf.xlu0 }
 0x209   :  { %3172 = vmatmul.msk.f32.gmra.mxu2 %vm181_vm6, %v708_v27  ;;  %3205 = vmatmul.msk.f32.gmra.mxu3 %vm181_vm6, %v708_v27 }
 0x20b   :  { %3109 = vmatmul.msk.f32.gmra.mxu0 %vm181_vm6, %v3748_v50  ;;  %3142 = vmatmul.msk.f32.gmra.mxu1 %vm181_vm6, %v3748_v50  ;;  %v340_v12 = vpop.trf.xlu0 }
 0x210   :  { %v731_v32 = vpop.trf.xlu1 }
 0x211   :  { %3173 = vmatmul.msk.f32.gmra.mxu2 %vm181_vm6, %v709_v28  ;;  %3206 = vmatmul.msk.f32.gmra.mxu3 %vm181_vm6, %v709_v28 }
 0x213   :  { %3110 = vmatmul.msk.f32.gmra.mxu0 %vm181_vm6, %v3750_v51  ;;  %3143 = vmatmul.msk.f32.gmra.mxu1 %vm181_vm6, %v3750_v51  ;;  %v341_v21 = vpop.trf.xlu0 }
 0x218   :  { %v732_v37 = vpop.trf.xlu1 }
 0x219   :  { %3174 = vmatmul.msk.f32.gmra.mxu2 %vm181_vm6, %v710_v30  ;;  %3207 = vmatmul.msk.f32.gmra.mxu3 %vm181_vm6, %v710_v30 }
 0x21b   :  { %3111 = vmatmul.msk.f32.gmra.mxu0 %vm181_vm6, %v3752_v53  ;;  %3144 = vmatmul.msk.f32.gmra.mxu1 %vm181_vm6, %v3752_v53  ;;  %v342_v30 = vpop.trf.xlu0 }
 0x220   :  { %v3848_v35 = vpop.f32.mrf.mxu0  ;;  %v3850_v36 = vpop.f32.mrf.mxu1 }
 0x221   :  { %7188 = vst [vmem:[#allocation10_spill] sm:$0xff] %v3848_v35  ;;  %3175 = vmatmul.msk.f32.gmra.mxu2 %vm181_vm6, %v711_v33  ;;  %3208 = vmatmul.msk.f32.gmra.mxu3 %vm181_vm6, %v711_v33  ;;  %v733_v43 = vpop.trf.xlu1 }
 0x222   :  { %7189 = vst [vmem:[#allocation11_spill] sm:$0xff] %v3850_v36 }
 0x223   :  { %3112 = vmatmul.msk.f32.gmra.mxu0 %vm181_vm6, %v3754_v56  ;;  %3145 = vmatmul.msk.f32.gmra.mxu1 %vm181_vm6, %v3754_v56 }
 0x228   :  { %v3858_v39 = vpop.f32.mrf.mxu0  ;;  %v3860_v40 = vpop.f32.mrf.mxu1 }
 0x229   :  { %7190 = vst [vmem:[#allocation12_spill] sm:$0xff] %v3858_v39  ;;  %3176 = vmatmul.msk.f32.gmra.mxu2 %vm181_vm6, %v712_v38  ;;  %3209 = vmatmul.msk.f32.gmra.mxu3 %vm181_vm6, %v712_v38  ;;  %v1076_v41 = vmax.f32 %v3858_v39, %v3860_v40  ;;  %v734_v48 = vpop.trf.xlu1 }
 0x22a   :  { %7191 = vst [vmem:[#allocation13_spill] sm:$0xff] %v3860_v40 }
 0x22b   :  { %1077 = vmax.xlane.f32.xlu0 %v1076_v41  ;;  %3113 = vmatmul.msk.f32.gmra.mxu0 %vm181_vm6, %v333_v29 }
 0x22c   :  { %3146 = vmatmul.msk.f32.gmra.mxu1 %vm181_vm6, %v333_v29 }
 0x230   :  { %v3868_v45 = vpop.f32.mrf.mxu0  ;;  %v3870_v46 = vpop.f32.mrf.mxu1 }
 0x231   :  { %7192 = vst [vmem:[#allocation14_spill] sm:$0xff] %v3868_v45  ;;  %3177 = vmatmul.msk.f32.gmra.mxu2 %vm181_vm6, %v713_v44  ;;  %3210 = vmatmul.msk.f32.gmra.mxu3 %vm181_vm6, %v713_v44  ;;  %v735_v56 = vpop.trf.xlu1  ;;  %v1079_v60 = vmax.f32 %v3868_v45, %v3870_v46 }
 0x232   :  { %7193 = vst [vmem:[#allocation15_spill] sm:$0xff] %v3870_v46 }
 0x233   :  { %3114 = vmatmul.msk.f32.gmra.mxu0 %vm181_vm6, %v334_v31 }
 0x234   :  { %3147 = vmatmul.msk.f32.gmra.mxu1 %vm181_vm6, %v334_v31 }
 0x238   :  { %v3876_v50 = vpop.f32.mrf.mxu0  ;;  %v3878_v51 = vpop.f32.mrf.mxu1 }
 0x239   :  { %7194 = vst [vmem:[#allocation16_spill] sm:$0xff] %v3876_v50  ;;  %3178 = vmatmul.msk.f32.gmra.mxu2 %vm181_vm6, %v714_v49  ;;  %3211 = vmatmul.msk.f32.gmra.mxu3 %vm181_vm6, %v714_v49  ;;  %v1082_v52 = vmax.f32 %v3876_v50, %v3878_v51  ;;  %v736_v4 = vpop.trf.xlu1 }
 0x23a   :  { %7195 = vst [vmem:[#allocation17_spill] sm:$0xff] %v3878_v51 }
 0x23b   :  { %1083 = vmax.xlane.f32.xlu2 %v1082_v52  ;;  %3115 = vmatmul.msk.f32.gmra.mxu0 %vm181_vm6, %v335_v34 }
 0x23c   :  { %3148 = vmatmul.msk.f32.gmra.mxu1 %vm181_vm6, %v335_v34  ;;  %v3886_v53 = vpop.f32.mrf.mxu2  ;;  %v3888_v54 = vpop.f32.mrf.mxu3 }
 0x23d   :  { %7196 = vst [vmem:[#allocation18_spill] sm:$0xff] %v3886_v53 }
 0x23e   :  { %7197 = vst [vmem:[#allocation19_spill] sm:$0xff] %v3888_v54 }
 0x240   :  { %v3890_v57 = vpop.f32.mrf.mxu0  ;;  %v3892_v58 = vpop.f32.mrf.mxu1 }
 0x241   :  { %7198 = vst [vmem:[#allocation20_spill] sm:$0xff] %v3890_v57  ;;  %3179 = vmatmul.msk.f32.gmra.mxu2 %vm181_vm6, %v731_v32  ;;  %3212 = vmatmul.msk.f32.gmra.mxu3 %vm181_vm6, %v731_v32  ;;  %v1085_v59 = vmax.f32 %v3890_v57, %v3892_v58  ;;  %v737_v14 = vpop.trf.xlu1 }
 0x242   :  { %7199 = vst [vmem:[#allocation21_spill] sm:$0xff] %v3892_v58 }
 0x243   :  { %1086 = vmax.xlane.f32.xlu0 %v1085_v59  ;;  %3116 = vmatmul.msk.f32.gmra.mxu0 %vm181_vm6, %v336_v42 }
 0x244   :  { %3149 = vmatmul.msk.f32.gmra.mxu1 %vm181_vm6, %v336_v42  ;;  %1080 = vmax.xlane.f32.xlu1 %v1079_v60  ;;  %v3902_v61 = vpop.f32.mrf.mxu2  ;;  %v3904_v62 = vpop.f32.mrf.mxu3 }
 0x245   :  { %7200 = vst [vmem:[#allocation22_spill] sm:$0xff] %v3902_v61  ;;  %v1172_v5 = vmax.f32 %v3902_v61, %v3904_v62 }
 0x246   :  { %7201 = vst [vmem:[#allocation23_spill] sm:$0xff] %v3904_v62 }
 0x248   :  { %v3906_v1 = vpop.f32.mrf.mxu0  ;;  %v3908_v2 = vpop.f32.mrf.mxu1 }
 0x249   :  { %7202 = vst [vmem:[#allocation24_spill] sm:$0xff] %v3906_v1  ;;  %3180 = vmatmul.msk.f32.gmra.mxu2 %vm181_vm6, %v732_v37  ;;  %3213 = vmatmul.msk.f32.gmra.mxu3 %vm181_vm6, %v732_v37  ;;  %v1088_v13 = vmax.f32 %v3906_v1, %v3908_v2  ;;  %v738_v25 = vpop.trf.xlu1 }
 0x24a   :  { %7203 = vst [vmem:[#allocation25_spill] sm:$0xff] %v3908_v2 }
 0x24b   :  { %3117 = vmatmul.msk.f32.gmra.mxu0 %vm181_vm6, %v337_v47 }
 0x24c   :  { %3150 = vmatmul.msk.f32.gmra.mxu1 %vm181_vm6, %v337_v47  ;;  %v3916_v6 = vpop.f32.mrf.mxu3  ;;  %1173 = vmax.xlane.f32.xlu1 %v1172_v5  ;;  %v3918_v7 = vpop.f32.mrf.mxu2 }
 0x24d   :  { %7204 = vst [vmem:[#allocation26_spill] sm:$0xff] %v3916_v6  ;;  %v1175_v8 = vmax.f32 %v3918_v7, %v3916_v6 }
 0x24e   :  { %7205 = vst [vmem:[#allocation27_spill] sm:$0xff] %v3918_v7 }
 0x24f   :  { %1176 = vmax.xlane.f32.xlu2 %v1175_v8 }
 0x250   :  { %v3922_v9 = vpop.f32.mrf.mxu0  ;;  %v3924_v10 = vpop.f32.mrf.mxu1 }
 0x251   :  { %7206 = vst [vmem:[#allocation28_spill] sm:$0xff] %v3922_v9  ;;  %3181 = vmatmul.msk.f32.gmra.mxu2 %vm181_vm6, %v733_v43  ;;  %3214 = vmatmul.msk.f32.gmra.mxu3 %vm181_vm6, %v733_v43  ;;  %v1091_v11 = vmax.f32 %v3922_v9, %v3924_v10  ;;  %v739_v33 = vpop.trf.xlu1  ;;  %v343_v43 = vpop.trf.xlu0 }
 0x252   :  { %7207 = vst [vmem:[#allocation29_spill] sm:$0xff] %v3924_v10 }
 0x253   :  { %1092 = vmax.xlane.f32.xlu0 %v1091_v11  ;;  %3118 = vmatmul.msk.f32.gmra.mxu0 %vm181_vm6, %v338_v55 }
 0x254   :  { %3151 = vmatmul.msk.f32.gmra.mxu1 %vm181_vm6, %v338_v55  ;;  %v3934_v15 = vpop.f32.mrf.mxu3  ;;  %1089 = vmax.xlane.f32.xlu1 %v1088_v13  ;;  %v3936_v16 = vpop.f32.mrf.mxu2 }
 0x255   :  { %7208 = vst [vmem:[#allocation30_spill] sm:$0xff] %v3934_v15  ;;  %v1178_v17 = vmax.f32 %v3936_v16, %v3934_v15 }
 0x256   :  { %7209 = vst [vmem:[#allocation31_spill] sm:$0xff] %v3936_v16 }
 0x257   :  { %1179 = vmax.xlane.f32.xlu2 %v1178_v17 }
 0x258   :  { %v3940_v18 = vpop.f32.mrf.mxu0  ;;  %v3942_v19 = vpop.f32.mrf.mxu1 }
 0x259   :  { %3182 = vmatmul.msk.f32.gmra.mxu2 %vm181_vm6, %v734_v48  ;;  %3215 = vmatmul.msk.f32.gmra.mxu3 %vm181_vm6, %v734_v48  ;;  %v1094_v20 = vmax.f32 %v3940_v18, %v3942_v19  ;;  %v740_v49 = vpop.trf.xlu1 }
 0x25b   :  { %3119 = vmatmul.msk.f32.gmra.mxu0 %vm181_vm6, %v339_v63 }
 0x25c   :  { %3152 = vmatmul.msk.f32.gmra.mxu1 %vm181_vm6, %v339_v63  ;;  %v3950_v22 = vpop.f32.mrf.mxu3  ;;  %1095 = vmax.xlane.f32.xlu1 %v1094_v20  ;;  %v3952_v23 = vpop.f32.mrf.mxu2 }
 0x25d   :  { %7210 = vst [vmem:[#allocation32_spill] sm:$0xff] %v3950_v22  ;;  %v1181_v24 = vmax.f32 %v3952_v23, %v3950_v22  ;;  %v344_v63 = vpop.trf.xlu0 }
 0x25e   :  { %7211 = vst [vmem:[#allocation33_spill] sm:$0xff] %v3952_v23 }
 0x25f   :  { %1182 = vmax.xlane.f32.xlu0 %v1181_v24 }
 0x260   :  { %v3956_v26 = vpop.f32.mrf.mxu0  ;;  %v3958_v27 = vpop.f32.mrf.mxu1 }
 0x261   :  { %3183 = vmatmul.msk.f32.gmra.mxu2 %vm181_vm6, %v735_v56  ;;  %3216 = vmatmul.msk.f32.gmra.mxu3 %vm181_vm6, %v735_v56  ;;  %v1097_v31 = vmax.f32 %v3956_v26, %v3958_v27 }
 0x263   :  { %3120 = vmatmul.msk.f32.gmra.mxu0 %vm181_vm6, %v340_v12 }
 0x264   :  { %3153 = vmatmul.msk.f32.gmra.mxu1 %vm181_vm6, %v340_v12  ;;  %v3964_v28 = vpop.f32.mrf.mxu2  ;;  %v3966_v29 = vpop.f32.mrf.mxu3 }
 0x265   :  { %7212 = vst [vmem:[#allocation34_spill] sm:$0xff] %v3964_v28  ;;  %v1184_v32 = vmax.f32 %v3964_v28, %v3966_v29  ;;  %v345_v20 = vpop.trf.xlu0 }
 0x266   :  { %7213 = vst [vmem:[#allocation35_spill] sm:$0xff] %v3966_v29 }
 0x267   :  { %1098 = vmax.xlane.f32.xlu0 %v1097_v31  ;;  %1185 = vmax.xlane.f32.xlu1 %v1184_v32 }
 0x268   :  { %v3972_v34 = vpop.f32.mrf.mxu0  ;;  %v3974_v37 = vpop.f32.mrf.mxu1 }
 0x269   :  { %3184 = vmatmul.msk.f32.gmra.mxu2 %vm181_vm6, %v736_v4  ;;  %3217 = vmatmul.msk.f32.gmra.mxu3 %vm181_vm6, %v736_v4  ;;  %v1100_v42 = vmax.f32 %v3972_v34, %v3974_v37  ;;  %v741_v4 = vpop.trf.xlu1 }
 0x26b   :  { %3121 = vmatmul.msk.f32.gmra.mxu0 %vm181_vm6, %v341_v21 }
 0x26c   :  { %v3979_v38 = vpop.f32.mrf.mxu2  ;;  %v3981_v41 = vpop.f32.mrf.mxu3  ;;  %3154 = vmatmul.msk.f32.gmra.mxu1 %vm181_vm6, %v341_v21 }
 0x26d   :  { %7214 = vst [vmem:[#allocation36_spill] sm:$0xff] %v3979_v38  ;;  %v1187_v56 = vmax.f32 %v3979_v38, %v3981_v41 }
 0x26e   :  { %7215 = vst [vmem:[#allocation37_spill] sm:$0xff] %v3981_v41 }
 0x26f   :  { %1101 = vmax.xlane.f32.xlu1 %v1100_v42 }
 0x270   :  { %v3986_v44 = vpop.f32.mrf.mxu0  ;;  %v3988_v47 = vpop.f32.mrf.mxu1 }
 0x271   :  { %3185 = vmatmul.msk.f32.gmra.mxu2 %vm181_vm6, %v737_v14  ;;  %3218 = vmatmul.msk.f32.gmra.mxu3 %vm181_vm6, %v737_v14  ;;  %v1103_v48 = vmax.f32 %v3986_v44, %v3988_v47 }
 0x273   :  { %1104 = vmax.xlane.f32.xlu0 %v1103_v48  ;;  %3122 = vmatmul.msk.f32.gmra.mxu0 %vm181_vm6, %v342_v30  ;;  %v346_v48 = vpop.trf.xlu0 }
 0x274   :  { %v3995_v52 = vpop.f32.mrf.mxu2  ;;  %v3997_v55 = vpop.f32.mrf.mxu3  ;;  %3155 = vmatmul.msk.f32.gmra.mxu1 %vm181_vm6, %v342_v30 }
 0x275   :  { %7216 = vst [vmem:[#allocation38_spill] sm:$0xff] %v3995_v52  ;;  %v1190_v11 = vmax.f32 %v3995_v52, %v3997_v55  ;;  %v742_v30 = vpop.trf.xlu1 }
 0x276   :  { %7217 = vst [vmem:[#allocation39_spill] sm:$0xff] %v3997_v55 }
 0x277   :  { %1188 = vmax.xlane.f32.xlu1 %v1187_v56 }
 0x278   :  { %v4002_v59 = vpop.f32.mrf.mxu0  ;;  %v4004_v60 = vpop.f32.mrf.mxu1 }
 0x279   :  { %3186 = vmatmul.msk.f32.gmra.mxu2 %vm181_vm6, %v738_v25  ;;  %3219 = vmatmul.msk.f32.gmra.mxu3 %vm181_vm6, %v738_v25  ;;  %v1106_v25 = vmax.f32 %v4002_v59, %v4004_v60 }
 0x27b   :  { %3123 = vmatmul.msk.f32.gmra.mxu0 %vm181_vm6, %v343_v43 }
 0x27c   :  { %v4009_v5 = vpop.f32.mrf.mxu2  ;;  %v4011_v8 = vpop.f32.mrf.mxu3  ;;  %3156 = vmatmul.msk.f32.gmra.mxu1 %vm181_vm6, %v343_v43 }
 0x27d   :  { %7218 = vst [vmem:[#allocation40_spill] sm:$0xff] %v4009_v5  ;;  %v1193_v12 = vmax.f32 %v4009_v5, %v4011_v8 }
 0x27e   :  { %7219 = vst [vmem:[#allocation41_spill] sm:$0xff] %v4011_v8 }
 0x27f   :  { %1191 = vmax.xlane.f32.xlu1 %v1190_v11  ;;  %1194 = vmax.xlane.f32.xlu2 %v1193_v12 }
 0x280   :  { %v4018_v13 = vpop.f32.mrf.mxu0  ;;  %v4020_v14 = vpop.f32.mrf.mxu1 }
 0x281   :  { %3187 = vmatmul.msk.f32.gmra.mxu2 %vm181_vm6, %v739_v33  ;;  %3220 = vmatmul.msk.f32.gmra.mxu3 %vm181_vm6, %v739_v33  ;;  %v1109_v17 = vmax.f32 %v4018_v13, %v4020_v14 }
 0x283   :  { %1110 = vmax.xlane.f32.xlu0 %v1109_v17  ;;  %3124 = vmatmul.msk.f32.gmra.mxu0 %vm181_vm6, %v344_v63 }
 0x284   :  { %v4027_v21 = vpop.f32.mrf.mxu2  ;;  %v4029_v24 = vpop.f32.mrf.mxu3  ;;  %3157 = vmatmul.msk.f32.gmra.mxu1 %vm181_vm6, %v344_v63 }
 0x285   :  { %v1196_v33 = vmax.f32 %v4027_v21, %v4029_v24  ;;  %v743_v63 = vpop.trf.xlu1 }
 0x287   :  { %1107 = vmax.xlane.f32.xlu1 %v1106_v25 }
 0x288   :  { %v4034_v31 = vpop.f32.mrf.mxu0  ;;  %v4036_v32 = vpop.f32.mrf.mxu1 }
 0x289   :  { %3188 = vmatmul.msk.f32.gmra.mxu2 %vm181_vm6, %v740_v49  ;;  %3221 = vmatmul.msk.f32.gmra.mxu3 %vm181_vm6, %v740_v49  ;;  %v1112_v56 = vmax.f32 %v4034_v31, %v4036_v32 }
 0x28b   :  { %1197 = vmax.xlane.f32.xlu0 %v1196_v33  ;;  %3125 = vmatmul.msk.f32.gmra.mxu0 %vm181_vm6, %v345_v20  ;;  %v347_v33 = vpop.trf.xlu0 }
 0x28c   :  { %v4043_v42 = vpop.f32.mrf.mxu2  ;;  %v4045_v43 = vpop.f32.mrf.mxu3  ;;  %3158 = vmatmul.msk.f32.gmra.mxu1 %vm181_vm6, %v345_v20 }
 0x28d   :  { %v1199_v25 = vmax.f32 %v4043_v42, %v4045_v43 }
 0x28f   :  { %1113 = vmax.xlane.f32.xlu1 %v1112_v56 }
 0x290   :  { %v4050_v11 = vpop.f32.mrf.mxu0  ;;  %v4052_v49 = vpop.f32.mrf.mxu1 }
 0x291   :  { %3189 = vmatmul.msk.f32.gmra.mxu2 %vm181_vm6, %v741_v4  ;;  %3222 = vmatmul.msk.f32.gmra.mxu3 %vm181_vm6, %v741_v4  ;;  %v1115_v12 = vmax.f32 %v4050_v11, %v4052_v49 }
 0x293   :  { %1116 = vmax.xlane.f32.xlu0 %v1115_v12  ;;  %3126 = vmatmul.msk.f32.gmra.mxu0 %vm181_vm6, %v346_v48  ;;  %v744_v12 = vpop.trf.xlu1  ;;  %v348_v36 = vpop.trf.xlu0 }
 0x294   :  { %v4059_v17 = vpop.f32.mrf.mxu2  ;;  %v4061_v20 = vpop.f32.mrf.mxu3  ;;  %3159 = vmatmul.msk.f32.gmra.mxu1 %vm181_vm6, %v346_v48 }
 0x295   :  { %v1202_v48 = vmax.f32 %v4059_v17, %v4061_v20 }
 0x297   :  { %1200 = vmax.xlane.f32.xlu1 %v1199_v25 }
 0x298   :  { %v4066_v56 = vpop.f32.mrf.mxu0  ;;  %v4068_v4 = vpop.f32.mrf.mxu1 }
 0x299   :  { %3190 = vmatmul.msk.f32.gmra.mxu2 %vm181_vm6, %v742_v30  ;;  %3223 = vmatmul.msk.f32.gmra.mxu3 %vm181_vm6, %v742_v30 }
 0x29b   :  { %3127 = vmatmul.msk.f32.gmra.mxu0 %vm181_vm6, %v347_v33  ;;  %v745_v3 = vpop.trf.xlu1 }
 0x29c   :  { %v4073_v53 = vpop.f32.mrf.mxu2  ;;  %v4075_v54 = vpop.f32.mrf.mxu3  ;;  %3160 = vmatmul.msk.f32.gmra.mxu1 %vm181_vm6, %v347_v33 }
 0x29d   :  { %v1205_v22 = vmax.f32 %v4073_v53, %v4075_v54 }
 0x29f   :  { %1203 = vmax.xlane.f32.xlu1 %v1202_v48  ;;  %v1118_v48 = vmax.f32 %v4066_v56, %v4068_v4 }
 0x2a0   :  { %v4080_v25 = vpop.f32.mrf.mxu0  ;;  %v4082_v35 = vpop.f32.mrf.mxu1 }
 0x2a1   :  { %3191 = vmatmul.msk.f32.gmra.mxu2 %vm181_vm6, %v743_v63  ;;  %3224 = vmatmul.msk.f32.gmra.mxu3 %vm181_vm6, %v743_v63  ;;  %v1121_v30 = vmax.f32 %v4080_v25, %v4082_v35 }
 0x2a3   :  { %1122 = vmax.xlane.f32.xlu0 %v1121_v30  ;;  %3128 = vmatmul.msk.f32.gmra.mxu0 %vm181_vm6, %v348_v36 }
 0x2a4   :  { %v4089_v33 = vpop.f32.mrf.mxu2  ;;  %v4091_v0 = vpop.f32.mrf.mxu3  ;;  %3161 = vmatmul.msk.f32.gmra.mxu1 %vm181_vm6, %v348_v36 }
 0x2a5   :  { %v746_v36 = vpop.trf.xlu1  ;;  %v1208_v6 = vmax.f32 %v4089_v33, %v4091_v0 }
 0x2a7   :  { %1119 = vmax.xlane.f32.xlu1 %v1118_v48 }
 0x2a8   :  { %v4096_v29 = vpop.f32.mrf.mxu0 }
 0x2a9   :  { %7220 = vst [vmem:[#allocation42_spill] sm:$0xff] %v4096_v29  ;;  %v4098_v63 = vpop.f32.mrf.mxu1  ;;  %3192 = vmatmul.msk.f32.gmra.mxu2 %vm181_vm6, %v744_v12  ;;  %3225 = vmatmul.msk.f32.gmra.mxu3 %vm181_vm6, %v744_v12 }
 0x2aa   :  { %7221 = vst [vmem:[#allocation43_spill] sm:$0xff] %v4098_v63  ;;  %v1124_v46 = vmax.f32 %v4096_v29, %v4098_v63 }
 0x2ac   :  { %v4102_v30 = vpop.f32.mrf.mxu2  ;;  %v4104_v28 = vpop.f32.mrf.mxu3 }
 0x2ad   :  { %v1211_v63 = vmax.f32 %v4102_v30, %v4104_v28 }
 0x2af   :  { %1206 = vmax.xlane.f32.xlu1 %v1205_v22 }
 0x2b0   :  { %v4108_v23 = vpop.f32.mrf.mxu0 }
 0x2b1   :  { %7222 = vst [vmem:[#allocation44_spill] sm:$0xff] %v4108_v23  ;;  %v4110_v48 = vpop.f32.mrf.mxu1  ;;  %3193 = vmatmul.msk.f32.gmra.mxu2 %vm181_vm6, %v745_v3  ;;  %3226 = vmatmul.msk.f32.gmra.mxu3 %vm181_vm6, %v745_v3  ;;  %v4130_v3 = vpop.xlane.xlu0 %1077 }
 0x2b2   :  { %7223 = vst [vmem:[#allocation45_spill] sm:$0xff] %v4110_v48  ;;  %v1127_v12 = vmax.f32 %v4108_v23, %v4110_v48 }
 0x2b4   :  { %1128 = vmax.xlane.f32.xlu0 %v1127_v12  ;;  %v4116_v15 = vpop.f32.mrf.mxu2  ;;  %v4118_v16 = vpop.f32.mrf.mxu3 }
 0x2b5   :  { %v1214_v8 = vmax.f32 %v4116_v15, %v4118_v16 }
 0x2b7   :  { %1209 = vmax.xlane.f32.xlu1 %v1208_v6  ;;  %v4122_v22 = vpop.xlane.xlu1 %1080 }
 0x2b8   :  { %7224 = vst [vmem:[#allocation46_spill] sm:$0xff] %v4122_v22  ;;  %v4124_v7 = vpop.f32.mrf.mxu0 }
 0x2b9   :  { %7225 = vst [vmem:[#allocation47_spill] sm:$0xff] %v4124_v7  ;;  %v4126_v62 = vpop.f32.mrf.mxu1  ;;  %3194 = vmatmul.msk.f32.gmra.mxu2 %vm181_vm6, %v746_v36  ;;  %3227 = vmatmul.msk.f32.gmra.mxu3 %vm181_vm6, %v746_v36  ;;  %v4144_v48 = vpop.xlane.xlu0 %1086 }
 0x2ba   :  { %7226 = vst [vmem:[#allocation48_spill] sm:$0xff] %v4126_v62 }
 0x2bb   :  { %7230 = vst [vmem:[#allocation52_spill] sm:$0xff] %v4144_v48 }
 0x2bc   :  { %v4132_v12 = vpop.f32.mrf.mxu2  ;;  %v4134_v61 = vpop.f32.mrf.mxu3 }
 0x2bf   :  { %v4138_v6 = vpop.xlane.xlu1 %1173  ;;  %1125 = vmax.xlane.f32.xlu1 %v1124_v46 }
 0x2c0   :  { %7227 = vst [vmem:[#allocation49_spill] sm:$0xff] %v4138_v6  ;;  %v4140_v45 = vpop.f32.mrf.mxu0 }
 0x2c1   :  { %7228 = vst [vmem:[#allocation50_spill] sm:$0xff] %v4140_v45  ;;  %v4142_v22 = vpop.f32.mrf.mxu1 }
 0x2c2   :  { %7229 = vst [vmem:[#allocation51_spill] sm:$0xff] %v4142_v22  ;;  %v1133_v36 = vmax.f32 %v4140_v45, %v4142_v22 }
 0x2c4   :  { %1134 = vmax.xlane.f32.xlu0 %v1133_v36  ;;  %v4148_v23 = vpop.f32.mrf.mxu2  ;;  %v4150_v55 = vpop.f32.mrf.mxu3 }
 0x2c5   :  { %7231 = vst [vmem:[#allocation53_spill] sm:$0xff] %v4148_v23  ;;  %v1220_v22 = vmax.f32 %v4148_v23, %v4150_v55 }
 0x2c6   :  { %7232 = vst [vmem:[#allocation54_spill] sm:$0xff] %v4150_v55  ;;  %v4160_v52 = vpop.xlane.xlu0 %1092 }
 0x2c7   :  { %1212 = vmax.xlane.f32.xlu1 %v1211_v63  ;;  %v4154_v6 = vpop.xlane.xlu1 %1089  ;;  %7234 = vst [vmem:[#allocation56_spill] sm:$0xff] %v4160_v52 }
 0x2c8   :  { %7233 = vst [vmem:[#allocation55_spill] sm:$0xff] %v4154_v6  ;;  %v4156_v46 = vpop.f32.mrf.mxu0 }
 0x2c9   :  { %v4158_v29 = vpop.f32.mrf.mxu1 }
 0x2ca   :  { %v1136_v58 = vmax.f32 %v4156_v46, %v4158_v29 }
 0x2cc   :  { %1221 = vmax.xlane.f32.xlu0 %v1220_v22  ;;  %v4164_v36 = vpop.f32.mrf.mxu2  ;;  %v4166_v45 = vpop.f32.mrf.mxu3 }
 0x2cd   :  { %7235 = vst [vmem:[#allocation57_spill] sm:$0xff] %v4164_v36 }
 0x2ce   :  { %7236 = vst [vmem:[#allocation58_spill] sm:$0xff] %v4166_v45 }
 0x2cf   :  { %1215 = vmax.xlane.f32.xlu1 %v1214_v8  ;;  %v1096_v41 = vpop.xlane.xlu1 %1095  ;;  %v1130_v8 = vmax.f32 %v4124_v7, %v4126_v62 }
 0x2d0   :  { %v4170_v63 = vpop.f32.mrf.mxu0 }
 0x2d1   :  { %v4172_v5 = vpop.f32.mrf.mxu1 }
 0x2d2   :  { %v4174_v38 = vpop.xlane.xlu0 %1182  ;;  %v1139_v2 = vmax.f32 %v4170_v63, %v4172_v5 }
 0x2d3   :  { %7237 = vst [vmem:[#allocation59_spill] sm:$0xff] %v4174_v38 }
 0x2d4   :  { %1140 = vmax.xlane.f32.xlu0 %v1139_v2  ;;  %v4178_v22 = vpop.f32.mrf.mxu2  ;;  %v4180_v55 = vpop.f32.mrf.mxu3 }
 0x2d5   :  { %7238 = vst [vmem:[#allocation60_spill] sm:$0xff] %v4178_v22  ;;  %v1226_v23 = vmax.f32 %v4178_v22, %v4180_v55 }
 0x2d6   :  { %7239 = vst [vmem:[#allocation61_spill] sm:$0xff] %v4180_v55 }
 0x2d7   :  { %1227 = vmax.xlane.f32.xlu2 %v1226_v23  ;;  %1131 = vmax.xlane.f32.xlu1 %v1130_v8 }
 0x2d8   :  { %v4186_v1 = vpop.f32.mrf.mxu0 }
 0x2d9   :  { %v4188_v6 = vpop.f32.mrf.mxu1 }
 0x2da   :  { %v4190_v38 = vpop.xlane.xlu1 %1185  ;;  %v1099_v10 = vpop.xlane.xlu0 %1098  ;;  %v1142_v2 = vmax.f32 %v4186_v1, %v4188_v6 }
 0x2db   :  { %7240 = vst [vmem:[#allocation62_spill] sm:$0xff] %v4190_v38  ;;  %v1282_v9 = vsub.f32 %v3956_v26, %v1099_v10  ;;  %v1283_v52 = vsub.f32 %v3958_v27, %v1099_v10  ;;  %v1217_v38 = vmax.f32 %v4132_v12, %v4134_v61 }
 0x2dc   :  { %1143 = vmax.xlane.f32.xlu0 %v1142_v2  ;;  %v4196_v55 = vpop.f32.mrf.mxu2  ;;  %v4198_v22 = vpop.f32.mrf.mxu3 }
 0x2dd   :  { %7241 = vst [vmem:[#allocation63_spill] sm:$0xff] %v4196_v55  ;;  %v1424_v23 = vmul.f32 1.442695, %v1282_v9  ;;  %v1229_v8 = vmax.f32 %v4196_v55, %v4198_v22  ;;  %v1426_v62 = vmul.f32 1.442695, %v1283_v52  ;;  %v1280_v9 = vsub.f32 %v3940_v18, %v1096_v41 }
 0x2de   :  { %7242 = vst [vmem:[#allocation64_spill] sm:$0xff] %v4198_v22  ;;  %v1281_v52 = vsub.f32 %v3942_v19, %v1096_v41 }
 0x2df   :  { %1230 = vmax.xlane.f32.xlu2 %v1229_v8  ;;  %1218 = vmax.xlane.f32.xlu1 %v1217_v38  ;;  %3241 = vpow2.f32 %v1424_v23 }
 0x2e0   :  { %v4204_v7 = vpop.f32.mrf.mxu0  ;;  %3243 = vpow2.f32 %v1426_v62 }
 0x2e1   :  { %v4206_v26 = vpop.f32.mrf.mxu1 }
 0x2e2   :  { %v1102_v10 = vpop.xlane.xlu1 %1101  ;;  %v1145_v27 = vmax.f32 %v4204_v7, %v4206_v26 }
 0x2e3   :  { %v1284_v2 = vsub.f32 %v3972_v34, %v1102_v10  ;;  %v1285_v22 = vsub.f32 %v3974_v37, %v1102_v10  ;;  %v1420_v34 = vmul.f32 1.442695, %v1280_v9  ;;  %v1422_v37 = vmul.f32 1.442695, %v1281_v52 }
 0x2e4   :  { %1146 = vmax.xlane.f32.xlu0 %v1145_v27  ;;  %v4214_v38 = vpop.f32.mrf.mxu2  ;;  %v4216_v8 = vpop.f32.mrf.mxu3 }
 0x2e5   :  { %7243 = vst [vmem:[#allocation65_spill] sm:$0xff] %v4214_v38  ;;  %v1428_v23 = vmul.f32 1.442695, %v1284_v2  ;;  %v1430_v55 = vmul.f32 1.442695, %v1285_v22  ;;  %v1232_v62 = vmax.f32 %v4214_v38, %v4216_v8  ;;  %v4222_v18 = vpop.eup %3241 }
 0x2e6   :  { %7244 = vst [vmem:[#allocation66_spill] sm:$0xff] %v4216_v8  ;;  %v4224_v19 = vpop.eup %3243  ;;  %v1105_v41 = vpop.xlane.xlu0 %1104 }
 0x2e7   :  { %7245 = vst [vmem:[#allocation67_spill] sm:$0xff] %v4222_v18  ;;  %3245 = vpow2.f32 %v1428_v23  ;;  %1233 = vmax.xlane.f32.xlu2 %v1232_v62  ;;  %1137 = vmax.xlane.f32.xlu1 %v1136_v58  ;;  %v1673_v2 = vadd.f32 %v4224_v19, %v4222_v18  ;;  %v1286_v9 = vsub.f32 %v3986_v44, %v1105_v41 }
 0x2e8   :  { %7246 = vst [vmem:[#allocation68_spill] sm:$0xff] %v4224_v19  ;;  %3247 = vpow2.f32 %v1430_v55  ;;  %v4226_v10 = vpop.f32.mrf.mxu0  ;;  %v1287_v58 = vsub.f32 %v3988_v47, %v1105_v41  ;;  %v1223_v62 = vmax.f32 %v4164_v36, %v4166_v45 }
 0x2e9   :  { %v4228_v22 = vpop.f32.mrf.mxu1  ;;  %3249 = vpow2.f32 %v1420_v34  ;;  %v1432_v38 = vmul.f32 1.442695, %v1286_v9 }
 0x2ea   :  { %v4230_v27 = vpop.xlane.xlu1 %1188  ;;  %3251 = vpow2.f32 %v1422_v37  ;;  %v1434_v34 = vmul.f32 1.442695, %v1287_v58  ;;  %v1148_v47 = vmax.f32 %v4226_v10, %v4228_v22 }
 0x2eb   :  { %7247 = vst [vmem:[#allocation69_spill] sm:$0xff] %v4230_v27  ;;  %3253 = vpow2.f32 %v1432_v38 }
 0x2ec   :  { %1674 = vadd.xlane.f32.xlu0 %v1673_v2  ;;  %v4236_v23 = vpop.f32.mrf.mxu2  ;;  %v4238_v55 = vpop.f32.mrf.mxu3  ;;  %3255 = vpow2.f32 %v1434_v34 }
 0x2ed   :  { %7248 = vst [vmem:[#allocation70_spill] sm:$0xff] %v4236_v23  ;;  %v4240_v52 = vpop.eup %3245 }
 0x2ee   :  { %7249 = vst [vmem:[#allocation71_spill] sm:$0xff] %v4238_v55  ;;  %v4244_v8 = vpop.eup %3247 }
 0x2ef   :  { %7250 = vst [vmem:[#allocation72_spill] sm:$0xff] %v4240_v52  ;;  %1224 = vmax.xlane.f32.xlu1 %v1223_v62  ;;  %v1676_v44 = vadd.f32 %v4244_v8, %v4240_v52  ;;  %v4252_v41 = vpop.eup %3249 }
 0x2f0   :  { %7251 = vst [vmem:[#allocation73_spill] sm:$0xff] %v4244_v8  ;;  %v4250_v37 = vpop.f32.mrf.mxu0  ;;  %v4256_v19 = vpop.eup %3251 }
 0x2f1   :  { %7252 = vst [vmem:[#allocation74_spill] sm:$0xff] %v4252_v41  ;;  %1677 = vadd.xlane.f32.xlu2 %v1676_v44  ;;  %v4254_v2 = vpop.f32.mrf.mxu1  ;;  %v1670_v62 = vadd.f32 %v4256_v19, %v4252_v41  ;;  %v4270_v52 = vpop.eup %3253 }
 0x2f2   :  { %7253 = vst [vmem:[#allocation75_spill] sm:$0xff] %v4256_v19  ;;  %v4258_v45 = vpop.xlane.xlu1 %1191  ;;  %v1235_v19 = vmax.f32 %v4236_v23, %v4238_v55 }
 0x2f3   :  { %7254 = vst [vmem:[#allocation76_spill] sm:$0xff] %v4258_v45  ;;  %v4274_v45 = vpop.eup %3255 }
 0x2f4   :  { %1149 = vmax.xlane.f32.xlu0 %v1148_v47  ;;  %v4260_v9 = vpop.f32.mrf.mxu2  ;;  %v4262_v58 = vpop.f32.mrf.mxu3  ;;  %7255 = vst [vmem:[#allocation77_spill] sm:$0xff] %v4270_v52 }
 0x2f5   :  { %7256 = vst [vmem:[#allocation78_spill] sm:$0xff] %v4274_v45 }
 0x2f6   :  { %v1111_v36 = vpop.xlane.xlu0 %1110 }
 0x2f7   :  { %v1290_v18 = vsub.f32 %v4018_v13, %v1111_v36  ;;  %v1291_v44 = vsub.f32 %v4020_v14, %v1111_v36  ;;  %1671 = vadd.xlane.f32.xlu1 %v1670_v62 }
 0x2f8   :  { %v4268_v8 = vpop.f32.mrf.mxu0 }
 0x2f9   :  { %v1440_v38 = vmul.f32 1.442695, %v1290_v18  ;;  %v1442_v34 = vmul.f32 1.442695, %v1291_v44  ;;  %v4272_v47 = vpop.f32.mrf.mxu1  ;;  %v1679_v18 = vadd.f32 %v4274_v45, %v4270_v52  ;;  %v1238_v52 = vmax.f32 %v4260_v9, %v4262_v58 }
 0x2fa   :  { %v1108_v27 = vpop.xlane.xlu1 %1107 }
 0x2fb   :  { %3257 = vpow2.f32 %v1440_v38  ;;  %v1288_v44 = vsub.f32 %v4002_v59, %v1108_v27  ;;  %v1151_v38 = vmax.f32 %v4250_v37, %v4254_v2  ;;  %v1289_v41 = vsub.f32 %v4004_v60, %v1108_v27 }
 0x2fc   :  { %3259 = vpow2.f32 %v1442_v34  ;;  %1236 = vmax.xlane.f32.xlu0 %v1235_v19  ;;  %v4278_v13 = vpop.f32.mrf.mxu2  ;;  %v4280_v14 = vpop.f32.mrf.mxu3 }
 0x2fd   :  { %v1241_v36 = vmax.f32 %v4278_v13, %v4280_v14  ;;  %v1436_v45 = vmul.f32 1.442695, %v1288_v44  ;;  %v1154_v44 = vmax.f32 %v4268_v8, %v4272_v47 }
 0x2fe   :  { %v1198_v62 = vpop.xlane.xlu0 %1197 }
 0x2ff   :  { %1242 = vmax.xlane.f32.xlu2 %v1241_v36  ;;  %1680 = vadd.xlane.f32.xlu1 %v1679_v18  ;;  %v1438_v18 = vmul.f32 1.442695, %v1289_v41  ;;  %3261 = vpow2.f32 %v1436_v45 }
 0x300   :  { %v4289_v34 = vpop.f32.mrf.mxu0 }
 0x301   :  { %v4291_v19 = vpop.eup %3257  ;;  %v4294_v55 = vpop.f32.mrf.mxu1  ;;  %3263 = vpow2.f32 %v1438_v18  ;;  %v1348_v18 = vsub.f32 %v4027_v21, %v1198_v62 }
 0x302   :  { %7257 = vst [vmem:[#allocation79_spill] sm:$0xff] %v4291_v19  ;;  %v4296_v23 = vpop.eup %3259  ;;  %v4298_v57 = vpop.xlane.xlu1 %1113 }
 0x303   :  { %7258 = vst [vmem:[#allocation80_spill] sm:$0xff] %v4296_v23  ;;  %v1685_v48 = vadd.f32 %v4296_v23, %v4291_v19  ;;  %v1556_v19 = vmul.f32 1.442695, %v1348_v18 }
 0x304   :  { %1152 = vmax.xlane.f32.xlu0 %v1151_v38  ;;  %v4300_v36 = vpop.f32.mrf.mxu2  ;;  %v4302_v59 = vpop.f32.mrf.mxu3 }
 0x305   :  { %7259 = vst [vmem:[#allocation81_spill] sm:$0xff] %v4300_v36 }
 0x306   :  { %7260 = vst [vmem:[#allocation82_spill] sm:$0xff] %v4302_v59  ;;  %v1117_v60 = vpop.xlane.xlu0 %1116 }
 0x307   :  { %v1294_v27 = vsub.f32 %v4050_v11, %v1117_v60  ;;  %v1295_v51 = vsub.f32 %v4052_v49, %v1117_v60  ;;  %1239 = vmax.xlane.f32.xlu1 %v1238_v52  ;;  %1686 = vadd.xlane.f32.xlu2 %v1685_v48  ;;  %v4326_v52 = vpop.eup %3261 }
 0x308   :  { %v4312_v38 = vpop.f32.mrf.mxu0  ;;  %7261 = vst [vmem:[#allocation83_spill] sm:$0xff] %v4326_v52  ;;  %v4329_v60 = vpop.eup %3263 }
 0x309   :  { %v1448_v41 = vmul.f32 1.442695, %v1294_v27  ;;  %v1450_v50 = vmul.f32 1.442695, %v1295_v51  ;;  %v4314_v40 = vpop.f32.mrf.mxu1  ;;  %v1244_v51 = vmax.f32 %v4300_v36, %v4302_v59  ;;  %7262 = vst [vmem:[#allocation84_spill] sm:$0xff] %v4329_v60  ;;  %v1682_v21 = vadd.f32 %v4329_v60, %v4326_v52 }
 0x30a   :  { %v1201_v39 = vpop.xlane.xlu1 %1200  ;;  %v1160_v11 = vmax.f32 %v4312_v38, %v4314_v40 }
 0x30b   :  { %3265 = vpow2.f32 %v1448_v41  ;;  %v1350_v23 = vsub.f32 %v4043_v42, %v1201_v39  ;;  %v1351_v45 = vsub.f32 %v4045_v43, %v1201_v39 }
 0x30c   :  { %3267 = vpow2.f32 %v1450_v50  ;;  %1155 = vmax.xlane.f32.xlu0 %v1154_v44  ;;  %v4320_v49 = vpop.f32.mrf.mxu2  ;;  %v4322_v48 = vpop.f32.mrf.mxu3  ;;  %v1349_v50 = vsub.f32 %v4029_v24, %v1198_v62 }
 0x30d   :  { %v1560_v42 = vmul.f32 1.442695, %v1350_v23  ;;  %v1562_v39 = vmul.f32 1.442695, %v1351_v45  ;;  %v1247_v18 = vmax.f32 %v4320_v49, %v4322_v48 }
 0x30e   :  { %v1558_v24 = vmul.f32 1.442695, %v1349_v50 }
 0x30f   :  { %1161 = vmax.xlane.f32.xlu1 %v1160_v11  ;;  %1245 = vmax.xlane.f32.xlu2 %v1244_v51  ;;  %3269 = vpow2.f32 %v1560_v42  ;;  %v1293_v42 = vsub.f32 %v4036_v32, %v4298_v57 }
 0x310   :  { %v4332_v43 = vpop.f32.mrf.mxu0  ;;  %3271 = vpow2.f32 %v1562_v39 }
 0x311   :  { %v4334_v27 = vpop.eup %3265  ;;  %v4336_v44 = vpop.f32.mrf.mxu1  ;;  %3273 = vpow2.f32 %v1556_v19 }
 0x312   :  { %7263 = vst [vmem:[#allocation85_spill] sm:$0xff] %v4334_v27  ;;  %v4338_v41 = vpop.eup %3267  ;;  %v1204_v59 = vpop.xlane.xlu1 %1203  ;;  %v1163_v52 = vmax.f32 %v4332_v43, %v4336_v44 }
 0x313   :  { %7264 = vst [vmem:[#allocation86_spill] sm:$0xff] %v4338_v41  ;;  %v1352_v23 = vsub.f32 %v4059_v17, %v1204_v59  ;;  %v1353_v11 = vsub.f32 %v4061_v20, %v1204_v59  ;;  %v1691_v60 = vadd.f32 %v4338_v41, %v4334_v27  ;;  %v1292_v17 = vsub.f32 %v4034_v31, %v4298_v57  ;;  %v4401_v41 = vpop.xlane.xlu2 %1083 }
 0x314   :  { %1683 = vadd.xlane.f32.xlu0 %v1682_v21  ;;  %v4344_v62 = vpop.f32.mrf.mxu2  ;;  %v4346_v36 = vpop.f32.mrf.mxu3 }
 0x315   :  { %v1564_v45 = vmul.f32 1.442695, %v1352_v23  ;;  %v1566_v51 = vmul.f32 1.442695, %v1353_v11  ;;  %v4356_v59 = vpop.eup %3269  ;;  %v1444_v31 = vmul.f32 1.442695, %v1292_v17 }
 0x316   :  { %7265 = vst [vmem:[#allocation87_spill] sm:$0xff] %v4356_v59  ;;  %v4362_v39 = vpop.eup %3271  ;;  %v1446_v11 = vmul.f32 1.442695, %v1293_v42 }
 0x317   :  { %3275 = vpow2.f32 %v1564_v45  ;;  %1248 = vmax.xlane.f32.xlu2 %v1247_v18  ;;  %1692 = vadd.xlane.f32.xlu1 %v1691_v60  ;;  %7266 = vst [vmem:[#allocation88_spill] sm:$0xff] %v4362_v39  ;;  %v1157_v60 = vmax.f32 %v4289_v34, %v4294_v55  ;;  %v4366_v21 = vpop.eup %3273 }
 0x318   :  { %3277 = vpow2.f32 %v1566_v51  ;;  %v4354_v20 = vpop.f32.mrf.mxu0  ;;  %7267 = vst [vmem:[#allocation89_spill] sm:$0xff] %v4366_v21 }
 0x319   :  { %3279 = vpow2.f32 %v1558_v24  ;;  %v4360_v50 = vpop.f32.mrf.mxu1  ;;  %v1775_v24 = vadd.f32 %v4362_v39, %v4356_v59 }
 0x31a   :  { %v1120_v19 = vpop.xlane.xlu1 %1119  ;;  %3281 = vpow2.f32 %v1444_v31 }
 0x31b   :  { %3283 = vpow2.f32 %v1446_v11  ;;  %v1296_v59 = vsub.f32 %v4066_v56, %v1120_v19 }
 0x31c   :  { %1158 = vmax.xlane.f32.xlu0 %v1157_v60  ;;  %v4374_v57 = vpop.f32.mrf.mxu2  ;;  %v4378_v51 = vpop.f32.mrf.mxu3 }
 0x31d   :  { %v4368_v23 = vpop.eup %3275 }
 0x31e   :  { %7268 = vst [vmem:[#allocation90_spill] sm:$0xff] %v4368_v23  ;;  %v4372_v45 = vpop.eup %3277 }
 0x31f   :  { %7269 = vst [vmem:[#allocation91_spill] sm:$0xff] %v4372_v45  ;;  %v4376_v32 = vpop.eup %3279  ;;  %1776 = vadd.xlane.f32.xlu2 %v1775_v24  ;;  %v1778_v18 = vadd.f32 %v4372_v45, %v4368_v23  ;;  %v1297_v24 = vsub.f32 %v4068_v4, %v1120_v19  ;;  %v1123_v45 = vpop.xlane.xlu0 %1122  ;;  %v1452_v23 = vmul.f32 1.442695, %v1296_v59 }
 0x320   :  { %7270 = vst [vmem:[#allocation92_spill] sm:$0xff] %v4376_v32  ;;  %v4382_v17 = vpop.f32.mrf.mxu0  ;;  %v1772_v60 = vadd.f32 %v4376_v32, %v4366_v21  ;;  %v4394_v11 = vpop.eup %3281 }
 0x321   :  { %1779 = vadd.xlane.f32.xlu1 %v1778_v18  ;;  %v4386_v39 = vpop.f32.mrf.mxu1  ;;  %7271 = vst [vmem:[#allocation93_spill] sm:$0xff] %v4394_v11  ;;  %v4396_v18 = vpop.eup %3283  ;;  %v1454_v32 = vmul.f32 1.442695, %v1297_v24  ;;  %3285 = vpow2.f32 %v1452_v23 }
 0x322   :  { %v1207_v42 = vpop.xlane.xlu1 %1206  ;;  %v1169_v31 = vmax.f32 %v4382_v17, %v4386_v39  ;;  %7272 = vst [vmem:[#allocation94_spill] sm:$0xff] %v4396_v18  ;;  %v1688_v27 = vadd.f32 %v4396_v18, %v4394_v11  ;;  %v4417_v18 = vpop.xlane.xlu2 %1176 }
 0x323   :  { %v1354_v21 = vsub.f32 %v4073_v53, %v1207_v42  ;;  %v1355_v4 = vsub.f32 %v4075_v54, %v1207_v42  ;;  %3287 = vpow2.f32 %v1454_v32  ;;  %v1250_v53 = vmax.f32 %v4344_v62, %v4346_v36  ;;  %7275 = vst [vmem:[#allocation97_spill] sm:$0xff] %v4417_v18 }
 0x324   :  { %1773 = vadd.xlane.f32.xlu0 %v1772_v60  ;;  %v4399_v56 = vpop.f32.mrf.mxu2  ;;  %v4404_v19 = vpop.f32.mrf.mxu3  ;;  %v1298_v54 = vsub.f32 %v4080_v25, %v1123_v45  ;;  %v1166_v42 = vmax.f32 %v4354_v20, %v4360_v50 }
 0x325   :  { %7273 = vst [vmem:[#allocation95_spill] sm:$0xff] %v4404_v19  ;;  %v1568_v59 = vmul.f32 1.442695, %v1354_v21  ;;  %v1299_v21 = vsub.f32 %v4082_v35, %v1123_v45 }
 0x326   :  { %v1456_v25 = vmul.f32 1.442695, %v1298_v54 }
 0x327   :  { %1164 = vmax.xlane.f32.xlu2 %v1163_v52  ;;  %v1570_v52 = vmul.f32 1.442695, %v1355_v4  ;;  %v4410_v24 = vpop.xlane.xlu0 %1128  ;;  %3289 = vpow2.f32 %v1568_v59  ;;  %v1458_v59 = vmul.f32 1.442695, %v1299_v21 }
 0x329   :  { %1170 = vmax.xlane.f32.xlu1 %v1169_v31  ;;  %v4415_v31 = vpop.eup %3285  ;;  %3291 = vpow2.f32 %v1570_v52 }
 0x32a   :  { %v1210_v60 = vpop.xlane.xlu1 %1209  ;;  %7274 = vst [vmem:[#allocation96_spill] sm:$0xff] %v4415_v31  ;;  %3293 = vpow2.f32 %v1456_v25 }
 0x32b   :  { %3295 = vpow2.f32 %v1458_v59  ;;  %v1356_v54 = vsub.f32 %v4089_v33, %v1210_v60 }
 0x32c   :  { %1689 = vadd.xlane.f32.xlu0 %v1688_v27  ;;  %v4420_v27 = vpop.eup %3287  ;;  %v4422_v23 = vpop.f32.mrf.mxu2 }
 0x32d   :  { %7276 = vst [vmem:[#allocation98_spill] sm:$0xff] %v4420_v27  ;;  %v4426_v4 = vpop.f32.mrf.mxu3  ;;  %v4430_v11 = vpop.eup %3289 }
 0x32e   :  { %7278 = vst [vmem:[#allocation100_spill] sm:$0xff] %v4430_v11 }
 0x32f   :  { %1251 = vmax.xlane.f32.xlu2 %v1250_v53  ;;  %v1694_v53 = vadd.f32 %v4420_v27, %v4415_v31  ;;  %v4432_v18 = vpop.eup %3291  ;;  %v4441_v27 = vpop.xlane.xlu2 %1179  ;;  %v1357_v31 = vsub.f32 %v4091_v0, %v1210_v60 }
 0x330   :  { %7279 = vst [vmem:[#allocation101_spill] sm:$0xff] %v4432_v18  ;;  %v1781_v52 = vadd.f32 %v4432_v18, %v4430_v11  ;;  %v1253_v18 = vmax.f32 %v4374_v57, %v4378_v51  ;;  %v4450_v11 = vpop.eup %3293 }
 0x331   :  { %7280 = vst [vmem:[#allocation102_spill] sm:$0xff] %v4441_v27  ;;  %v4452_v33 = vpop.eup %3295  ;;  %v1574_v0 = vmul.f32 1.442695, %v1357_v31 }
 0x332   :  { %v4424_v32 = vpop.xlane.xlu1 %1125  ;;  %7281 = vst [vmem:[#allocation103_spill] sm:$0xff] %v4450_v11 }
 0x333   :  { %7277 = vst [vmem:[#allocation99_spill] sm:$0xff] %v4424_v32 }
 0x334   :  { %1167 = vmax.xlane.f32.xlu0 %v1166_v42  ;;  %v4444_v32 = vpop.f32.mrf.mxu2  ;;  %7282 = vst [vmem:[#allocation104_spill] sm:$0xff] %v4452_v33 }
 0x337   :  { %v4434_v35 = vpop.xlane.xlu0 %1134  ;;  %1695 = vadd.xlane.f32.xlu2 %v1694_v53  ;;  %v4446_v53 = vpop.f32.mrf.mxu3 }
 0x33a   :  { %v1213_v45 = vpop.xlane.xlu1 %1212 }
 0x33b   :  { %v1358_v42 = vsub.f32 %v4102_v30, %v1213_v45  ;;  %v1359_v21 = vsub.f32 %v4104_v28, %v1213_v45  ;;  %v1572_v30 = vmul.f32 1.442695, %v1356_v54  ;;  %v1697_v45 = vadd.f32 %v4452_v33, %v4450_v11 }
 0x33c   :  { %1782 = vadd.xlane.f32.xlu0 %v1781_v52  ;;  %v4458_v52 = vpop.xlane.xlu2 %1194  ;;  %v1256_v54 = vmax.f32 %v4399_v56, %v4404_v19 }
 0x33d   :  { %v1576_v25 = vmul.f32 1.442695, %v1358_v42  ;;  %v1578_v59 = vmul.f32 1.442695, %v1359_v21 }
 0x33f   :  { %3297 = vpow2.f32 %v1576_v25  ;;  %v4454_v28 = vpop.xlane.xlu0 %1221  ;;  %1254 = vmax.xlane.f32.xlu2 %v1253_v18  ;;  %v4466_v25 = vpop.f32.mrf.mxu2 }
 0x340   :  { %7283 = vst [vmem:[#allocation105_spill] sm:$0xff] %v4454_v28  ;;  %3299 = vpow2.f32 %v1578_v59  ;;  %v4468_v18 = vpop.f32.mrf.mxu3 }
 0x341   :  { %3301 = vpow2.f32 %v1572_v30  ;;  %v1265_v19 = vmax.f32 %v4466_v25, %v4468_v18 }
 0x342   :  { %v1216_v60 = vpop.xlane.xlu1 %1215  ;;  %3303 = vpow2.f32 %v1574_v0 }
 0x344   :  { %1698 = vadd.xlane.f32.xlu0 %v1697_v45 }
 0x345   :  { %v4460_v42 = vpop.eup %3297 }
 0x346   :  { %7284 = vst [vmem:[#allocation106_spill] sm:$0xff] %v4460_v42  ;;  %v4464_v21 = vpop.eup %3299 }
 0x347   :  { %7285 = vst [vmem:[#allocation107_spill] sm:$0xff] %v4464_v21  ;;  %v1141_v31 = vpop.xlane.xlu0 %1140  ;;  %1257 = vmax.xlane.f32.xlu2 %v1256_v54  ;;  %v1787_v59 = vadd.f32 %v4464_v21, %v4460_v42  ;;  %v4474_v45 = vpop.eup %3301  ;;  %v1361_v42 = vsub.f32 %v4118_v16, %v1216_v60 }
 0x348   :  { %v1310_v30 = vsub.f32 %v4170_v63, %v1141_v31  ;;  %v1311_v0 = vsub.f32 %v4172_v5, %v1141_v31  ;;  %7286 = vst [vmem:[#allocation108_spill] sm:$0xff] %v4474_v45  ;;  %v4476_v28 = vpop.eup %3303 }
 0x349   :  { %1788 = vadd.xlane.f32.xlu1 %v1787_v59  ;;  %7287 = vst [vmem:[#allocation109_spill] sm:$0xff] %v4476_v28  ;;  %v1784_v5 = vadd.f32 %v4476_v28, %v4474_v45 }
 0x34a   :  { %v1480_v27 = vmul.f32 1.442695, %v1310_v30  ;;  %v1482_v33 = vmul.f32 1.442695, %v1311_v0  ;;  %v4478_v11 = vpop.xlane.xlu1 %1131  ;;  %v4482_v54 = vpop.xlane.xlu2 %1227  ;;  %v1360_v0 = vsub.f32 %v4116_v15, %v1216_v60 }
 0x34b   :  { %7288 = vst [vmem:[#allocation110_spill] sm:$0xff] %v4478_v11 }
 0x34c   :  { %3305 = vpow2.f32 %v1480_v27  ;;  %7289 = vst [vmem:[#allocation111_spill] sm:$0xff] %v4482_v54  ;;  %1266 = vmax.xlane.f32.xlu0 %v1265_v19  ;;  %v1580_v54 = vmul.f32 1.442695, %v1360_v0  ;;  %v1262_v0 = vmax.f32 %v4444_v32, %v4446_v53 }
 0x34d   :  { %3307 = vpow2.f32 %v1482_v33  ;;  %v1259_v33 = vmax.f32 %v4422_v23, %v4426_v4 }
 0x34f   :  { %v1144_v63 = vpop.xlane.xlu0 %1143  ;;  %1785 = vadd.xlane.f32.xlu2 %v1784_v5 }
 0x350   :  { %v1312_v15 = vsub.f32 %v4186_v1, %v1144_v63 }
 0x352   :  { %v4486_v31 = vpop.eup %3305  ;;  %v1219_v59 = vpop.xlane.xlu1 %1218  ;;  %v1484_v60 = vmul.f32 1.442695, %v1312_v15 }
 0x353   :  { %7290 = vst [vmem:[#allocation112_spill] sm:$0xff] %v4486_v31  ;;  %v4488_v30 = vpop.eup %3307  ;;  %v1362_v21 = vsub.f32 %v4132_v12, %v1219_v59  ;;  %v1363_v27 = vsub.f32 %v4134_v61, %v1219_v59  ;;  %v4498_v28 = vpop.xlane.xlu2 %1230  ;;  %v1582_v12 = vmul.f32 1.442695, %v1361_v42  ;;  %v1313_v61 = vsub.f32 %v4188_v6, %v1144_v63 }
 0x354   :  { %7291 = vst [vmem:[#allocation113_spill] sm:$0xff] %v4488_v30  ;;  %v1715_v19 = vadd.f32 %v4488_v30, %v4486_v31 }
 0x355   :  { %v1584_v5 = vmul.f32 1.442695, %v1362_v21  ;;  %7292 = vst [vmem:[#allocation114_spill] sm:$0xff] %v4498_v28  ;;  %v1586_v45 = vmul.f32 1.442695, %v1363_v27 }
 0x356   :  { %1716 = vadd.xlane.f32.xlu1 %v1715_v19  ;;  %v1486_v21 = vmul.f32 1.442695, %v1313_v61 }
 0x357   :  { %v1147_v11 = vpop.xlane.xlu0 %1146  ;;  %1260 = vmax.xlane.f32.xlu2 %v1259_v33  ;;  %3309 = vpow2.f32 %v1584_v5 }
 0x358   :  { %3311 = vpow2.f32 %v1586_v45  ;;  %v1314_v33 = vsub.f32 %v4204_v7, %v1147_v11  ;;  %v1315_v15 = vsub.f32 %v4206_v26, %v1147_v11 }
 0x359   :  { %3313 = vpow2.f32 %v1580_v54 }
 0x35a   :  { %v1138_v16 = vpop.xlane.xlu1 %1137  ;;  %3315 = vpow2.f32 %v1582_v12 }
 0x35b   :  { %v1308_v59 = vsub.f32 %v4156_v46, %v1138_v16  ;;  %v1309_v27 = vsub.f32 %v4158_v29, %v1138_v16  ;;  %3317 = vpow2.f32 %v1484_v60  ;;  %v4512_v45 = vpop.xlane.xlu2 %1233  ;;  %v1488_v60 = vmul.f32 1.442695, %v1314_v33 }
 0x35c   :  { %3319 = vpow2.f32 %v1486_v21 }
 0x35d   :  { %v4506_v1 = vpop.eup %3309  ;;  %v1476_v42 = vmul.f32 1.442695, %v1308_v59  ;;  %v1478_v46 = vmul.f32 1.442695, %v1309_v27  ;;  %v1490_v59 = vmul.f32 1.442695, %v1315_v15 }
 0x35e   :  { %7293 = vst [vmem:[#allocation115_spill] sm:$0xff] %v4506_v1  ;;  %v4510_v6 = vpop.eup %3311 }
 0x35f   :  { %v4508_v19 = vpop.xlane.xlu0 %1674  ;;  %1263 = vmax.xlane.f32.xlu2 %v1262_v0  ;;  %7294 = vst [vmem:[#allocation116_spill] sm:$0xff] %v4510_v6  ;;  %v4514_v54 = vpop.eup %3313  ;;  %v1793_v29 = vadd.f32 %v4510_v6, %v4506_v1  ;;  %3321 = vpow2.f32 %v1476_v42 }
 0x360   :  { %7295 = vst [vmem:[#allocation117_spill] sm:$0xff] %v4514_v54  ;;  %v4518_v63 = vpop.eup %3315  ;;  %3323 = vpow2.f32 %v1478_v46 }
 0x361   :  { %7296 = vst [vmem:[#allocation118_spill] sm:$0xff] %v4518_v63  ;;  %1794 = vadd.xlane.f32.xlu0 %v1793_v29  ;;  %v4524_v12 = vpop.eup %3317  ;;  %v1790_v61 = vadd.f32 %v4518_v63, %v4514_v54  ;;  %3325 = vpow2.f32 %v1488_v60 }
 0x362   :  { %v4521_v5 = vpop.xlane.xlu1 %1224  ;;  %7298 = vst [vmem:[#allocation120_spill] sm:$0xff] %v4524_v12  ;;  %v4528_v16 = vpop.eup %3319  ;;  %3327 = vpow2.f32 %v1490_v59 }
 0x363   :  { %7297 = vst [vmem:[#allocation119_spill] sm:$0xff] %v4521_v5  ;;  %v1718_v26 = vadd.f32 %v4528_v16, %v4524_v12  ;;  %v7382_v12 = vld [vmem:[#allocation66_spill] sm:$0xff] }
 0x364   :  { %7299 = vst [vmem:[#allocation121_spill] sm:$0xff] %v4528_v16  ;;  %v4538_v42 = vpop.xlane.xlu2 %1677 }
 0x365   :  { %v4532_v0 = vpop.eup %3321 }
 0x366   :  { %7300 = vst [vmem:[#allocation122_spill] sm:$0xff] %v4532_v0  ;;  %v4536_v11 = vpop.eup %3323 }
 0x367   :  { %v1150_v21 = vpop.xlane.xlu0 %1149  ;;  %1791 = vadd.xlane.f32.xlu2 %v1790_v61  ;;  %7301 = vst [vmem:[#allocation123_spill] sm:$0xff] %v4536_v11  ;;  %v4546_v15 = vpop.eup %3325 }
 0x368   :  { %v1316_v7 = vsub.f32 %v4226_v10, %v1150_v21  ;;  %v1317_v27 = vsub.f32 %v4228_v22, %v1150_v21  ;;  %v1712_v10 = vadd.f32 %v4536_v11, %v4532_v0  ;;  %7302 = vst [vmem:[#allocation124_spill] sm:$0xff] %v4546_v15  ;;  %v4548_v61 = vpop.eup %3327 }
 0x369   :  { %1719 = vadd.xlane.f32.xlu0 %v1718_v26  ;;  %7303 = vst [vmem:[#allocation125_spill] sm:$0xff] %v4548_v61  ;;  %v1721_v26 = vadd.f32 %v4548_v61, %v4546_v15 }
 0x36a   :  { %v1492_v46 = vmul.f32 1.442695, %v1316_v7  ;;  %v1494_v29 = vmul.f32 1.442695, %v1317_v27  ;;  %v4540_v33 = vpop.xlane.xlu1 %1671 }
 0x36c   :  { %3329 = vpow2.f32 %v1492_v46 }
 0x36d   :  { %3331 = vpow2.f32 %v1494_v29 }
 0x36f   :  { %v4544_v22 = vpop.xlane.xlu0 %1236  ;;  %1713 = vadd.xlane.f32.xlu2 %v1712_v10 }
 0x372   :  { %v4550_v60 = vpop.eup %3329  ;;  %v1243_v21 = vpop.xlane.xlu2 %1242 }
 0x373   :  { %7304 = vst [vmem:[#allocation126_spill] sm:$0xff] %v4550_v60  ;;  %v4552_v7 = vpop.xlane.xlu1 %1680  ;;  %v4554_v27 = vpop.eup %3331  ;;  %v1378_v63 = vsub.f32 %v4278_v13, %v1243_v21  ;;  %v1379_v16 = vsub.f32 %v4280_v14, %v1243_v21 }
 0x374   :  { %7305 = vst [vmem:[#allocation127_spill] sm:$0xff] %v4554_v27  ;;  %v1724_v59 = vadd.f32 %v4554_v27, %v4550_v60  ;;  %v7361_v60 = vld [vmem:[#allocation51_spill] sm:$0xff] }
 0x375   :  { %v1618_v15 = vmul.f32 1.442695, %v1379_v16 }
 0x376   :  { %1725 = vadd.xlane.f32.xlu1 %v1724_v59 }
 0x377   :  { %v1153_v46 = vpop.xlane.xlu0 %1152  ;;  %1722 = vadd.xlane.f32.xlu2 %v1721_v26 }
 0x378   :  { %v1318_v29 = vsub.f32 %v4250_v37, %v1153_v46  ;;  %v1319_v10 = vsub.f32 %v4254_v2, %v1153_v46  ;;  %v1616_v37 = vmul.f32 1.442695, %v1378_v63 }
 0x37a   :  { %v1496_v54 = vmul.f32 1.442695, %v1318_v29  ;;  %v1498_v11 = vmul.f32 1.442695, %v1319_v10  ;;  %v4563_v6 = vpop.xlane.xlu2 %1686 }
 0x37b   :  { %v1240_v0 = vpop.xlane.xlu1 %1239 }
 0x37c   :  { %v1376_v27 = vsub.f32 %v4260_v9, %v1240_v0  ;;  %v1377_v61 = vsub.f32 %v4262_v58, %v1240_v0  ;;  %3333 = vpow2.f32 %v1496_v54  ;;  %v7308_v0 = vld [vmem:[#allocation12_spill] sm:$0xff] }
 0x37d   :  { %3335 = vpow2.f32 %v1498_v11 }
 0x37e   :  { %v1612_v59 = vmul.f32 1.442695, %v1376_v27  ;;  %v1614_v26 = vmul.f32 1.442695, %v1377_v61  ;;  %v7310_v61 = vld [vmem:[#allocation13_spill] sm:$0xff] }
 0x37f   :  { %v1156_v2 = vpop.xlane.xlu0 %1155  ;;  %v1269_v27 = vsub.f32 %v7310_v61, %v4130_v3 }
 0x380   :  { %3337 = vpow2.f32 %v1612_v59  ;;  %v1320_v13 = vsub.f32 %v4268_v8, %v1156_v2  ;;  %v1321_v46 = vsub.f32 %v4272_v47, %v1156_v2  ;;  %v1268_v8 = vsub.f32 %v7308_v0, %v4130_v3 }
 0x381   :  { %3339 = vpow2.f32 %v1614_v26  ;;  %v1398_v3 = vmul.f32 1.442695, %v1269_v27 }
 0x382   :  { %v4570_v29 = vpop.eup %3333  ;;  %3341 = vpow2.f32 %v1616_v37  ;;  %v1500_v14 = vmul.f32 1.442695, %v1320_v13  ;;  %v1502_v9 = vmul.f32 1.442695, %v1321_v46  ;;  %v4572_v58 = vpop.xlane.xlu2 %1245  ;;  %v1396_v13 = vmul.f32 1.442695, %v1268_v8 }
 0x383   :  { %7306 = vst [vmem:[#allocation128_spill] sm:$0xff] %v4570_v29  ;;  %v1162_v21 = vpop.xlane.xlu1 %1161  ;;  %v4574_v54 = vpop.eup %3335  ;;  %3343 = vpow2.f32 %v1618_v15  ;;  %v7312_v15 = vld [vmem:[#allocation16_spill] sm:$0xff] }
 0x384   :  { %7307 = vst [vmem:[#allocation129_spill] sm:$0xff] %v4574_v54  ;;  %v1324_v63 = vsub.f32 %v4312_v38, %v1162_v21  ;;  %v1325_v16 = vsub.f32 %v4314_v40, %v1162_v21  ;;  %v1727_v47 = vadd.f32 %v4574_v54, %v4570_v29  ;;  %3345 = vpow2.f32 %v1500_v14  ;;  %v7315_v14 = vld [vmem:[#allocation17_spill] sm:$0xff]  ;;  %v7351_v54 = vld [vmem:[#allocation39_spill] sm:$0xff] }
 0x385   :  { %v1272_v59 = vsub.f32 %v7312_v15, %v4401_v41  ;;  %3347 = vpow2.f32 %v1502_v9  ;;  %v1273_v21 = vsub.f32 %v7315_v14, %v4401_v41 }
 0x386   :  { %v4582_v11 = vpop.eup %3337  ;;  %v1508_v38 = vmul.f32 1.442695, %v1324_v63  ;;  %1728 = vadd.xlane.f32.xlu0 %v1727_v47  ;;  %v1510_v40 = vmul.f32 1.442695, %v1325_v16  ;;  %v7317_v16 = vld [vmem:[#allocation52_spill] sm:$0xff] }
 0x387   :  { %7309 = vst [vmem:[#allocation12_spill] sm:$0xff] %v4582_v11  ;;  %v4586_v10 = vpop.eup %3339  ;;  %v4590_v26 = vpop.xlane.xlu0 %1683  ;;  %v1404_v0 = vmul.f32 1.442695, %v1272_v59  ;;  %v7318_v47 = vld [vmem:[#allocation20_spill] sm:$0xff]  ;;  %v1406_v27 = vmul.f32 1.442695, %v1273_v21 }
 0x388   :  { %7311 = vst [vmem:[#allocation13_spill] sm:$0xff] %v4586_v10  ;;  %v1814_v37 = vadd.f32 %v4586_v10, %v4582_v11  ;;  %v4594_v2 = vpop.eup %3341  ;;  %3349 = vpow2.f32 %v1508_v38  ;;  %v1274_v61 = vsub.f32 %v7318_v47, %v7317_v16  ;;  %v7321_v47 = vld [vmem:[#allocation56_spill] sm:$0xff] }
 0x389   :  { %7313 = vst [vmem:[#allocation16_spill] sm:$0xff] %v4594_v2  ;;  %v4596_v46 = vpop.eup %3343  ;;  %3351 = vpow2.f32 %v1510_v40 }
 0x38a   :  { %7314 = vst [vmem:[#allocation130_spill] sm:$0xff] %v4596_v46  ;;  %1815 = vadd.xlane.f32.xlu1 %v1814_v37  ;;  %v1249_v9 = vpop.xlane.xlu2 %1248  ;;  %v4600_v63 = vpop.eup %3345  ;;  %3353 = vpow2.f32 %v1396_v13  ;;  %v1817_v41 = vadd.f32 %v4596_v46, %v4594_v2  ;;  %v7320_v37 = vld [vmem:[#allocation21_spill] sm:$0xff]  ;;  %v1408_v40 = vmul.f32 1.442695, %v1274_v61  ;;  %v7326_v61 = vld [vmem:[#allocation55_spill] sm:$0xff] }
 0x38b   :  { %7316 = vst [vmem:[#allocation17_spill] sm:$0xff] %v4600_v63  ;;  %v1382_v15 = vsub.f32 %v4320_v49, %v1249_v9  ;;  %v1383_v8 = vsub.f32 %v4322_v48, %v1249_v9  ;;  %v4606_v10 = vpop.eup %3347  ;;  %3355 = vpow2.f32 %v1398_v3  ;;  %v1275_v14 = vsub.f32 %v7320_v37, %v7317_v16  ;;  %v7322_v49 = vld [vmem:[#allocation28_spill] sm:$0xff]  ;;  %v7324_v3 = vld [vmem:[#allocation29_spill] sm:$0xff] }
 0x38c   :  { %7319 = vst [vmem:[#allocation52_spill] sm:$0xff] %v4606_v10  ;;  %3357 = vpow2.f32 %v1404_v0  ;;  %v1278_v11 = vsub.f32 %v7322_v49, %v7321_v47  ;;  %v1730_v13 = vadd.f32 %v4606_v10, %v4600_v63  ;;  %v1279_v21 = vsub.f32 %v7324_v3, %v7321_v47  ;;  %v7329_v49 = vld [vmem:[#allocation81_spill] sm:$0xff]  ;;  %v4644_v10 = vpop.xlane.xlu1 %1692 }
 0x38d   :  { %v1624_v59 = vmul.f32 1.442695, %v1382_v15  ;;  %v1626_v38 = vmul.f32 1.442695, %v1383_v8  ;;  %v7327_v8 = vld [vmem:[#allocation24_spill] sm:$0xff]  ;;  %v1380_v46 = vsub.f32 %v7329_v49, %v4572_v58  ;;  %vm2057_vm15 = vweird.f32 %v4644_v10 }
 0x38e   :  { %1818 = vadd.xlane.f32.xlu0 %v1817_v41  ;;  %v4616_v9 = vpop.eup %3349  ;;  %v1276_v41 = vsub.f32 %v7327_v8, %v7326_v61  ;;  %v1410_v37 = vmul.f32 1.442695, %v1275_v14  ;;  %v7334_v8 = vld [vmem:[#allocation25_spill] sm:$0xff] }
 0x38f   :  { %3359 = vpow2.f32 %v1624_v59  ;;  %v1159_v48 = vpop.xlane.xlu0 %1158  ;;  %7323 = vst [vmem:[#allocation20_spill] sm:$0xff] %v4616_v9  ;;  %v4622_v15 = vpop.eup %3351  ;;  %v1277_v14 = vsub.f32 %v7334_v8, %v7326_v61 }
 0x390   :  { %3361 = vpow2.f32 %v1626_v38  ;;  %v1322_v0 = vsub.f32 %v4289_v34, %v1159_v48  ;;  %v1323_v16 = vsub.f32 %v4294_v55, %v1159_v48  ;;  %7325 = vst [vmem:[#allocation21_spill] sm:$0xff] %v4622_v15  ;;  %v4626_v59 = vpop.eup %3353  ;;  %v1416_v55 = vmul.f32 1.442695, %v1278_v11 }
 0x391   :  { %3363 = vpow2.f32 %v1406_v27  ;;  %7328 = vst [vmem:[#allocation56_spill] sm:$0xff] %v4626_v59  ;;  %v4632_v34 = vpop.eup %3355  ;;  %v7332_v27 = vld [vmem:[#allocation82_spill] sm:$0xff]  ;;  %v1412_v49 = vmul.f32 1.442695, %v1276_v41  ;;  %v1414_v8 = vmul.f32 1.442695, %v1277_v14 }
 0x392   :  { %1731 = vadd.xlane.f32.xlu1 %v1730_v13  ;;  %v1504_v2 = vmul.f32 1.442695, %v1322_v0  ;;  %v1506_v47 = vmul.f32 1.442695, %v1323_v16  ;;  %v4630_v38 = vpop.xlane.xlu2 %1776  ;;  %7331 = vst [vmem:[#allocation29_spill] sm:$0xff] %v4632_v34  ;;  %3365 = vpow2.f32 %v1408_v40  ;;  %v1381_v48 = vsub.f32 %v7332_v27, %v4572_v58  ;;  %v4636_v3 = vpop.eup %3357  ;;  %v7337_v58 = vld [vmem:[#allocation69_spill] sm:$0xff] }
 0x393   :  { %7330 = vst [vmem:[#allocation28_spill] sm:$0xff] %v4630_v38  ;;  %v1418_v13 = vmul.f32 1.442695, %v1279_v21  ;;  %v1736_v0 = vadd.f32 %v4622_v15, %v4616_v9  ;;  %v7338_v40 = vld [vmem:[#allocation36_spill] sm:$0xff]  ;;  %v1620_v21 = vmul.f32 1.442695, %v1380_v46 }
 0x394   :  { %7333 = vst [vmem:[#allocation55_spill] sm:$0xff] %v4636_v3  ;;  %3367 = vpow2.f32 %v1504_v2  ;;  %v1342_v27 = vsub.f32 %v7338_v40, %v7337_v58  ;;  %v1622_v2 = vmul.f32 1.442695, %v1381_v48 }
 0x395   :  { %v4642_v16 = vpop.eup %3359  ;;  %3369 = vpow2.f32 %v1506_v47 }
 0x396   :  { %7335 = vst [vmem:[#allocation24_spill] sm:$0xff] %v4642_v16  ;;  %v4646_v11 = vpop.eup %3361  ;;  %3371 = vpow2.f32 %v1410_v37  ;;  %1737 = vadd.xlane.f32.xlu0 %v1736_v0  ;;  %v7342_v37 = vld [vmem:[#allocation37_spill] sm:$0xff]  ;;  %v1544_v0 = vmul.f32 1.442695, %v1342_v27  ;;  %v7349_v27 = vld [vmem:[#allocation38_spill] sm:$0xff] }
 0x397   :  { %7336 = vst [vmem:[#allocation81_spill] sm:$0xff] %v4646_v11  ;;  %v4650_v63 = vpop.eup %3363  ;;  %3373 = vpow2.f32 %v1416_v55  ;;  %v4652_v61 = vpop.xlane.xlu0 %1773  ;;  %v1823_v41 = vadd.f32 %v4646_v11, %v4642_v16  ;;  %v1343_v15 = vsub.f32 %v7342_v37, %v7337_v58  ;;  %v7344_v55 = vld [vmem:[#allocation40_spill] sm:$0xff] }
 0x398   :  { %7339 = vst [vmem:[#allocation82_spill] sm:$0xff] %v4650_v63  ;;  %3375 = vpow2.f32 %v1418_v13  ;;  %v4656_v47 = vpop.eup %3365  ;;  %v1346_v48 = vsub.f32 %v7344_v55, %v4458_v52  ;;  %v7346_v13 = vld [vmem:[#allocation41_spill] sm:$0xff] }
 0x399   :  { %7340 = vst [vmem:[#allocation25_spill] sm:$0xff] %v4652_v61  ;;  %3377 = vpow2.f32 %v1412_v49  ;;  %v1347_v14 = vsub.f32 %v7346_v13, %v4458_v52  ;;  %v1546_v16 = vmul.f32 1.442695, %v1343_v15 }
 0x39a   :  { %7341 = vst [vmem:[#allocation69_spill] sm:$0xff] %v4656_v47  ;;  %1824 = vadd.xlane.f32.xlu1 %v1823_v41  ;;  %v4660_v46 = vpop.eup %3367  ;;  %3379 = vpow2.f32 %v1620_v21  ;;  %v1165_v40 = vpop.xlane.xlu2 %1164  ;;  %v7348_v41 = vld [vmem:[#allocation76_spill] sm:$0xff]  ;;  %v7398_v47 = vld [vmem:[#allocation71_spill] sm:$0xff] }
 0x39b   :  { %7343 = vst [vmem:[#allocation36_spill] sm:$0xff] %v4660_v46  ;;  %v4664_v9 = vpop.eup %3369  ;;  %3381 = vpow2.f32 %v1622_v2  ;;  %v1326_v49 = vsub.f32 %v4332_v43, %v1165_v40  ;;  %v1327_v11 = vsub.f32 %v4336_v44, %v1165_v40  ;;  %v1344_v37 = vsub.f32 %v7349_v27, %v7348_v41 }
 0x39c   :  { %7345 = vst [vmem:[#allocation37_spill] sm:$0xff] %v4664_v9  ;;  %v4670_v58 = vpop.eup %3371  ;;  %3383 = vpow2.f32 %v1414_v8  ;;  %v1733_v21 = vadd.f32 %v4664_v9, %v4660_v46  ;;  %v1345_v52 = vsub.f32 %v7351_v54, %v7348_v41  ;;  %v1552_v44 = vmul.f32 1.442695, %v1346_v48  ;;  %v7353_v8 = vld [vmem:[#allocation44_spill] sm:$0xff]  ;;  %v4686_v9 = vpop.xlane.xlu1 %1779  ;;  %v7358_v48 = vld [vmem:[#allocation45_spill] sm:$0xff] }
 0x39d   :  { %7347 = vst [vmem:[#allocation40_spill] sm:$0xff] %v4670_v58  ;;  %v4676_v55 = vpop.eup %3373  ;;  %v1512_v2 = vmul.f32 1.442695, %v1326_v49  ;;  %v1514_v13 = vmul.f32 1.442695, %v1327_v11  ;;  %3385 = vpow2.f32 %v1544_v0  ;;  %v1302_v40 = vsub.f32 %v7353_v8, %v4410_v24 }
 0x39e   :  { %7350 = vst [vmem:[#allocation41_spill] sm:$0xff] %v4676_v55  ;;  %v4680_v43 = vpop.eup %3375  ;;  %1734 = vadd.xlane.f32.xlu2 %v1733_v21  ;;  %v1554_v29 = vmul.f32 1.442695, %v1347_v14  ;;  %v1548_v54 = vmul.f32 1.442695, %v1344_v37  ;;  %v1303_v49 = vsub.f32 %v7358_v48, %v4410_v24  ;;  %v7360_v21 = vld [vmem:[#allocation50_spill] sm:$0xff]  ;;  %v1307_v37 = vsub.f32 %v7361_v60, %v4434_v35 }
 0x39f   :  { %7352 = vst [vmem:[#allocation76_spill] sm:$0xff] %v4680_v43  ;;  %v4684_v27 = vpop.eup %3377  ;;  %3387 = vpow2.f32 %v1512_v2  ;;  %v4688_v15 = vpop.xlane.xlu0 %1689  ;;  %v1550_v0 = vmul.f32 1.442695, %v1345_v52  ;;  %v1464_v14 = vmul.f32 1.442695, %v1302_v40  ;;  %v1306_v2 = vsub.f32 %v7360_v21, %v4434_v35 }
 0x3a0   :  { %7354 = vst [vmem:[#allocation38_spill] sm:$0xff] %v4684_v27  ;;  %v4690_v46 = vpop.eup %3379  ;;  %3389 = vpow2.f32 %v1514_v13  ;;  %v1466_v40 = vmul.f32 1.442695, %v1303_v49  ;;  %vm2041_vm9 = vweird.f32 %v4688_v15 }
 0x3a1   :  { %7355 = vst [vmem:[#allocation39_spill] sm:$0xff] %v4686_v9  ;;  %v4692_v11 = vpop.eup %3381  ;;  %3391 = vpow2.f32 %v1546_v16  ;;  %v1472_v35 = vmul.f32 1.442695, %v1306_v2 }
 0x3a2   :  { %7356 = vst [vmem:[#allocation44_spill] sm:$0xff] %v4690_v46  ;;  %v4696_v41 = vpop.eup %3383  ;;  %3393 = vpow2.f32 %v1552_v44  ;;  %v1252_v8 = vpop.xlane.xlu2 %1251  ;;  %v1820_v24 = vadd.f32 %v4692_v11, %v4690_v46  ;;  %v7379_v46 = vld [vmem:[#allocation15_spill] sm:$0xff] }
 0x3a3   :  { %7357 = vst [vmem:[#allocation131_spill] sm:$0xff] %v4692_v11  ;;  %3395 = vpow2.f32 %v1554_v29  ;;  %v1384_v13 = vsub.f32 %v4344_v62, %v1252_v8  ;;  %v1385_v16 = vsub.f32 %v4346_v36, %v1252_v8  ;;  %v4704_v52 = vpop.eup %3385  ;;  %v1474_v36 = vmul.f32 1.442695, %v1307_v37 }
 0x3a4   :  { %7359 = vst [vmem:[#allocation45_spill] sm:$0xff] %v4696_v41  ;;  %3397 = vpow2.f32 %v1548_v54 }
 0x3a5   :  { %7362 = vst [vmem:[#allocation50_spill] sm:$0xff] %v4704_v52  ;;  %v4708_v44 = vpop.eup %3387  ;;  %3399 = vpow2.f32 %v1550_v0  ;;  %v1628_v48 = vmul.f32 1.442695, %v1384_v13  ;;  %v1630_v21 = vmul.f32 1.442695, %v1385_v16 }
 0x3a6   :  { %7363 = vst [vmem:[#allocation51_spill] sm:$0xff] %v4708_v44  ;;  %v4710_v29 = vpop.eup %3389  ;;  %3401 = vpow2.f32 %v1464_v14  ;;  %1821 = vadd.xlane.f32.xlu2 %v1820_v24  ;;  %v1171_v14 = vpop.xlane.xlu1 %1170 }
 0x3a7   :  { %7364 = vst [vmem:[#allocation132_spill] sm:$0xff] %v4710_v29  ;;  %v4712_v62 = vpop.eup %3391  ;;  %3403 = vpow2.f32 %v1628_v48  ;;  %v1168_v60 = vpop.xlane.xlu0 %1167  ;;  %v1739_v54 = vadd.f32 %v4710_v29, %v4708_v44 }
 0x3a8   :  { %7365 = vst [vmem:[#allocation133_spill] sm:$0xff] %v4712_v62  ;;  %v4716_v8 = vpop.eup %3393  ;;  %3405 = vpow2.f32 %v1630_v21  ;;  %v1328_v0 = vsub.f32 %v4354_v20, %v1168_v60  ;;  %v1329_v49 = vsub.f32 %v4360_v50, %v1168_v60  ;;  %v1330_v20 = vsub.f32 %v4382_v17, %v1171_v14 }
 0x3a9   :  { %7366 = vst [vmem:[#allocation134_spill] sm:$0xff] %v4716_v8  ;;  %v4720_v13 = vpop.eup %3395  ;;  %3407 = vpow2.f32 %v1466_v40  ;;  %1740 = vadd.xlane.f32.xlu1 %v1739_v54  ;;  %v1331_v40 = vsub.f32 %v4386_v39, %v1171_v14  ;;  %v7377_v39 = vld [vmem:[#allocation46_spill] sm:$0xff] }
 0x3aa   :  { %7367 = vst [vmem:[#allocation135_spill] sm:$0xff] %v4720_v13  ;;  %v4722_v2 = vpop.eup %3397  ;;  %3409 = vpow2.f32 %v1472_v35  ;;  %v1516_v37 = vmul.f32 1.442695, %v1328_v0  ;;  %v1518_v16 = vmul.f32 1.442695, %v1329_v49  ;;  %v4724_v24 = vpop.xlane.xlu2 %1695  ;;  %v7378_v14 = vld [vmem:[#allocation14_spill] sm:$0xff]  ;;  %v1271_v29 = vsub.f32 %v7379_v46, %v7377_v39 }
 0x3ab   :  { %7368 = vst [vmem:[#allocation136_spill] sm:$0xff] %v4722_v2  ;;  %v4726_v48 = vpop.eup %3399  ;;  %3411 = vpow2.f32 %v1474_v36  ;;  %v1520_v17 = vmul.f32 1.442695, %v1330_v20  ;;  %vm2073_vm0 = vweird.f32 %v4724_v24 }
 0x3ac   :  { %7369 = vst [vmem:[#allocation137_spill] sm:$0xff] %v4726_v48  ;;  %v4728_v21 = vpop.eup %3401  ;;  %3413 = vrcp.f32 %v4644_v10 }
 0x3ad   :  { %7370 = vst [vmem:[#allocation138_spill] sm:$0xff] %v4728_v21  ;;  %v4732_v50 = vpop.eup %3403  ;;  %3415 = vpow2.f32 %v1516_v37  ;;  %v1270_v37 = vsub.f32 %v7378_v14, %v7377_v39  ;;  %v1373_v14 = vsub.f32 %v7382_v12, %v4512_v45  ;;  %v7387_v12 = vld [vmem:[#allocation42_spill] sm:$0xff]  ;;  %v2063_v21 = vand.u32 2147483648, %v4644_v10 }
 0x3ae   :  { %7371 = vst [vmem:[#allocation139_spill] sm:$0xff] %v4732_v50  ;;  %v4735_v60 = vpop.eup %3405  ;;  %3417 = vpow2.f32 %v1518_v16  ;;  %v1522_v16 = vmul.f32 1.442695, %v1331_v40 }
 0x3af   :  { %7372 = vst [vmem:[#allocation140_spill] sm:$0xff] %v4735_v60  ;;  %v4737_v35 = vpop.eup %3407  ;;  %3419 = vrcp.f32 %v4508_v19  ;;  %v4740_v54 = vpop.xlane.xlu0 %1782  ;;  %v1826_v36 = vadd.f32 %v4735_v60, %v4732_v50  ;;  %v7380_v60 = vld [vmem:[#allocation65_spill] sm:$0xff] }
 0x3b0   :  { %7373 = vst [vmem:[#allocation141_spill] sm:$0xff] %v4737_v35  ;;  %v4744_v0 = vpop.eup %3409  ;;  %3421 = vrcp.f32 %v4724_v24  ;;  %v1372_v50 = vsub.f32 %v7380_v60, %v4512_v45  ;;  %v4770_v60 = vmul.f32 1.442695, %v1270_v37  ;;  %v7386_v45 = vld [vmem:[#allocation99_spill] sm:$0xff] }
 0x3b1   :  { %7374 = vst [vmem:[#allocation142_spill] sm:$0xff] %v4740_v54  ;;  %v4747_v49 = vpop.eup %3411  ;;  %3423 = vrcp.f32 %v4538_v42  ;;  %1827 = vadd.xlane.f32.xlu0 %v1826_v36  ;;  %v4774_v54 = vmul.f32 1.442695, %v1271_v29  ;;  %v1300_v61 = vsub.f32 %v7387_v12, %v7386_v45  ;;  %v4806_v12 = vadd.f32 %v4680_v43, %v4676_v55  ;;  %v7394_v55 = vld [vmem:[#allocation95_spill] sm:$0xff] }
 0x3b2   :  { %7375 = vst [vmem:[#allocation143_spill] sm:$0xff] %v4744_v0  ;;  %v4752_v11 = vpop.eup %3413  ;;  %3425 = vrcp.f32 %v4552_v7  ;;  %v1255_v20 = vpop.xlane.xlu2 %1254 }
 0x3b3   :  { %7376 = vst [vmem:[#allocation144_spill] sm:$0xff] %v4747_v49  ;;  %v4759_v44 = vpop.eup %3415  ;;  %3427 = vrcp.f32 %v4563_v6  ;;  %v1386_v40 = vsub.f32 %v4374_v57, %v1255_v20  ;;  %v1387_v36 = vsub.f32 %v4378_v51, %v1255_v20  ;;  %v1604_v57 = vmul.f32 1.442695, %v1372_v50  ;;  %v7390_v50 = vld [vmem:[#allocation43_spill] sm:$0xff] }
 0x3b4   :  { %7381 = vst [vmem:[#allocation46_spill] sm:$0xff] %v4759_v44  ;;  %v4766_v1 = vpop.eup %3417  ;;  %3429 = vpow2.f32 %v1520_v17  ;;  %v1606_v17 = vmul.f32 1.442695, %v1373_v14  ;;  %v2053_v37 = vmul.f32 %v4752_v11, %v4644_v10  ;;  %v1301_v34 = vsub.f32 %v7390_v50, %v7386_v45 }
 0x3b5   :  { %7383 = vst [vmem:[#allocation14_spill] sm:$0xff] %v4766_v1  ;;  %v4768_v46 = vpop.eup %3419  ;;  %3431 = vpow2.f32 %v1522_v16  ;;  %v1632_v39 = vmul.f32 1.442695, %v1386_v40  ;;  %v1634_v30 = vmul.f32 1.442695, %v1387_v36  ;;  %v1742_v20 = vadd.f32 %v4766_v1, %v4759_v44  ;;  %v7388_v40 = vld [vmem:[#allocation49_spill] sm:$0xff] }
 0x3b6   :  { %7384 = vst [vmem:[#allocation15_spill] sm:$0xff] %v4770_v60  ;;  %v4772_v31 = vpop.eup %3421  ;;  %3433 = vrcp.f32 %v4688_v15  ;;  %v7389_v36 = vld [vmem:[#allocation22_spill] sm:$0xff]  ;;  %v4795_v14 = vmul.f32 %v4768_v46, %v4508_v19  ;;  %v4810_v50 = vmul.f32 1.442695, %v1300_v61  ;;  %v4818_v44 = vadd.f32 %v4696_v41, %v4684_v27 }
 0x3b7   :  { %7385 = vst [vmem:[#allocation65_spill] sm:$0xff] %v4774_v54  ;;  %v4779_v51 = vpop.eup %3423  ;;  %3435 = vpow2.f32 %v1632_v39  ;;  %v4783_v16 = vpop.xlane.xlu0 %1698  ;;  %v2069_v1 = vmul.f32 %v4772_v31, %v4724_v24  ;;  %v4832_v41 = vadd.f32 %v4747_v49, %v4744_v0  ;;  %vm2058_vm11 = vweird.f32 %v4752_v11 }
 0x3b8   :  { %v4787_v29 = vpop.eup %3425  ;;  %3437 = vpow2.f32 %v1634_v30  ;;  %v4814_v30 = vmul.f32 %v4779_v51, %v4538_v42  ;;  %vm2074_vm13 = vweird.f32 %v4772_v31  ;;  %vm2089_vm14 = vweird.f32 %v4783_v16  ;;  %vm4907_vm5 = vmor %vm2057_vm15, %vm2058_vm11 }
 0x3b9   :  { %v4797_v59 = vpop.eup %3427  ;;  %3439 = vrcp.f32 %v4783_v16  ;;  %1743 = vadd.xlane.f32.xlu0 %v1742_v20  ;;  %v2054_v20 = vsub.f32 1.0, %v2053_v37  ;;  %vm4893_vm4 = vmor %vm2073_vm0, %vm2074_vm13  ;;  %vm2009_vm0 = vweird.f32 %v4590_v26 }
 0x3ba   :  { %v4808_v45 = vpop.eup %3429  ;;  %3441 = vpow2.f32 %v1604_v57  ;;  %v1258_v9 = vpop.xlane.xlu2 %1257  ;;  %v4826_v57 = vmul.f32 1.442695, %v1301_v34  ;;  %v2021_v5 = vmul.f32 %v4797_v59, %v4563_v6  ;;  %v4855_v34 = vmul.f32 %v4787_v29, %v4552_v7 }
 0x3bb   :  { %7392 = vst [vmem:[#allocation66_spill] sm:$0xff] %v4808_v45  ;;  %v4820_v38 = vpop.eup %3431  ;;  %3443 = vpow2.f32 %v1606_v17  ;;  %v1388_v43 = vsub.f32 %v4399_v56, %v1258_v9  ;;  %v1389_v58 = vsub.f32 %v7394_v55, %v1258_v9  ;;  %v7396_v17 = vld [vmem:[#allocation70_spill] sm:$0xff]  ;;  %v2070_v56 = vsub.f32 1.0, %v2069_v1 }
 0x3bc   :  { %7393 = vst [vmem:[#allocation99_spill] sm:$0xff] %v4820_v38  ;;  %v4824_v61 = vpop.eup %3433  ;;  %3445 = vrcp.f32 %v4540_v33  ;;  %v1374_v37 = vsub.f32 %v7396_v17, %v4544_v22  ;;  %v2055_v0 = vmul.f32 %v4752_v11, %v2054_v20  ;;  %v2022_v35 = vsub.f32 1.0, %v2021_v5 }
 0x3bd   :  { %v4834_v27 = vpop.eup %3435  ;;  %v1636_v63 = vmul.f32 1.442695, %v1388_v43  ;;  %v1638_v9 = vmul.f32 1.442695, %v1389_v58  ;;  %3447 = vrcp.f32 %v4590_v26  ;;  %v1745_v58 = vadd.f32 %v4820_v38, %v4808_v45 }
 0x3be   :  { %7395 = vst [vmem:[#allocation42_spill] sm:$0xff] %v4834_v27  ;;  %v4838_v55 = vpop.eup %3437  ;;  %v2037_v3 = vmul.f32 %v4824_v61, %v4688_v15  ;;  %v4862_v20 = vmul.f32 1.442695, %v1374_v37  ;;  %v2095_v37 = vand.u32 2147483648, %v4783_v16  ;;  %v2093_v5 = vand.u32 2147483647, %v4783_v16 }
 0x3bf   :  { %7397 = vst [vmem:[#allocation49_spill] sm:$0xff] %v4838_v55  ;;  %v3440_v49 = vpop.eup %3439  ;;  %3449 = vpow2.f32 %v1636_v63  ;;  %v1267_v17 = vpop.xlane.xlu0 %1266  ;;  %v1829_v1 = vadd.f32 %v4838_v55, %v4834_v27  ;;  %v2071_v55 = vmul.f32 %v4772_v31, %v2070_v56  ;;  %vm2042_vm8 = vweird.f32 %v4824_v61 }
 0x3c0   :  { %v4851_v43 = vpop.eup %3441  ;;  %v2085_v28 = vmul.f32 %v3440_v49, %v4783_v16  ;;  %3451 = vpow2.f32 %v1638_v9  ;;  %v1394_v27 = vsub.f32 %v4466_v25, %v1267_v17  ;;  %v1395_v38 = vsub.f32 %v4468_v18, %v1267_v17  ;;  %vm4937_vm10 = vmor %vm2041_vm9, %vm2042_vm8 }
 0x3c1   :  { %7399 = vst [vmem:[#allocation22_spill] sm:$0xff] %v4851_v43  ;;  %v4860_v63 = vpop.eup %3443  ;;  %1830 = vadd.xlane.f32.xlu2 %v1829_v1  ;;  %1746 = vadd.xlane.f32.xlu0 %v1745_v58  ;;  %v2056_v25 = vadd.f32 %v4752_v11, %v2055_v0  ;;  %v2079_v18 = vand.u32 2147483648, %v4724_v24  ;;  %vm2090_vm12 = vweird.f32 %v3440_v49  ;;  %v2072_v58 = vadd.f32 %v4772_v31, %v2071_v55 }
 0x3c2   :  { %7400 = vst [vmem:[#allocation43_spill] sm:$0xff] %v4860_v63  ;;  %v4867_v45 = vpop.eup %3445  ;;  %v2086_v54 = vsub.f32 1.0, %v2085_v28  ;;  %v4870_v39 = vpop.xlane.xlu2 %1785  ;;  %v1648_v9 = vmul.f32 1.442695, %v1394_v27  ;;  %v1650_v56 = vmul.f32 1.442695, %v1395_v38  ;;  %vm2091_vm2 = vmor %vm2089_vm14, %vm2090_vm12  ;;  %vm2026_vm11 = vweird.f32 %v4797_v59 }
 0x3c3   :  { %v4875_v60 = vpop.eup %3447  ;;  %v2038_v28 = vsub.f32 1.0, %v2037_v3  ;;  %v2077_v0 = vand.u32 2147483647, %v4724_v24  ;;  %vm2094_vm3 = vcmp.eq.f32.partialorder %v2093_v5, 8.507059e+37  ;;  %v2061_v16 = vand.u32 2147483647, %v4644_v10 }
 0x3c4   :  { %v2087_v17 = vmul.f32 %v3440_v49, %v2086_v54  ;;  %3453 = vpow2.f32 %v1648_v9  ;;  %v2096_v54 = vor.u32 1.1754944e-38, %v2095_v37  ;;  %v2005_v55 = vmul.f32 %v4875_v60, %v4590_v26 }
 0x3c5   :  { %v4879_v1 = vpop.eup %3449  ;;  %3455 = vpow2.f32 %v1650_v56  ;;  %v2023_v56 = vmul.f32 %v4797_v59, %v2022_v35  ;;  %v2039_v24 = vmul.f32 %v4824_v61, %v2038_v28  ;;  %v2064_v5 = vor.u32 1.1754944e-38, %v2063_v21 }
 0x3c6   :  { %7401 = vst [vmem:[#allocation95_spill] sm:$0xff] %v4879_v1  ;;  %v4883_v27 = vpop.eup %3451  ;;  %v2088_v38 = vadd.f32 %v3440_v49, %v2087_v17  ;;  %vm2078_vm6 = vcmp.eq.f32.partialorder %v2077_v0, 8.507059e+37  ;;  %v2060_v35 = vsel %vm4907_vm5, %v4752_v11, %v2056_v25  ;;  %v2006_v21 = vsub.f32 1.0, %v2005_v55  ;;  %v7411_v55 = vld [vmem:[#allocation96_spill] sm:$0xff] }
 0x3c7   :  { %7402 = vst [vmem:[#allocation70_spill] sm:$0xff] %v4883_v27  ;;  %v1832_v3 = vadd.f32 %v4883_v27, %v4879_v1  ;;  %v2076_v27 = vsel %vm4893_vm4, %v4772_v31, %v2072_v58  ;;  %vm2062_vm7 = vcmp.eq.f32.partialorder %v2061_v16, 8.507059e+37  ;;  %v7410_v11 = vsub.f32 %v7398_v47, %v4544_v22 }
 0x3c8   :  { %v2092_v9 = vsel %vm2091_vm2, %v3440_v49, %v2088_v38  ;;  %v2080_v38 = vor.u32 1.1754944e-38, %v2079_v18  ;;  %v2024_v47 = vadd.f32 %v4797_v59, %v2023_v56  ;;  %vm2025_vm12 = vweird.f32 %v4563_v6 }
 0x3c9   :  { %1833 = vadd.xlane.f32.xlu0 %v1832_v3  ;;  %v2097_v37 = vsel %vm2094_vm3, %v2096_v54, %v2092_v9  ;;  %v7407_v54 = vld [vmem:[#allocation103_spill] sm:$0xff]  ;;  %v7408_v3 = vld [vmem:[#allocation104_spill] sm:$0xff]  ;;  %v1610_v25 = vmul.f32 1.442695, %v7410_v11  ;;  %vm4960_vm14 = vmor %vm2025_vm12, %vm2026_vm11  ;;  %vm2010_vm15 = vweird.f32 %v4875_v60  ;;  %v2015_v11 = vand.u32 2147483648, %v4590_v26 }
 0x3ca   :  { %v1261_v1 = vpop.xlane.xlu2 %1260  ;;  %v4914_v28 = vpop.eup %3453  ;;  %v2098_v10 = vmul.f32 %v7407_v54, %v2097_v37  ;;  %v2099_v9 = vmul.f32 %v7408_v3, %v2097_v37  ;;  %v2081_v18 = vsel %vm2078_vm6, %v2080_v38, %v2076_v27  ;;  %v2065_v27 = vsel %vm2062_vm7, %v2064_v5, %v2060_v35  ;;  %v7412_v37 = vld [vmem:[#allocation98_spill] sm:$0xff]  ;;  %v7415_v35 = vld [vmem:[#allocation85_spill] sm:$0xff]  ;;  %vm4989_vm3 = vmor %vm2009_vm0, %vm2010_vm15 }
 0x3cb   :  { %v1390_v31 = vsub.f32 %v4422_v23, %v1261_v1  ;;  %v1391_v58 = vsub.f32 %v4426_v4, %v1261_v1  ;;  %v4920_v17 = vpop.eup %3455  ;;  %v2040_v4 = vadd.f32 %v4824_v61, %v2039_v24  ;;  %v2047_v1 = vand.u32 2147483648, %v4688_v15 }
 0x3cc   :  { %7409 = vst [vmem:[#allocation71_spill] sm:$0xff] %v4920_v17  ;;  %2873 = vmatpush.xpose.msrb.mxu0 %v2098_v10  ;;  %2893 = vmatpush.xpose.msrb.mxu1 %v2099_v9  ;;  %v1841_v23 = vadd.f32 %v4920_v17, %v4914_v28  ;;  %v2082_v16 = vmul.f32 %v7411_v55, %v2081_v18  ;;  %v7416_v9 = vld [vmem:[#allocation86_spill] sm:$0xff]  ;;  %vm1994_vm4 = vweird.f32 %v4787_v29  ;;  %vm1993_vm5 = vweird.f32 %v4552_v7 }
 0x3cd   :  { %v1640_v0 = vmul.f32 1.442695, %v1390_v31  ;;  %v1642_v49 = vmul.f32 1.442695, %v1391_v58  ;;  %v2083_v38 = vmul.f32 %v7412_v37, %v2081_v18  ;;  %v2045_v31 = vand.u32 2147483647, %v4688_v15  ;;  %vm5017_vm7 = vmor %vm1993_vm5, %vm1994_vm4 }
 0x3ce   :  { %1842 = vadd.xlane.f32.xlu2 %v1841_v23  ;;  %v1990_v58 = vsub.f32 1.0, %v4855_v34  ;;  %v2007_v24 = vmul.f32 %v4875_v60, %v2006_v21  ;;  %v2044_v15 = vsel %vm4937_vm10, %v4824_v61, %v2040_v4  ;;  %v2031_v34 = vand.u32 2147483648, %v4563_v6 }
 0x3cf   :  { %3457 = vpow2.f32 %v1640_v0  ;;  %v2048_v5 = vor.u32 1.1754944e-38, %v2047_v1  ;;  %v2066_v54 = vmul.f32 %v7415_v35, %v2065_v27  ;;  %v2067_v21 = vmul.f32 %v7416_v9, %v2065_v27  ;;  %v7423_v27 = vld [vmem:[#allocation94_spill] sm:$0xff]  ;;  %v7430_v35 = vld [vmem:[#allocation79_spill] sm:$0xff] }
 0x3d0   :  { %3459 = vpow2.f32 %v1642_v49  ;;  %2874 = vmatpush.xpose.msrb.mxu0 %v2082_v16  ;;  %2894 = vmatpush.xpose.msrb.mxu1 %v2083_v38  ;;  %vm2046_vm13 = vcmp.eq.f32.partialorder %v2045_v31, 8.507059e+37  ;;  %v2032_v4 = vor.u32 1.1754944e-38, %v2031_v34  ;;  %v2013_v16 = vand.u32 2147483647, %v4590_v26 }
 0x3d1   :  { %3461 = vpow2.f32 %v4862_v20  ;;  %1710 = vadd.xlane.f32.xlu0 %v4832_v41  ;;  %v2029_v20 = vand.u32 2147483647, %v4563_v6  ;;  %v1991_v41 = vmul.f32 %v4787_v29, %v1990_v58  ;;  %v2049_v18 = vsel %vm2046_vm13, %v2048_v5, %v2044_v15  ;;  %v7429_v15 = vld [vmem:[#allocation47_spill] sm:$0xff] }
 0x3d2   :  { %v1264_v56 = vpop.xlane.xlu2 %1263  ;;  %3463 = vpow2.f32 %v1610_v25  ;;  %v2008_v6 = vadd.f32 %v4875_v60, %v2007_v24  ;;  %v2051_v55 = vmul.f32 %v7423_v27, %v2049_v18  ;;  %v7424_v37 = vsub.f32 1.0, %v4814_v30  ;;  %v7428_v24 = vld [vmem:[#allocation110_spill] sm:$0xff]  ;;  %v7439_v27 = vld [vmem:[#allocation84_spill] sm:$0xff] }
 0x3d3   :  { %v1392_v10 = vsub.f32 %v4444_v32, %v1264_v56  ;;  %v1393_v3 = vsub.f32 %v4446_v53, %v1264_v56  ;;  %v2028_v32 = vsel %vm4960_vm14, %v4797_v59, %v2024_v47  ;;  %vm2030_vm2 = vcmp.eq.f32.partialorder %v2029_v20, 8.507059e+37  ;;  %v7422_v59 = vld [vmem:[#allocation93_spill] sm:$0xff] }
 0x3d4   :  { %2875 = vmatpush.xpose.msrb.mxu0 %v2066_v54  ;;  %2895 = vmatpush.xpose.msrb.mxu1 %v2067_v21  ;;  %v2050_v1 = vmul.f32 %v7422_v59, %v2049_v18  ;;  %v1975_v38 = vmul.f32 %v4779_v51, %v7424_v37  ;;  %v2033_v58 = vsel %vm2030_vm2, %v2032_v4, %v2028_v32  ;;  %v1999_v5 = vand.u32 2147483648, %v4552_v7  ;;  %v7438_v59 = vld [vmem:[#allocation83_spill] sm:$0xff] }
 0x3d5   :  { %v4968_v53 = vpop.eup %3457  ;;  %v1644_v0 = vmul.f32 1.442695, %v1392_v10  ;;  %v1646_v49 = vmul.f32 1.442695, %v1393_v3  ;;  %v2012_v26 = vsel %vm4989_vm3, %v4875_v60, %v2008_v6  ;;  %v1992_v30 = vadd.f32 %v4787_v29, %v1991_v41  ;;  %v7431_v60 = vld [vmem:[#allocation80_spill] sm:$0xff] }
 0x3d6   :  { %7419 = vst [vmem:[#allocation103_spill] sm:$0xff] %v4968_v53  ;;  %v4972_v23 = vpop.eup %3459  ;;  %1668 = vadd.xlane.f32.xlu2 %v4806_v12  ;;  %v1941_v12 = vmul.f32 %v4867_v45, %v4540_v33  ;;  %v1304_v34 = vsub.f32 %v7429_v15, %v7428_v24  ;;  %v2016_v56 = vor.u32 1.1754944e-38, %v2015_v11  ;;  %v2034_v54 = vmul.f32 %v7430_v35, %v2033_v58  ;;  %v7432_v3 = vld [vmem:[#allocation48_spill] sm:$0xff] }
 0x3d7   :  { %7420 = vst [vmem:[#allocation104_spill] sm:$0xff] %v4972_v23  ;;  %v4976_v25 = vpop.eup %3461  ;;  %3465 = vpow2.f32 %v1644_v0  ;;  %v1835_v31 = vadd.f32 %v4972_v23, %v4968_v53  ;;  %v2035_v20 = vmul.f32 %v7431_v60, %v2033_v58  ;;  %vm2014_vm6 = vcmp.eq.f32.partialorder %v2013_v16, 8.507059e+37 }
 0x3d8   :  { %7421 = vst [vmem:[#allocation96_spill] sm:$0xff] %v4976_v25  ;;  %3467 = vpow2.f32 %v1646_v49  ;;  %2876 = vmatpush.xpose.msrb.mxu0 %v2050_v1  ;;  %2896 = vmatpush.xpose.msrb.mxu1 %v2051_v55  ;;  %v5000_v47 = vpop.eup %3463  ;;  %v1997_v10 = vand.u32 2147483647, %v4552_v7  ;;  %v1305_v9 = vsub.f32 %v7432_v3, %v7428_v24  ;;  %v7433_v21 = vsub.f32 1.0, %v4795_v14  ;;  %v7442_v24 = vld [vmem:[#allocation77_spill] sm:$0xff] }
 0x3d9   :  { %7427 = vst [vmem:[#allocation98_spill] sm:$0xff] %v5000_v47  ;;  %1836 = vadd.xlane.f32.xlu1 %v1835_v31  ;;  %1665 = vadd.xlane.f32.xlu0 %v4818_v44  ;;  %v2017_v41 = vsel %vm2014_vm6, %v2016_v56, %v2012_v26  ;;  %vm1978_vm8 = vweird.f32 %v4779_v51  ;;  %v1942_v32 = vsub.f32 1.0, %v1941_v12  ;;  %v1811_v7 = vadd.f32 %v5000_v47, %v4976_v25  ;;  %v7445_v56 = vld [vmem:[#allocation27_spill] sm:$0xff] }
 0x3da   :  { %v1959_v61 = vmul.f32 %v4768_v46, %v7433_v21  ;;  %v1996_v14 = vsel %vm5017_vm7, %v4787_v29, %v1992_v30  ;;  %v1976_v0 = vadd.f32 %v4779_v51, %v1975_v38  ;;  %vm1977_vm9 = vweird.f32 %v4538_v42  ;;  %v7449_v21 = vld [vmem:[#allocation72_spill] sm:$0xff] }
 0x3db   :  { %v1983_v6 = vand.u32 2147483648, %v4538_v42  ;;  %v2000_v4 = vor.u32 1.1754944e-38, %v1999_v5  ;;  %v1981_v11 = vand.u32 2147483647, %v4538_v42  ;;  %v2018_v1 = vmul.f32 %v7438_v59, %v2017_v41  ;;  %vm5044_vm11 = vmor %vm1977_vm9, %vm1978_vm8  ;;  %v7461_v42 = vld [vmem:[#allocation31_spill] sm:$0xff] }
 0x3dc   :  { %2877 = vmatpush.xpose.msrb.mxu0 %v2034_v54  ;;  %2897 = vmatpush.xpose.msrb.mxu1 %v2035_v20  ;;  %v2019_v55 = vmul.f32 %v7439_v27, %v2017_v41  ;;  %vm1998_vm10 = vcmp.eq.f32.partialorder %v1997_v10, 8.507059e+37  ;;  %3469 = vpow2.f32 %v4810_v50  ;;  %v1468_v29 = vmul.f32 1.442695, %v1304_v34  ;;  %v7443_v34 = vld [vmem:[#allocation78_spill] sm:$0xff]  ;;  %v7450_v41 = vld [vmem:[#allocation73_spill] sm:$0xff] }
 0x3dd   :  { %v5022_v44 = vpop.eup %3465  ;;  %v1808_v37 = vadd.f32 %v4860_v63, %v4851_v43  ;;  %v2001_v38 = vsel %vm1998_vm10, %v2000_v4, %v1996_v14  ;;  %v1943_v31 = vmul.f32 %v4867_v45, %v1942_v32  ;;  %v1980_v58 = vsel %vm5044_vm11, %v4779_v51, %v1976_v0  ;;  %v7444_v51 = vld [vmem:[#allocation97_spill] sm:$0xff]  ;;  %v7479_v4 = vld [vmem:[#allocation59_spill] sm:$0xff] }
 0x3de   :  { %7436 = vst [vmem:[#allocation85_spill] sm:$0xff] %v5022_v44  ;;  %v5030_v49 = vpop.eup %3467  ;;  %1812 = vadd.xlane.f32.xlu2 %v1811_v7  ;;  %v1960_v50 = vadd.f32 %v4768_v46, %v1959_v61  ;;  %vm1962_vm12 = vweird.f32 %v4768_v46  ;;  %v1470_v22 = vmul.f32 1.442695, %v1305_v9  ;;  %v1967_v12 = vand.u32 2147483648, %v4508_v19  ;;  %v7471_v20 = vld [vmem:[#allocation141_spill] sm:$0xff] }
 0x3df   :  { %7437 = vst [vmem:[#allocation86_spill] sm:$0xff] %v5030_v49  ;;  %v1838_v16 = vadd.f32 %v5030_v49, %v5022_v44  ;;  %v1984_v26 = vor.u32 1.1754944e-38, %v1983_v6  ;;  %v1965_v30 = vand.u32 2147483647, %v4508_v19  ;;  %vm1961_vm13 = vweird.f32 %v4508_v19 }
 0x3e0   :  { %2878 = vmatpush.xpose.msrb.mxu0 %v2018_v1  ;;  %2898 = vmatpush.xpose.msrb.mxu1 %v2019_v55  ;;  %v2002_v15 = vmul.f32 %v7442_v24, %v2001_v38  ;;  %v2003_v5 = vmul.f32 %v7443_v34, %v2001_v38  ;;  %vm1982_vm14 = vcmp.eq.f32.partialorder %v1981_v11, 8.507059e+37  ;;  %v1334_v35 = vsub.f32 %v7445_v56, %v7444_v51  ;;  %vm5066_vm15 = vmor %vm1961_vm13, %vm1962_vm12  ;;  %v7454_v11 = vld [vmem:[#allocation15_spill] sm:$0xff]  ;;  %v7457_v1 = vld [vmem:[#allocation26_spill] sm:$0xff] }
 0x3e1   :  { %1839 = vadd.xlane.f32.xlu1 %v1838_v16  ;;  %1809 = vadd.xlane.f32.xlu0 %v1808_v37  ;;  %3471 = vpow2.f32 %v4826_v57  ;;  %v1766_v54 = vadd.f32 %v4726_v48, %v4722_v2  ;;  %v1985_v60 = vsel %vm1982_vm14, %v1984_v26, %v1980_v58  ;;  %v1964_v19 = vsel %vm5066_vm15, %v4768_v46, %v1960_v50  ;;  %v7460_v38 = vld [vmem:[#allocation102_spill] sm:$0xff]  ;;  %v7463_v50 = vld [vmem:[#allocation111_spill] sm:$0xff]  ;;  %v7466_v24 = vld [vmem:[#allocation68_spill] sm:$0xff] }
 0x3e2   :  { %3473 = vpow2.f32 %v1468_v29  ;;  %v1944_v10 = vadd.f32 %v4867_v45, %v1943_v31  ;;  %vm1946_vm0 = vweird.f32 %v4867_v45  ;;  %v5075_v57 = vpop.eup %3469  ;;  %v1968_v3 = vor.u32 1.1754944e-38, %v1967_v12  ;;  %v7459_v29 = vld [vmem:[#allocation65_spill] sm:$0xff]  ;;  %v7465_v26 = vld [vmem:[#allocation67_spill] sm:$0xff] }
 0x3e3   :  { %7448 = vst [vmem:[#allocation93_spill] sm:$0xff] %v5075_v57  ;;  %3475 = vpow2.f32 %v1470_v22  ;;  %v1951_v9 = vand.u32 2147483648, %v4540_v33  ;;  %vm1966_vm2 = vcmp.eq.f32.partialorder %v1965_v30, 8.507059e+37  ;;  %vm1945_vm3 = vweird.f32 %v4540_v33  ;;  %v7464_v22 = vld [vmem:[#allocation60_spill] sm:$0xff]  ;;  %v7468_v34 = vld [vmem:[#allocation61_spill] sm:$0xff] }
 0x3e4   :  { %2879 = vmatpush.xpose.msrb.mxu0 %v2002_v15  ;;  %2899 = vmatpush.xpose.msrb.mxu1 %v2003_v5  ;;  %v1986_v61 = vmul.f32 %v7449_v21, %v1985_v60  ;;  %v1987_v18 = vmul.f32 %v7450_v41, %v1985_v60  ;;  %v1949_v46 = vand.u32 2147483647, %v4540_v33  ;;  %v7451_v32 = vsub.f32 %v7389_v36, %v7388_v40  ;;  %vm5091_vm4 = vmor %vm1945_vm3, %vm1946_vm0  ;;  %v7455_v33 = vld [vmem:[#allocation23_spill] sm:$0xff]  ;;  %v7470_v60 = vld [vmem:[#allocation138_spill] sm:$0xff] }
 0x3e5   :  { %v1769_v14 = vadd.f32 %v4720_v13, %v4716_v8  ;;  %v1763_v0 = vadd.f32 %v4712_v62, %v4704_v52  ;;  %v1969_v6 = vsel %vm1966_vm2, %v1968_v3, %v1964_v19  ;;  %3477 = vpow2.f32 %v7454_v11  ;;  %v7472_v3 = vld [vmem:[#allocation114_spill] sm:$0xff]  ;;  %v7480_v11 = vld [vmem:[#allocation33_spill] sm:$0xff] }
 0x3e6   :  { %1767 = vadd.xlane.f32.xlu2 %v1766_v54  ;;  %v1524_v7 = vmul.f32 1.442695, %v7451_v32  ;;  %v7456_v59 = vsub.f32 %v7455_v33, %v7388_v40  ;;  %v1335_v27 = vsub.f32 %v7457_v1, %v7444_v51  ;;  %v1948_v55 = vsel %vm5091_vm4, %v4867_v45, %v1944_v10  ;;  %v7476_v32 = vld [vmem:[#allocation74_spill] sm:$0xff] }
 0x3e7   :  { %v5104_v16 = vpop.eup %3471  ;;  %3479 = vpow2.f32 %v7459_v29  ;;  %v1528_v37 = vmul.f32 1.442695, %v1334_v35  ;;  %v1336_v31 = vsub.f32 %v7461_v42, %v7460_v38  ;;  %v1952_v58 = vor.u32 1.1754944e-38, %v1951_v9  ;;  %v7469_v35 = vld [vmem:[#allocation30_spill] sm:$0xff]  ;;  %v7473_v9 = vld [vmem:[#allocation63_spill] sm:$0xff] }
 0x3e8   :  { %v1526_v36 = vmul.f32 1.442695, %v7456_v59  ;;  %2880 = vmatpush.xpose.msrb.mxu0 %v1986_v61  ;;  %2900 = vmatpush.xpose.msrb.mxu1 %v1987_v18  ;;  %7458 = vst [vmem:[#allocation94_spill] sm:$0xff] %v5104_v16  ;;  %v5109_v40 = vpop.eup %3473  ;;  %v1368_v12 = vsub.f32 %v7464_v22, %v7463_v50  ;;  %v1970_v30 = vmul.f32 %v7465_v26, %v1969_v6  ;;  %vm1950_vm5 = vcmp.eq.f32.partialorder %v1949_v46, 8.507059e+37  ;;  %v7475_v18 = vld [vmem:[#allocation64_spill] sm:$0xff]  ;;  %v7484_v42 = vld [vmem:[#allocation34_spill] sm:$0xff] }
 0x3e9   :  { %1770 = vadd.xlane.f32.xlu1 %v1769_v14  ;;  %1764 = vadd.xlane.f32.xlu0 %v1763_v0  ;;  %7462 = vst [vmem:[#allocation110_spill] sm:$0xff] %v5109_v40  ;;  %v1971_v45 = vmul.f32 %v7466_v24, %v1969_v6  ;;  %v5115_v15 = vpop.eup %3475  ;;  %3481 = vpow2.f32 %v1524_v7  ;;  %v1369_v5 = vsub.f32 %v7468_v34, %v7463_v50  ;;  %v1530_v56 = vmul.f32 1.442695, %v1335_v27  ;;  %v7477_v14 = vld [vmem:[#allocation75_spill] sm:$0xff]  ;;  %v7487_v26 = vld [vmem:[#allocation57_spill] sm:$0xff]  ;;  %v5149_v24 = vpop.xlane.xlu1 %1788 }
 0x3ea   :  { %7467 = vst [vmem:[#allocation47_spill] sm:$0xff] %v5115_v15  ;;  %v1953_v51 = vsel %vm1950_vm5, %v1952_v58, %v1948_v55  ;;  %3483 = vpow2.f32 %v1526_v36  ;;  %v1337_v54 = vsub.f32 %v7469_v35, %v7460_v38  ;;  %v1703_v19 = vadd.f32 %v7471_v20, %v7470_v60  ;;  %v7481_v55 = vld [vmem:[#allocation32_spill] sm:$0xff]  ;;  %v7483_v38 = vld [vmem:[#allocation62_spill] sm:$0xff]  ;;  %v7490_v35 = vld [vmem:[#allocation35_spill] sm:$0xff] }
 0x3eb   :  { %3485 = vpow2.f32 %v1528_v37  ;;  %v1532_v10 = vmul.f32 1.442695, %v1336_v31  ;;  %v1370_v21 = vsub.f32 %v7473_v9, %v7472_v3  ;;  %v5125_v61 = vpop.eup %3477  ;;  %v1596_v41 = vmul.f32 1.442695, %v1368_v12  ;;  %v7486_v12 = vld [vmem:[#allocation119_spill] sm:$0xff] }
 0x3ec   :  { %2881 = vmatpush.xpose.msrb.mxu0 %v1970_v30  ;;  %2901 = vmatpush.xpose.msrb.mxu1 %v1971_v45  ;;  %7474 = vst [vmem:[#allocation79_spill] sm:$0xff] %v5125_v61  ;;  %v1371_v46 = vsub.f32 %v7475_v18, %v7472_v3  ;;  %v1954_v7 = vmul.f32 %v7476_v32, %v1953_v51  ;;  %v1598_v59 = vmul.f32 1.442695, %v1369_v5  ;;  %3487 = vpow2.f32 %v1530_v56  ;;  %v7489_v5 = vld [vmem:[#allocation58_spill] sm:$0xff] }
 0x3ed   :  { %v1955_v0 = vmul.f32 %v7477_v14, %v1953_v51  ;;  %v5131_v6 = vpop.eup %3479  ;;  %v1338_v33 = vsub.f32 %v7480_v11, %v7479_v4  ;;  %v1706_v36 = vadd.f32 %v5115_v15, %v5109_v40  ;;  %v1700_v1 = vadd.f32 %v5104_v16, %v5075_v57  ;;  %v7495_v14 = vld [vmem:[#allocation69_spill] sm:$0xff] }
 0x3ee   :  { %1704 = vadd.xlane.f32.xlu2 %v1703_v19  ;;  %7478 = vst [vmem:[#allocation80_spill] sm:$0xff] %v5131_v6  ;;  %v1534_v27 = vmul.f32 1.442695, %v1337_v54  ;;  %v1339_v29 = vsub.f32 %v7481_v55, %v7479_v4  ;;  %3489 = vpow2.f32 %v1532_v10  ;;  %v1340_v31 = vsub.f32 %v7484_v42, %v7483_v38  ;;  %v7491_v19 = vld [vmem:[#allocation55_spill] sm:$0xff]  ;;  %v7492_v10 = vld [vmem:[#allocation82_spill] sm:$0xff] }
 0x3ef   :  { %v5141_v37 = vpop.eup %3481  ;;  %v1600_v58 = vmul.f32 1.442695, %v1370_v21  ;;  %3491 = vpow2.f32 %v1596_v41  ;;  %v1602_v22 = vmul.f32 1.442695, %v1371_v46  ;;  %v1366_v30 = vsub.f32 %v7487_v26, %v7486_v12  ;;  %v5159_v21 = vpop.xlane.xlu0 %1794 }
 0x3f0   :  { %2882 = vmatpush.xpose.msrb.mxu0 %v1954_v7  ;;  %2902 = vmatpush.xpose.msrb.mxu1 %v1955_v0  ;;  %7482 = vst [vmem:[#allocation48_spill] sm:$0xff] %v5141_v37  ;;  %v5145_v50 = vpop.eup %3483  ;;  %v1536_v34 = vmul.f32 1.442695, %v1338_v33  ;;  %3493 = vpow2.f32 %v1598_v59  ;;  %v1367_v51 = vsub.f32 %v7489_v5, %v7486_v12  ;;  %v1538_v56 = vmul.f32 1.442695, %v1339_v29  ;;  %v5165_v7 = vpop.xlane.xlu2 %1791  ;;  %v7496_v0 = vld [vmem:[#allocation40_spill] sm:$0xff] }
 0x3f1   :  { %1707 = vadd.xlane.f32.xlu1 %v1706_v36  ;;  %1701 = vadd.xlane.f32.xlu0 %v1700_v1  ;;  %7485 = vst [vmem:[#allocation83_spill] sm:$0xff] %v5145_v50  ;;  %v5151_v45 = vpop.eup %3485  ;;  %3495 = vpow2.f32 %v1534_v27  ;;  %v1341_v54 = vsub.f32 %v7490_v35, %v7483_v38  ;;  %v1658_v3 = vadd.f32 %v7492_v10, %v7491_v19  ;;  %v1540_v9 = vmul.f32 1.442695, %v1340_v31  ;;  %v7498_v36 = vld [vmem:[#allocation105_spill] sm:$0xff]  ;;  %v7501_v29 = vld [vmem:[#allocation54_spill] sm:$0xff]  ;;  %v5181_v31 = vpop.xlane.xlu1 %1716  ;;  %v7509_v35 = vld [vmem:[#allocation39_spill] sm:$0xff] }
 0x3f2   :  { %7488 = vst [vmem:[#allocation84_spill] sm:$0xff] %v5151_v45  ;;  %3497 = vpow2.f32 %v1600_v58  ;;  %v5161_v41 = vpop.eup %3487  ;;  %v1592_v18 = vmul.f32 1.442695, %v1366_v30  ;;  %v1594_v32 = vmul.f32 1.442695, %v1367_v51  ;;  %v1661_v4 = vadd.f32 %v7496_v0, %v7495_v14  ;;  %v7499_v1 = vld [vmem:[#allocation53_spill] sm:$0xff] }
 0x3f3   :  { %7493 = vst [vmem:[#allocation77_spill] sm:$0xff] %v5161_v41  ;;  %3499 = vpow2.f32 %v1602_v22  ;;  %v1655_v11 = vadd.f32 %v5131_v6, %v5125_v61  ;;  %v1542_v59 = vmul.f32 1.442695, %v1341_v54  ;;  %v1364_v27 = vsub.f32 %v7499_v1, %v7498_v36  ;;  %v7507_v51 = vld [vmem:[#allocation28_spill] sm:$0xff]  ;;  %v7515_v1 = vld [vmem:[#allocation25_spill] sm:$0xff] }
 0x3f4   :  { %v5163_v46 = vpop.eup %3489  ;;  %3501 = vpow2.f32 %v1536_v34  ;;  %v1365_v38 = vsub.f32 %v7501_v29, %v7498_v36  ;;  %v7516_v29 = vld [vmem:[#allocation142_spill] sm:$0xff]  ;;  %v2527_v43 = vand.u32 2147483648, %v7509_v35  ;;  %v2191_v61 = vand.u32 2147483648, %v5181_v31 }
 0x3f5   :  { %7494 = vst [vmem:[#allocation78_spill] sm:$0xff] %v5163_v46  ;;  %v5171_v33 = vpop.eup %3491  ;;  %3503 = vpow2.f32 %v1538_v56  ;;  %v1588_v12 = vmul.f32 1.442695, %v1364_v27  ;;  %v2543_v23 = vand.u32 2147483648, %v7516_v29  ;;  %vm2185_vm7 = vweird.f32 %v5181_v31 }
 0x3f6   :  { %1659 = vadd.xlane.f32.xlu2 %v1658_v3  ;;  %7497 = vst [vmem:[#allocation97_spill] sm:$0xff] %v5171_v33  ;;  %v5175_v55 = vpop.eup %3493  ;;  %3505 = vpow2.f32 %v1540_v9  ;;  %v1590_v34 = vmul.f32 1.442695, %v1365_v38  ;;  %v7510_v9 = vld [vmem:[#allocation56_spill] sm:$0xff]  ;;  %v2189_v44 = vand.u32 2147483647, %v5181_v31  ;;  %vm2601_vm9 = vweird.f32 %v5159_v21 }
 0x3f7   :  { %7500 = vst [vmem:[#allocation27_spill] sm:$0xff] %v5175_v55  ;;  %v5179_v42 = vpop.eup %3495  ;;  %3507 = vpow2.f32 %v1592_v18  ;;  %v1802_v26 = vadd.f32 %v5175_v55, %v5171_v33  ;;  %v5198_v54 = vpop.xlane.xlu0 %1719  ;;  %v7511_v18 = vld [vmem:[#allocation29_spill] sm:$0xff]  ;;  %vm2569_vm4 = vweird.f32 %v5149_v24 }
 0x3f8   :  { %7502 = vst [vmem:[#allocation72_spill] sm:$0xff] %v5179_v42  ;;  %v5183_v58 = vpop.eup %3497  ;;  %3509 = vpow2.f32 %v1594_v32  ;;  %v1652_v32 = vadd.f32 %v7511_v18, %v7510_v9  ;;  %v1754_v25 = vadd.f32 %v5179_v42, %v5163_v46  ;;  %vm2190_vm11 = vcmp.eq.f32.partialorder %v2189_v44, 8.507059e+37 }
 0x3f9   :  { %1662 = vadd.xlane.f32.xlu1 %v1661_v4  ;;  %1656 = vadd.xlane.f32.xlu0 %v1655_v11  ;;  %7503 = vst [vmem:[#allocation73_spill] sm:$0xff] %v5183_v58  ;;  %v5185_v22 = vpop.eup %3499  ;;  %3511 = vpow2.f32 %v1542_v59  ;;  %v5208_v59 = vpop.xlane.xlu2 %1713  ;;  %vm2201_vm14 = vweird.f32 %v5198_v54 }
 0x3fa   :  { %7504 = vst [vmem:[#allocation15_spill] sm:$0xff] %v5185_v22  ;;  %v5189_v30 = vpop.eup %3501  ;;  %3513 = vrcp.f32 %v5181_v31  ;;  %v1805_v3 = vadd.f32 %v5185_v22, %v5183_v58  ;;  %v5246_v62 = vpop.xlane.xlu1 %1725  ;;  %v2173_v17 = vand.u32 2147483647, %v5208_v59  ;;  %vm2169_vm2 = vweird.f32 %v5208_v59 }
 0x3fb   :  { %7505 = vst [vmem:[#allocation23_spill] sm:$0xff] %v5189_v30  ;;  %v5192_v5 = vpop.eup %3503  ;;  %3515 = vrcp.f32 %v7507_v51 }
 0x3fc   :  { %7506 = vst [vmem:[#allocation26_spill] sm:$0xff] %v5192_v5  ;;  %v5195_v56 = vpop.eup %3505  ;;  %3517 = vrcp.f32 %v7509_v35 }
 0x3fd   :  { %7508 = vst [vmem:[#allocation65_spill] sm:$0xff] %v5195_v56  ;;  %v5204_v4 = vpop.eup %3507  ;;  %3519 = vpow2.f32 %v1588_v12 }
 0x3fe   :  { %1803 = vadd.xlane.f32.xlu2 %v1802_v26  ;;  %7512 = vst [vmem:[#allocation102_spill] sm:$0xff] %v5204_v4  ;;  %v5206_v11 = vpop.eup %3509  ;;  %3521 = vpow2.f32 %v1590_v34 }
 0x3ff   :  { %7513 = vst [vmem:[#allocation31_spill] sm:$0xff] %v5206_v11  ;;  %v5210_v36 = vpop.eup %3511  ;;  %3523 = vrcp.f32 %v7515_v1  ;;  %v1799_v12 = vadd.f32 %v5206_v11, %v5204_v4  ;;  %v5231_v55 = vpop.xlane.xlu0 %1728  ;;  %v1751_v11 = vadd.f32 %v5161_v41, %v5151_v45  ;;  %v2511_v45 = vand.u32 2147483648, %v7507_v51 }
 0x400   :  { %7514 = vst [vmem:[#allocation111_spill] sm:$0xff] %v5210_v36  ;;  %v5213_v27 = vpop.eup %3513  ;;  %3525 = vrcp.f32 %v7516_v29  ;;  %v1760_v33 = vadd.f32 %v5210_v36, %v5195_v56  ;;  %v7519_v56 = vld [vmem:[#allocation8_spill] sm:$0xff] }
 0x401   :  { %1806 = vadd.xlane.f32.xlu1 %v1805_v3  ;;  %1653 = vadd.xlane.f32.xlu0 %v1652_v32  ;;  %v5216_v38 = vpop.eup %3515  ;;  %3527 = vrcp.f32 %v5149_v24  ;;  %v2181_v3 = vmul.f32 %v5213_v27, %v5181_v31  ;;  %v5251_v41 = vmul.f32 2.0, %v7519_v56  ;;  %v5265_v56 = vadd.f32 %v5145_v50, %v5141_v37 }
 0x402   :  { %v5221_v26 = vpop.eup %3517  ;;  %3529 = vrcp.f32 %v5159_v21  ;;  %v2501_v22 = vmul.f32 %v5216_v38, %v7507_v51  ;;  %v5306_v53 = vpop.xlane.xlu1 %1815  ;;  %vm2186_vm6 = vweird.f32 %v5213_v27 }
 0x403   :  { %v5224_v34 = vpop.eup %3519  ;;  %3531 = vrcp.f32 %v4870_v39  ;;  %7520 = vst [vmem:[#allocation68_spill] sm:$0xff] %v5251_v41  ;;  %v2182_v52 = vsub.f32 1.0, %v2181_v3  ;;  %vm5341_vm8 = vmor %vm2185_vm7, %vm2186_vm6  ;;  %vm5428_vm6 = vcmp.eq.f32.partialorder %v2173_v17, 8.507059e+37  ;;  %vm2233_vm7 = vweird.f32 %v5246_v62 }
 0x404   :  { %7517 = vst [vmem:[#allocation60_spill] sm:$0xff] %v5224_v34  ;;  %v5228_v32 = vpop.eup %3521  ;;  %3533 = vrcp.f32 %v5198_v54  ;;  %v2502_v2 = vsub.f32 1.0, %v2501_v22  ;;  %v1757_v22 = vadd.f32 %v5192_v5, %v5189_v30 }
 0x405   :  { %7518 = vst [vmem:[#allocation67_spill] sm:$0xff] %v5228_v32  ;;  %v5237_v4 = vpop.eup %3523  ;;  %3535 = vrcp.f32 %v5208_v59  ;;  %v1796_v3 = vadd.f32 %v5228_v32, %v5224_v34  ;;  %v2183_v50 = vmul.f32 %v5213_v27, %v2182_v52  ;;  %v5288_v34 = vor.u32 1.1754944e-38, %v2527_v43 }
 0x406   :  { %1800 = vadd.xlane.f32.xlu2 %v1799_v12  ;;  %v2517_v12 = vmul.f32 %v5221_v26, %v7509_v35  ;;  %v5243_v58 = vpop.eup %3525  ;;  %v2485_v48 = vmul.f32 %v5237_v4, %v7515_v1  ;;  %3537 = vrcp.f32 %v5246_v62  ;;  %7521 = vst [vmem:[#allocation61_spill] sm:$0xff] %v5306_v53 }
 0x407   :  { %v5248_v36 = vpop.eup %3527  ;;  %v2533_v8 = vmul.f32 %v5243_v58, %v7516_v29  ;;  %v5308_v18 = vpop.xlane.xlu0 %1818  ;;  %v2184_v9 = vadd.f32 %v5213_v27, %v2183_v50  ;;  %v2605_v50 = vand.u32 2147483647, %v5159_v21 }
 0x408   :  { %v5255_v63 = vpop.eup %3529  ;;  %v2518_v47 = vsub.f32 1.0, %v2517_v12  ;;  %v2565_v41 = vmul.f32 %v5248_v36, %v5149_v24  ;;  %v5280_v12 = vor.u32 1.1754944e-38, %v2511_v45  ;;  %v2486_v42 = vsub.f32 1.0, %v2485_v48  ;;  %7522 = vst [vmem:[#allocation30_spill] sm:$0xff] %v5308_v18 }
 0x409   :  { %1761 = vadd.xlane.f32.xlu1 %v1760_v33  ;;  %1752 = vadd.xlane.f32.xlu0 %v1751_v11  ;;  %v2495_v33 = vand.u32 2147483648, %v7515_v1  ;;  %v5261_v11 = vpop.xlane.xlu2 %1722  ;;  %v5271_v13 = vpop.eup %3531  ;;  %v2597_v37 = vmul.f32 %v5255_v63, %v5159_v21  ;;  %v5296_v45 = vmul.f32 %v5216_v38, %v2502_v2  ;;  %v2534_v43 = vsub.f32 1.0, %v2533_v8 }
 0x40a   :  { %3539 = vrcp.f32 %v5261_v11  ;;  %v5286_v32 = vpop.eup %3533  ;;  %v5299_v52 = vmul.f32 %v5221_v26, %v2518_v47  ;;  %v2566_v30 = vsub.f32 1.0, %v2565_v41  ;;  %v2575_v48 = vand.u32 2147483648, %v5149_v24  ;;  %v5373_v15 = vpop.xlane.xlu1 %1731 }
 0x40b   :  { %v5290_v46 = vor.u32 1.1754944e-38, %v2495_v33  ;;  %v5293_v5 = vpop.eup %3535  ;;  %3541 = vrcp.f32 %v5165_v7  ;;  %v2559_v33 = vand.u32 2147483648, %v4870_v39  ;;  %v2598_v2 = vsub.f32 1.0, %v2597_v37 }
 0x40c   :  { %v2197_v47 = vmul.f32 %v5286_v32, %v5198_v54  ;;  %v5314_v6 = vpop.eup %3537  ;;  %v5317_v8 = vmul.f32 %v5237_v4, %v2486_v42  ;;  %v5319_v41 = vor.u32 1.1754944e-38, %v2543_v23  ;;  %v5330_v10 = vmul.f32 %v5243_v58, %v2534_v43 }
 0x40d   :  { %v5333_v23 = vmul.f32 %v5248_v36, %v2566_v30  ;;  %v5335_v42 = vor.u32 1.1754944e-38, %v2575_v48  ;;  %v5337_v19 = vor.u32 1.1754944e-38, %v2559_v33  ;;  %v2599_v31 = vmul.f32 %v5255_v63, %v2598_v2 }
 0x40e   :  { %1797 = vadd.xlane.f32.xlu2 %v1796_v3  ;;  %v2549_v3 = vmul.f32 %v5271_v13, %v4870_v39  ;;  %v2198_v57 = vsub.f32 1.0, %v2197_v47  ;;  %v2229_v43 = vmul.f32 %v5314_v6, %v5246_v62  ;;  %v2188_v30 = vsel %vm5341_vm8, %v5213_v27, %v2184_v9 }
 0x40f   :  { %v2192_v48 = vor.u32 1.1754944e-38, %v2191_v61  ;;  %v2607_v33 = vand.u32 2147483648, %v5159_v21  ;;  %vm5360_vm10 = vcmp.eq.f32.partialorder %v2605_v50, 8.507059e+37  ;;  %vm2602_vm12 = vweird.f32 %v5255_v63  ;;  %v5375_v40 = vpop.xlane.xlu0 %1737 }
 0x410   :  { %v5324_v37 = vpop.eup %3539  ;;  %v2550_v49 = vsub.f32 1.0, %v2549_v3  ;;  %v2591_v9 = vand.u32 2147483648, %v5165_v7  ;;  %v2600_v47 = vadd.f32 %v5255_v63, %v2599_v31  ;;  %3543 = vrcp.f32 %v5231_v55  ;;  %v7527_v31 = vld [vmem:[#allocation112_spill] sm:$0xff]  ;;  %vm5389_vm13 = vmor %vm2601_vm9, %vm2602_vm12 }
 0x411   :  { %1758 = vadd.xlane.f32.xlu1 %v1757_v22  ;;  %v2165_v22 = vmul.f32 %v5293_v5, %v5208_v59  ;;  %v5345_v16 = vpop.eup %3541  ;;  %v2213_v60 = vmul.f32 %v5324_v37, %v5261_v11  ;;  %v2193_v27 = vsel %vm2190_vm11, %v2192_v48, %v2188_v30  ;;  %v2608_v50 = vor.u32 1.1754944e-38, %v2607_v33 }
 0x412   :  { %v5357_v0 = vmul.f32 %v5271_v13, %v2550_v49  ;;  %v2581_v61 = vmul.f32 %v5345_v16, %v5165_v7  ;;  %v2199_v49 = vmul.f32 %v5286_v32, %v2198_v57  ;;  %v2207_v3 = vand.u32 2147483648, %v5198_v54  ;;  %v7529_v57 = vld [vmem:[#allocation113_spill] sm:$0xff] }
 0x413   :  { %v2166_v20 = vsub.f32 1.0, %v2165_v22  ;;  %v2230_v22 = vsub.f32 1.0, %v2229_v43  ;;  %v2214_v14 = vsub.f32 1.0, %v2213_v60  ;;  %v2205_v30 = vand.u32 2147483647, %v5198_v54 }
 0x414   :  { %v5380_v48 = vmul.f32 %v7527_v31, %v2193_v27  ;;  %v5383_v43 = vmul.f32 %v7529_v57, %v2193_v27  ;;  %v5393_v33 = vor.u32 1.1754944e-38, %v2591_v9  ;;  %v2200_v27 = vadd.f32 %v5286_v32, %v2199_v49 }
 0x415   :  { %v2167_v44 = vmul.f32 %v5293_v5, %v2166_v20  ;;  %v2582_v20 = vsub.f32 1.0, %v2581_v61  ;;  %v2231_v31 = vmul.f32 %v5314_v6, %v2230_v22  ;;  %vm2202_vm15 = vweird.f32 %v5286_v32 }
 0x416   :  { %7528 = vst [vmem:[#allocation114_spill] sm:$0xff] %v5380_v48  ;;  %v2604_v21 = vsel %vm5389_vm13, %v5255_v63, %v2600_v47  ;;  %v2208_v57 = vor.u32 1.1754944e-38, %v2207_v3  ;;  %vm2170_vm0 = vweird.f32 %v5293_v5  ;;  %v5406_v9 = vpop.eup %3543  ;;  %v2239_v49 = vand.u32 2147483648, %v5246_v62  ;;  %vm5424_vm5 = vmor %vm2201_vm14, %vm2202_vm15  ;;  %v7547_v3 = vld [vmem:[#allocation120_spill] sm:$0xff] }
 0x417   :  { %7530 = vst [vmem:[#allocation63_spill] sm:$0xff] %v5383_v43  ;;  %v2215_v43 = vmul.f32 %v5324_v37, %v2214_v14  ;;  %v2168_v61 = vadd.f32 %v5293_v5, %v2167_v44  ;;  %vm5410_vm3 = vcmp.eq.f32.partialorder %v2205_v30, 8.507059e+37  ;;  %v5416_v63 = vmul.f32 %v5345_v16, %v2582_v20  ;;  %vm5444_vm9 = vmor %vm2169_vm2, %vm2170_vm0 }
 0x418   :  { %v2223_v14 = vand.u32 2147483648, %v5261_v11  ;;  %v2609_v44 = vsel %vm5360_vm10, %v2608_v50, %v2604_v21  ;;  %vm2234_vm8 = vweird.f32 %v5314_v6  ;;  %v2204_v54 = vsel %vm5424_vm5, %v5286_v32, %v2200_v27  ;;  %v7543_v27 = vld [vmem:[#allocation115_spill] sm:$0xff] }
 0x419   :  { %1755 = vadd.xlane.f32.xlu1 %v1754_v25  ;;  %v2175_v25 = vand.u32 2147483648, %v5208_v59  ;;  %v2216_v50 = vadd.f32 %v5324_v37, %v2215_v43  ;;  %vm2218_vm10 = vweird.f32 %v5324_v37  ;;  %v2172_v32 = vsel %vm5444_vm9, %v5293_v5, %v2168_v61  ;;  %vm5467_vm12 = vmor %vm2233_vm7, %vm2234_vm8 }
 0x41a   :  { %v2240_v30 = vor.u32 1.1754944e-38, %v2239_v49  ;;  %vm2217_vm11 = vweird.f32 %v5261_v11  ;;  %v2237_v59 = vand.u32 2147483647, %v5246_v62  ;;  %v2221_v60 = vand.u32 2147483647, %v5261_v11 }
 0x41b   :  { %v2176_v22 = vor.u32 1.1754944e-38, %v2175_v25  ;;  %v2232_v25 = vadd.f32 %v5314_v6, %v2231_v31  ;;  %v2224_v20 = vor.u32 1.1754944e-38, %v2223_v14  ;;  %3545 = vrcp.f32 %v5306_v53  ;;  %v5461_v31 = vpop.xlane.xlu1 %1824  ;;  %vm5480_vm13 = vmor %vm2217_vm11, %vm2218_vm10 }
 0x41c   :  { %v2209_v5 = vsel %vm5410_vm3, %v2208_v57, %v2204_v54  ;;  %v5474_v21 = vmul.f32 %v7543_v27, %v2609_v44  ;;  %3547 = vrcp.f32 %v5373_v15  ;;  %v2573_v49 = vand.u32 2147483647, %v5149_v24  ;;  %v5487_v57 = vpop.xlane.xlu2 %1734  ;;  %v7549_v54 = vld [vmem:[#allocation121_spill] sm:$0xff]  ;;  %v7555_v27 = vld [vmem:[#allocation123_spill] sm:$0xff] }
 0x41d   :  { %v2236_v11 = vsel %vm5467_vm12, %v5314_v6, %v2232_v25  ;;  %v2177_v62 = vsel %vm5428_vm6, %v2176_v22, %v2172_v32  ;;  %v2220_v14 = vsel %vm5480_vm13, %v5324_v37, %v2216_v50  ;;  %v2568_v47 = vadd.f32 %v5248_v36, %v5333_v23  ;;  %v7551_v37 = vld [vmem:[#allocation116_spill] sm:$0xff]  ;;  %v7553_v32 = vld [vmem:[#allocation122_spill] sm:$0xff] }
 0x41e   :  { %7544 = vst [vmem:[#allocation64_spill] sm:$0xff] %v5474_v21  ;;  %vm2570_vm14 = vweird.f32 %v5248_v36  ;;  %v2255_v6 = vand.u32 2147483648, %v5231_v55  ;;  %3549 = vrcp.f32 %v5308_v18  ;;  %vm2238_vm15 = vcmp.eq.f32.partialorder %v2237_v59, 8.507059e+37  ;;  %v7568_v59 = vld [vmem:[#allocation125_spill] sm:$0xff] }
 0x41f   :  { %vm2222_vm0 = vcmp.eq.f32.partialorder %v2221_v60, 8.507059e+37  ;;  %v2253_v22 = vand.u32 2147483647, %v5231_v55  ;;  %v5499_v25 = vmul.f32 %v7547_v3, %v2209_v5  ;;  %v5502_v17 = vmul.f32 %v7549_v54, %v2209_v5  ;;  %vm5515_vm2 = vmor %vm2569_vm4, %vm2570_vm14 }
 0x420   :  { %v2241_v23 = vsel %vm2238_vm15, %v2240_v30, %v2236_v11  ;;  %v2225_v50 = vsel %vm2222_vm0, %v2224_v20, %v2220_v14  ;;  %v5508_v43 = vmul.f32 %v7553_v32, %v2177_v62  ;;  %v5511_v61 = vmul.f32 %v7555_v27, %v2177_v62  ;;  %v7573_v20 = vld [vmem:[#allocation106_spill] sm:$0xff] }
 0x421   :  { %1749 = vadd.xlane.f32.xlu1 %v5265_v56  ;;  %v2245_v56 = vmul.f32 %v5406_v9, %v5231_v55  ;;  %7548 = vst [vmem:[#allocation74_spill] sm:$0xff] %v5499_v25  ;;  %v5519_v60 = vpop.eup %3545  ;;  %vm2249_vm3 = vweird.f32 %v5231_v55  ;;  %v2572_v30 = vsel %vm5515_vm2, %v5248_v36, %v2568_v47  ;;  %vm5528_vm5 = vcmp.eq.f32.partialorder %v2573_v49, 8.507059e+37  ;;  %v7564_v36 = vld [vmem:[#allocation126_spill] sm:$0xff]  ;;  %v7565_v47 = vld [vmem:[#allocation127_spill] sm:$0xff] }
 0x422   :  { %7550 = vst [vmem:[#allocation75_spill] sm:$0xff] %v5502_v17  ;;  %v5532_v24 = vpop.eup %3547  ;;  %vm2585_vm4 = vweird.f32 %v5165_v7  ;;  %v2256_v11 = vor.u32 1.1754944e-38, %v2255_v6  ;;  %v2719_v62 = vand.u32 2147483648, %v5306_v53  ;;  %vm5540_vm6 = vcmp.eq.f32.partialorder %v2253_v22, 8.507059e+37 }
 0x423   :  { %v2246_v48 = vsub.f32 1.0, %v2245_v56  ;;  %v5505_v56 = vmul.f32 %v7551_v37, %v2609_v44  ;;  %7554 = vst [vmem:[#allocation33_spill] sm:$0xff] %v5508_v43  ;;  %v5538_v14 = vpop.xlane.xlu1 %1740  ;;  %v5545_v49 = vmul.f32 %v7564_v36, %v2241_v23  ;;  %v5548_v54 = vmul.f32 %v7565_v47, %v2241_v23  ;;  %v7566_v37 = vld [vmem:[#allocation124_spill] sm:$0xff] }
 0x424   :  { %v5450_v2 = vpop.xlane.xlu0 %1827  ;;  %7556 = vst [vmem:[#allocation32_spill] sm:$0xff] %v5511_v61  ;;  %v5551_v6 = vmul.f32 %v7566_v37, %v2225_v50  ;;  %v5553_v32 = vpop.eup %3549  ;;  %v2735_v27 = vand.u32 2147483648, %v5308_v18  ;;  %v5558_v22 = vmul.f32 %v7568_v59, %v2225_v50  ;;  %v2577_v36 = vsel %vm5528_vm5, %v5335_v42, %v2572_v30 }
 0x425   :  { %7552 = vst [vmem:[#allocation59_spill] sm:$0xff] %v5505_v56  ;;  %v2247_v5 = vmul.f32 %v5406_v9, %v2246_v48  ;;  %v2589_v48 = vand.u32 2147483647, %v5165_v7  ;;  %v2709_v23 = vmul.f32 %v5519_v60, %v5306_v53  ;;  %v2261_v47 = vmul.f32 %v5532_v24, %v5373_v15 }
 0x426   :  { %7559 = vst [vmem:[#allocation62_spill] sm:$0xff] %v5519_v60  ;;  %vm2250_vm7 = vweird.f32 %v5406_v9  ;;  %vm2553_vm8 = vweird.f32 %v4870_v39  ;;  %v5570_v56 = vor.u32 1.1754944e-38, %v2719_v62  ;;  %v2271_v50 = vand.u32 2147483648, %v5373_v15 }
 0x427   :  { %7567 = vst [vmem:[#allocation34_spill] sm:$0xff] %v5553_v32  ;;  %v2248_v37 = vadd.f32 %v5406_v9, %v2247_v5  ;;  %vm5574_vm9 = vcmp.eq.f32.partialorder %v2589_v48, 8.507059e+37  ;;  %vm2537_vm10 = vweird.f32 %v7516_v29  ;;  %v2725_v30 = vmul.f32 %v5553_v32, %v5308_v18  ;;  %v5581_v5 = vpop.xlane.xlu2 %1821  ;;  %vm5594_vm11 = vmor %vm2249_vm3, %vm2250_vm7 }
 0x428   :  { %7569 = vst [vmem:[#allocation119_spill] sm:$0xff] %v5570_v56  ;;  %v5584_v59 = vmul.f32 %v7573_v20, %v2577_v36  ;;  %v2557_v62 = vand.u32 2147483647, %v4870_v39  ;;  %v2541_v56 = vand.u32 2147483647, %v7516_v29  ;;  %v5590_v48 = vor.u32 1.1754944e-38, %v2735_v27 }
 0x429   :  { %7572 = vst [vmem:[#allocation57_spill] sm:$0xff] %v5581_v5  ;;  %v2584_v18 = vadd.f32 %v5345_v16, %v5416_v63  ;;  %vm2586_vm12 = vweird.f32 %v5345_v16  ;;  %v7578_v20 = vld [vmem:[#allocation107_spill] sm:$0xff]  ;;  %v2710_v61 = vsub.f32 1.0, %v2709_v23  ;;  %v2262_v43 = vsub.f32 1.0, %v2261_v47 }
 0x42a   :  { %7574 = vst [vmem:[#allocation58_spill] sm:$0xff] %v5584_v59  ;;  %v5602_v59 = vmul.f32 %v7578_v20, %v2577_v36  ;;  %v2252_v55 = vsel %vm5594_vm11, %v5406_v9, %v2248_v37  ;;  %v5612_v25 = vor.u32 1.1754944e-38, %v2271_v50  ;;  %v2269_v63 = vand.u32 2147483647, %v5373_v15  ;;  %vm5626_vm0 = vmor %vm2585_vm4, %vm2586_vm12 }
 0x42b   :  { %7575 = vst [vmem:[#allocation35_spill] sm:$0xff] %v5590_v48  ;;  %vm2554_vm13 = vweird.f32 %v5271_v13  ;;  %vm2538_vm14 = vweird.f32 %v5243_v58  ;;  %v2726_v36 = vsub.f32 1.0, %v2725_v30  ;;  %vm2265_vm15 = vweird.f32 %v5373_v15 }
 0x42c   :  { %v5523_v44 = vpop.xlane.xlu0 %1743  ;;  %7579 = vst [vmem:[#allocation105_spill] sm:$0xff] %v5602_v59  ;;  %v2303_v23 = vand.u32 2147483648, %v5375_v40  ;;  %vm5630_vm2 = vcmp.eq.f32.partialorder %v2557_v62, 8.507059e+37  ;;  %vm5634_vm3 = vcmp.eq.f32.partialorder %v2541_v56, 8.507059e+37  ;;  %v2257_v30 = vsel %vm5540_vm6, %v2256_v11, %v2252_v55  ;;  %vm5673_vm5 = vmor %vm2553_vm8, %vm2554_vm13 }
 0x42d   :  { %3551 = vrcp.f32 %v5523_v44  ;;  %v2588_v7 = vsel %vm5626_vm0, %v5345_v16, %v2584_v18  ;;  %v2552_v62 = vadd.f32 %v5271_v13, %v5357_v0  ;;  %v2263_v20 = vmul.f32 %v5532_v24, %v2262_v43  ;;  %v7592_v18 = vld [vmem:[#allocation128_spill] sm:$0xff]  ;;  %vm5695_vm7 = vmor %vm2537_vm10, %vm2538_vm14 }
 0x42e   :  { %3553 = vrcp.f32 %v5375_v40  ;;  %v2536_v27 = vadd.f32 %v5243_v58, %v5330_v10  ;;  %v5655_v3 = vmul.f32 %v5519_v60, %v2710_v61  ;;  %v2767_v11 = vand.u32 2147483648, %v5461_v31  ;;  %v7597_v60 = vld [vmem:[#allocation129_spill] sm:$0xff] }
 0x42f   :  { %3555 = vrcp.f32 %v5538_v14  ;;  %v5660_v0 = vor.u32 1.1754944e-38, %v2303_v23  ;;  %v2593_v10 = vsel %vm5574_vm9, %v5393_v33, %v2588_v7  ;;  %v5678_v23 = vmul.f32 %v5553_v32, %v2726_v36 }
 0x430   :  { %7586 = vst [vmem:[#allocation53_spill] sm:$0xff] %v5655_v3  ;;  %vm2266_vm4 = vweird.f32 %v5532_v24  ;;  %vm5681_vm6 = vcmp.eq.f32.partialorder %v2269_v63, 8.507059e+37  ;;  %v5686_v42 = vmul.f32 %v7592_v18, %v2257_v30  ;;  %v2556_v39 = vsel %vm5673_vm5, %v5271_v13, %v2552_v62 }
 0x431   :  { %7589 = vst [vmem:[#allocation54_spill] sm:$0xff] %v5678_v23  ;;  %v2287_v7 = vand.u32 2147483648, %v5487_v57  ;;  %v2264_v18 = vadd.f32 %v5532_v24, %v2263_v20  ;;  %v2540_v13 = vsel %vm5695_vm7, %v5243_v58, %v2536_v27  ;;  %v5710_v29 = vor.u32 1.1754944e-38, %v2767_v11  ;;  %v7600_v27 = vld [vmem:[#allocation118_spill] sm:$0xff]  ;;  %vm5738_vm11 = vmor %vm2265_vm15, %vm2266_vm4 }
 0x432   :  { %v5715_v3 = vmul.f32 %v7597_v60, %v2257_v30  ;;  %vm2522_vm8 = vweird.f32 %v5221_v26  ;;  %v5725_v33 = vmul.f32 %v7600_v27, %v2593_v10  ;;  %v5729_v11 = vadd.f32 %v5221_v26, %v5299_v52 }
 0x433   :  { %v5588_v53 = vpop.eup %3551  ;;  %7596 = vst [vmem:[#allocation39_spill] sm:$0xff] %v5710_v29  ;;  %vm2521_vm9 = vweird.f32 %v7509_v35  ;;  %v2561_v52 = vsel %vm5630_vm2, %v5337_v19, %v2556_v39  ;;  %v2268_v15 = vsel %vm5738_vm11, %v5532_v24, %v2264_v18  ;;  %vm2297_vm12 = vweird.f32 %v5375_v40 }
 0x434   :  { %v5604_v17 = vpop.xlane.xlu0 %1746  ;;  %v5610_v48 = vpop.eup %3553  ;;  %v2325_v9 = vmul.f32 %v5588_v53, %v5523_v44  ;;  %7601 = vst [vmem:[#allocation142_spill] sm:$0xff] %v5725_v33  ;;  %vm2330_vm14 = vweird.f32 %v5588_v53  ;;  %v2335_v24 = vand.u32 2147483648, %v5523_v44  ;;  %vm2329_vm0 = vweird.f32 %v5523_v44 }
 0x435   :  { %3557 = vrcp.f32 %v5604_v17  ;;  %v5638_v50 = vpop.eup %3555  ;;  %v2293_v56 = vmul.f32 %v5610_v48, %v5375_v40  ;;  %v5664_v21 = vpop.xlane.xlu2 %1830  ;;  %vm2298_vm10 = vweird.f32 %v5610_v48  ;;  %v2349_v39 = vand.u32 2147483647, %v5604_v17 }
 0x436   :  { %3559 = vrcp.f32 %v5461_v31  ;;  %v2309_v43 = vmul.f32 %v5638_v50, %v5538_v14  ;;  %v2326_v55 = vsub.f32 1.0, %v2325_v9  ;;  %vm2345_vm15 = vweird.f32 %v5604_v17 }
 0x437   :  { %3561 = vrcp.f32 %v5487_v57  ;;  %v2294_v63 = vsub.f32 1.0, %v2293_v56  ;;  %v7598_v56 = vld [vmem:[#allocation117_spill] sm:$0xff]  ;;  %v7612_v9 = vand.u32 2147483647, %v7509_v35  ;;  %vm2350_vm4 = vcmp.eq.f32.partialorder %v2349_v39, 8.507059e+37 }
 0x438   :  { %v5718_v32 = vmul.f32 %v7598_v56, %v2593_v10  ;;  %v2310_v23 = vsub.f32 1.0, %v2309_v43  ;;  %v2327_v58 = vmul.f32 %v5588_v53, %v2326_v55  ;;  %v2545_v55 = vsel %vm5634_vm3, %v5319_v41, %v2540_v13  ;;  %v7604_v13 = vld [vmem:[#allocation108_spill] sm:$0xff]  ;;  %v7608_v43 = vld [vmem:[#allocation109_spill] sm:$0xff]  ;;  %vm5793_vm3 = vmor %vm2329_vm0, %vm2330_vm14 }
 0x439   :  { %v2295_v10 = vmul.f32 %v5610_v48, %v2294_v63  ;;  %v5753_v56 = vor.u32 1.1754944e-38, %v2287_v7  ;;  %v2351_v41 = vand.u32 2147483648, %v5604_v17  ;;  %v5774_v27 = vmul.f32 %v7604_v13, %v2561_v52 }
 0x43a   :  { %7599 = vst [vmem:[#allocation25_spill] sm:$0xff] %v5718_v32  ;;  %v2311_v37 = vmul.f32 %v5638_v50, %v2310_v23  ;;  %v2328_v7 = vadd.f32 %v5588_v53, %v2327_v58  ;;  %v2273_v58 = vsel %vm5681_vm6, %v5612_v25, %v2268_v15  ;;  %v5786_v30 = vmul.f32 %v7608_v43, %v2561_v52 }
 0x43b   :  { %v5699_v36 = vpop.eup %3557  ;;  %7605 = vst [vmem:[#allocation8_spill] sm:$0xff] %v5774_v27  ;;  %vm5800_vm5 = vcmp.eq.f32.partialorder %v7612_v9, 8.507059e+37  ;;  %vm2314_vm6 = vweird.f32 %v5638_v50  ;;  %vm2506_vm11 = vweird.f32 %v5216_v38  ;;  %vm2313_vm14 = vweird.f32 %v5538_v14  ;;  %v7628_v9 = vld [vmem:[#allocation101_spill] sm:$0xff] }
 0x43c   :  { %v5702_v16 = vpop.xlane.xlu0 %1833  ;;  %v5708_v62 = vpop.eup %3559  ;;  %v2341_v61 = vmul.f32 %v5699_v36, %v5604_v17  ;;  %vm2346_vm13 = vweird.f32 %v5699_v36  ;;  %7609 = vst [vmem:[#allocation112_spill] sm:$0xff] %v5786_v30  ;;  %v2352_v17 = vor.u32 1.1754944e-38, %v2351_v41  ;;  %v2332_v52 = vsel %vm5793_vm3, %v5588_v53, %v2328_v7  ;;  %v7619_v7 = vld [vmem:[#allocation99_spill] sm:$0xff]  ;;  %vm5835_vm3 = vmor %vm2313_vm14, %vm2314_vm6 }
 0x43d   :  { %7595 = vst [vmem:[#allocation28_spill] sm:$0xff] %v5708_v62  ;;  %v5721_v20 = vpop.eup %3561  ;;  %vm5777_vm2 = vmor %vm2345_vm15, %vm2346_vm13  ;;  %v2312_v15 = vadd.f32 %v5638_v50, %v2311_v37  ;;  %vm2281_vm13 = vweird.f32 %v5487_v57  ;;  %v2336_v41 = vor.u32 1.1754944e-38, %v2335_v24  ;;  %vm2505_vm15 = vweird.f32 %v7507_v51  ;;  %v7618_v37 = vld [vmem:[#allocation66_spill] sm:$0xff] }
 0x43e   :  { %v2342_v60 = vsub.f32 1.0, %v2341_v61  ;;  %v5751_v61 = vmul.f32 %v5708_v62, %v5461_v31  ;;  %v2277_v19 = vmul.f32 %v5721_v20, %v5487_v57  ;;  %v2317_v27 = vand.u32 2147483647, %v5538_v14  ;;  %vm5926_vm6 = vmor %vm2505_vm15, %vm2506_vm11 }
 0x43f   :  { %3563 = vrcp.f32 %v5581_v5  ;;  %v2504_v23 = vadd.f32 %v5216_v38, %v5296_v45 }
 0x440   :  { %v2343_v47 = vmul.f32 %v5699_v36, %v2342_v60  ;;  %v2333_v60 = vand.u32 2147483647, %v5523_v44  ;;  %v2296_v44 = vadd.f32 %v5610_v48, %v2295_v10  ;;  %v2319_v10 = vand.u32 2147483648, %v5538_v14  ;;  %v7624_v14 = vld [vmem:[#allocation100_spill] sm:$0xff] }
 0x441   :  { %v5766_v63 = vpop.xlane.xlu2 %1842  ;;  %v2758_v24 = vsub.f32 1.0, %v5751_v61  ;;  %v2316_v61 = vsel %vm5835_vm3, %v5638_v50, %v2312_v15 }
 0x442   :  { %v2344_v18 = vadd.f32 %v5699_v36, %v2343_v47  ;;  %v2278_v47 = vsub.f32 1.0, %v2277_v19  ;;  %vm2334_vm0 = vcmp.eq.f32.partialorder %v2333_v60, 8.507059e+37  ;;  %v5840_v60 = vmul.f32 %v7624_v14, %v2545_v55 }
 0x444   :  { %v5788_v29 = vpop.xlane.xlu0 %1710  ;;  %v2348_v13 = vsel %vm5777_vm2, %v5699_v36, %v2344_v18  ;;  %v7615_v36 = vand.u32 2147483647, %v5375_v40  ;;  %vm5827_vm2 = vmor %vm2521_vm9, %vm2522_vm8  ;;  %v2279_v43 = vmul.f32 %v5721_v20, %v2278_v47  ;;  %7625 = vst [vmem:[#allocation113_spill] sm:$0xff] %v5840_v60  ;;  %v7630_v40 = vld [vmem:[#allocation17_spill] sm:$0xff]  ;;  %vm2318_vm9 = vcmp.eq.f32.partialorder %v2317_v27, 8.507059e+37  ;;  %v7681_v60 = vld [vmem:[#allocation74_spill] sm:$0xff] }
 0x445   :  { %v2353_v53 = vsel %vm2350_vm4, %v2352_v17, %v2348_v13  ;;  %v2337_v17 = vsel %vm2334_vm0, %v2336_v41, %v2332_v52  ;;  %vm2489_vm4 = vweird.f32 %v7515_v1  ;;  %vm5853_vm8 = vmor %vm2297_vm12, %vm2298_vm10  ;;  %v5858_v52 = vmul.f32 %v7628_v9, %v2545_v55 }
 0x446   :  { %vm5811_vm7 = vcmp.eq.f32.partialorder %v7615_v36, 8.507059e+37  ;;  %v2354_v39 = vmul.f32 %v7618_v37, %v2353_v53  ;;  %v2355_v18 = vmul.f32 %v7619_v7, %v2353_v53  ;;  %v2524_v36 = vsel %vm5827_vm2, %v5221_v26, %v5729_v11  ;;  %v7631_v53 = vld [vmem:[#allocation46_spill] sm:$0xff] }
 0x447   :  { %7629 = vst [vmem:[#allocation115_spill] sm:$0xff] %v5858_v52  ;;  %v2320_v41 = vor.u32 1.1754944e-38, %v2319_v10  ;;  %v2300_v50 = vsel %vm5853_vm8, %v5610_v48, %v2296_v44  ;;  %v5869_v15 = vmul.f32 %v7630_v40, %v2273_v58  ;;  %v2338_v55 = vmul.f32 %v7631_v53, %v2337_v17  ;;  %v7632_v37 = vld [vmem:[#allocation14_spill] sm:$0xff]  ;;  %v7633_v48 = vld [vmem:[#allocation52_spill] sm:$0xff]  ;;  %v7646_v40 = vld [vmem:[#allocation91_spill] sm:$0xff] }
 0x448   :  { %2913 = vmatpush.xpose.msrb.mxu2 %v2354_v39  ;;  %2933 = vmatpush.xpose.msrb.mxu3 %v2355_v18  ;;  %v2339_v39 = vmul.f32 %v7632_v37, %v2337_v17  ;;  %v2280_v10 = vadd.f32 %v5721_v20, %v2279_v43  ;;  %vm2282_vm10 = vweird.f32 %v5721_v20  ;;  %v5881_v44 = vmul.f32 %v7633_v48, %v2273_v58  ;;  %v7636_v17 = vld [vmem:[#allocation51_spill] sm:$0xff] }
 0x449   :  { %v5844_v35 = vpop.xlane.xlu2 %1668  ;;  %v2321_v11 = vsel %vm2318_vm9, %v2320_v41, %v2316_v61  ;;  %v5884_v18 = vmul.f32 %v5708_v62, %v2758_v24  ;;  %v2529_v27 = vsel %vm5800_vm5, %v5288_v34, %v2524_v36  ;;  %v2751_v43 = vand.u32 2147483648, %v5581_v5  ;;  %v5898_v24 = vpop.eup %3563  ;;  %v7637_v34 = vld [vmem:[#allocation132_spill] sm:$0xff]  ;;  %vm5907_vm5 = vmor %vm2281_vm13, %vm2282_vm10  ;;  %v7640_v61 = vld [vmem:[#allocation90_spill] sm:$0xff] }
 0x44a   :  { %3565 = vrcp.f32 %v5844_v35  ;;  %v2305_v58 = vsel %vm5811_vm7, %v5660_v0, %v2300_v50  ;;  %vm2490_vm12 = vweird.f32 %v5237_v4  ;;  %7635 = vst [vmem:[#allocation121_spill] sm:$0xff] %v5898_v24  ;;  %v2322_v25 = vmul.f32 %v7636_v17, %v2321_v11 }
 0x44b   :  { %3567 = vrcp.f32 %v5766_v63  ;;  %7634 = vst [vmem:[#allocation120_spill] sm:$0xff] %v5884_v18  ;;  %v2323_v13 = vmul.f32 %v7637_v34, %v2321_v11  ;;  %v2488_v0 = vadd.f32 %v5237_v4, %v5317_v8  ;;  %v2284_v14 = vsel %vm5907_vm5, %v5721_v20, %v2280_v10  ;;  %v7649_v10 = vld [vmem:[#allocation21_spill] sm:$0xff]  ;;  %vm5955_vm13 = vmor %vm2489_vm4, %vm2490_vm12 }
 0x44c   :  { %v5874_v7 = vpop.xlane.xlu1 %1836  ;;  %v5876_v26 = vpop.xlane.xlu0 %1665  ;;  %3569 = vrcp.f32 %v5450_v2  ;;  %2914 = vmatpush.xpose.msrb.mxu2 %v2338_v55  ;;  %2934 = vmatpush.xpose.msrb.mxu3 %v2339_v39  ;;  %v5920_v47 = vmul.f32 %v7640_v61, %v2529_v27  ;;  %v2493_v8 = vand.u32 2147483647, %v7515_v1  ;;  %v7645_v20 = vand.u32 2147483647, %v5487_v57  ;;  %v7648_v39 = vld [vmem:[#allocation20_spill] sm:$0xff] }
 0x44d   :  { %3571 = vrcp.f32 %v5876_v26  ;;  %v5940_v53 = vmul.f32 %v7646_v40, %v2529_v27  ;;  %v2508_v55 = vsel %vm5926_vm6, %v5216_v38, %v2504_v23  ;;  %v2741_v37 = vmul.f32 %v5898_v24, %v5581_v5 }
 0x44e   :  { %3573 = vrcp.f32 %v5664_v21  ;;  %7641 = vst [vmem:[#allocation116_spill] sm:$0xff] %v5920_v47  ;;  %vm2286_vm7 = vcmp.eq.f32.partialorder %v7645_v20, 8.507059e+37  ;;  %v2306_v11 = vmul.f32 %v7648_v39, %v2305_v58  ;;  %v2307_v48 = vmul.f32 %v7649_v10, %v2305_v58 }
 0x44f   :  { %3575 = vrcp.f32 %v5788_v29  ;;  %7647 = vst [vmem:[#allocation123_spill] sm:$0xff] %v5940_v53  ;;  %v7650_v17 = vand.u32 2147483647, %v7507_v51  ;;  %v5961_v38 = vor.u32 1.1754944e-38, %v2751_v43  ;;  %v2492_v51 = vsel %vm5955_vm13, %v5237_v4, %v2488_v0 }
 0x450   :  { %v5913_v19 = vpop.eup %3565  ;;  %2915 = vmatpush.xpose.msrb.mxu2 %v2322_v25  ;;  %2935 = vmatpush.xpose.msrb.mxu3 %v2323_v13  ;;  %v2289_v25 = vsel %vm2286_vm7, %v5753_v56, %v2284_v14  ;;  %v1935_v34 = vand.u32 2147483648, %v5844_v35  ;;  %vm2494_vm14 = vcmp.eq.f32.partialorder %v2493_v8, 8.507059e+37  ;;  %v1933_v0 = vand.u32 2147483647, %v5844_v35 }
 0x451   :  { %v5931_v36 = vpop.eup %3567  ;;  %v1925_v41 = vmul.f32 %v5913_v19, %v5844_v35  ;;  %v5935_v50 = vpop.xlane.xlu2 %1812  ;;  %vm2510_vm11 = vcmp.eq.f32.partialorder %v7650_v17, 8.507059e+37  ;;  %7653 = vst [vmem:[#allocation126_spill] sm:$0xff] %v5961_v38  ;;  %vm1930_vm15 = vweird.f32 %v5913_v19  ;;  %v2742_v9 = vsub.f32 1.0, %v2741_v37  ;;  %v7682_v38 = vld [vmem:[#allocation75_spill] sm:$0xff] }
 0x452   :  { %7644 = vst [vmem:[#allocation122_spill] sm:$0xff] %v5935_v50  ;;  %v5959_v27 = vpop.eup %3569  ;;  %v2853_v1 = vmul.f32 %v5931_v36, %v5766_v63  ;;  %v2513_v43 = vsel %vm2510_vm11, %v5280_v12, %v2508_v55  ;;  %v7656_v12 = vld [vmem:[#allocation37_spill] sm:$0xff]  ;;  %v2497_v40 = vsel %vm2494_vm14, %v5290_v46, %v2492_v51  ;;  %3577 = vrcp.f32 %v5702_v16 }
 0x453   :  { %v1926_v23 = vsub.f32 1.0, %v1925_v41  ;;  %v5967_v58 = vpop.eup %3571  ;;  %v7655_v41 = vld [vmem:[#allocation36_spill] sm:$0xff]  ;;  %v2291_v8 = vmul.f32 %v7656_v12, %v2289_v25  ;;  %vm1929_vm0 = vweird.f32 %v5844_v35  ;;  %vm1934_vm3 = vcmp.eq.f32.partialorder %v1933_v0, 8.507059e+37  ;;  %v7659_v0 = vld [vmem:[#allocation87_spill] sm:$0xff] }
 0x454   :  { %v5972_v13 = vpop.xlane.xlu1 %1839  ;;  %v5974_v45 = vpop.xlane.xlu0 %1809  ;;  %v1909_v4 = vmul.f32 %v5967_v58, %v5876_v26  ;;  %2916 = vmatpush.xpose.msrb.mxu2 %v2306_v11  ;;  %2936 = vmatpush.xpose.msrb.mxu3 %v2307_v48  ;;  %v2290_v20 = vmul.f32 %v7655_v41, %v2289_v25  ;;  %v2773_v11 = vmul.f32 %v5959_v27, %v5450_v2  ;;  %v2854_v37 = vsub.f32 1.0, %v2853_v1  ;;  %vm1931_vm2 = vmor %vm1929_vm0, %vm1930_vm15  ;;  %v7657_v1 = vld [vmem:[#allocation41_spill] sm:$0xff] }
 0x455   :  { %7654 = vst [vmem:[#allocation127_spill] sm:$0xff] %v5974_v45  ;;  %v5977_v61 = vpop.eup %3573  ;;  %v1927_v56 = vmul.f32 %v5913_v19, %v1926_v23  ;;  %v1936_v48 = vor.u32 1.1754944e-38, %v1935_v34  ;;  %3579 = vrcp.f32 %v5874_v7  ;;  %v1919_v23 = vand.u32 2147483648, %v5876_v26 }
 0x456   :  { %v5984_v14 = vpop.eup %3575  ;;  %v1910_v55 = vsub.f32 1.0, %v1909_v4  ;;  %v2789_v10 = vmul.f32 %v5977_v61, %v5664_v21  ;;  %v1917_v51 = vand.u32 2147483647, %v5876_v26  ;;  %vm1914_vm4 = vweird.f32 %v5967_v58 }
 0x457   :  { %v1928_v39 = vadd.f32 %v5913_v19, %v1927_v56  ;;  %v2149_v46 = vmul.f32 %v5984_v14, %v5788_v29  ;;  %v7658_v56 = vld [vmem:[#allocation76_spill] sm:$0xff]  ;;  %vm1913_vm8 = vweird.f32 %v5876_v26  ;;  %3581 = vrcp.f32 %v5935_v50 }
 0x458   :  { %v1911_v17 = vmul.f32 %v5967_v58, %v1910_v55  ;;  %2917 = vmatpush.xpose.msrb.mxu2 %v2290_v20  ;;  %2937 = vmatpush.xpose.msrb.mxu3 %v2291_v8  ;;  %v2783_v20 = vand.u32 2147483648, %v5450_v2  ;;  %v6017_v8 = vmul.f32 %v7659_v0, %v2513_v43  ;;  %v7661_v55 = vld [vmem:[#allocation88_spill] sm:$0xff]  ;;  %v2799_v0 = vand.u32 2147483648, %v5664_v21  ;;  %vm1915_vm9 = vmor %vm1913_vm8, %vm1914_vm4 }
 0x459   :  { %v6001_v35 = vpop.xlane.xlu2 %1767  ;;  %v1932_v57 = vsel %vm1931_vm2, %v5913_v19, %v1928_v39  ;;  %v6020_v39 = vmul.f32 %v7661_v55, %v2513_v43  ;;  %v2855_v43 = vmul.f32 %v5931_v36, %v2854_v37  ;;  %v2150_v55 = vsub.f32 1.0, %v2149_v46 }
 0x45a   :  { %v1937_v25 = vsel %vm1934_vm3, %v1936_v48, %v1932_v57  ;;  %v1912_v41 = vadd.f32 %v5967_v58, %v1911_v17  ;;  %7660 = vst [vmem:[#allocation124_spill] sm:$0xff] %v6017_v8  ;;  %v7663_v48 = vld [vmem:[#allocation89_spill] sm:$0xff]  ;;  %v6028_v17 = vmul.f32 %v5898_v24, %v2742_v9  ;;  %v2790_v9 = vsub.f32 1.0, %v2789_v10 }
 0x45b   :  { %v1938_v34 = vmul.f32 %v7657_v1, %v1937_v25  ;;  %v1939_v4 = vmul.f32 %v7658_v56, %v1937_v25  ;;  %7662 = vst [vmem:[#allocation125_spill] sm:$0xff] %v6020_v39  ;;  %v6023_v57 = vmul.f32 %v7663_v48, %v2497_v40  ;;  %v6025_v25 = vpop.eup %3577  ;;  %v2774_v1 = vsub.f32 1.0, %v2773_v11  ;;  %v7666_v56 = vld [vmem:[#allocation92_spill] sm:$0xff] }
 0x45c   :  { %v6012_v12 = vpop.xlane.xlu1 %1770  ;;  %v6014_v19 = vpop.xlane.xlu0 %1764  ;;  %7665 = vst [vmem:[#allocation107_spill] sm:$0xff] %v6028_v17  ;;  %v6032_v53 = vmul.f32 %v7666_v56, %v2497_v40  ;;  %v1920_v48 = vor.u32 1.1754944e-38, %v1919_v23  ;;  %2918 = vmatpush.xpose.msrb.mxu2 %v5869_v15  ;;  %2938 = vmatpush.xpose.msrb.mxu3 %v5881_v44  ;;  %v1916_v26 = vsel %vm1915_vm9, %v5967_v58, %v1912_v41  ;;  %vm1918_vm10 = vcmp.eq.f32.partialorder %v1917_v51, 8.507059e+37  ;;  %v7669_v58 = vld [vmem:[#allocation38_spill] sm:$0xff] }
 0x45d   :  { %7664 = vst [vmem:[#allocation106_spill] sm:$0xff] %v6023_v57  ;;  %2883 = vmatpush.xpose.msrb.mxu0 %v1938_v34  ;;  %2903 = vmatpush.xpose.msrb.mxu1 %v1939_v4  ;;  %v6042_v40 = vpop.eup %3579  ;;  %v6044_v11 = vor.u32 1.1754944e-38, %v2783_v20  ;;  %v2805_v37 = vmul.f32 %v6025_v25, %v5702_v16  ;;  %3583 = vrcp.f32 %v5972_v13  ;;  %v6050_v44 = vmul.f32 %v5959_v27, %v2774_v1  ;;  %v7670_v4 = vld [vmem:[#allocation45_spill] sm:$0xff] }
 0x45e   :  { %7667 = vst [vmem:[#allocation128_spill] sm:$0xff] %v6032_v53  ;;  %v1921_v15 = vsel %vm1918_vm10, %v1920_v48, %v1916_v26  ;;  %v2815_v10 = vand.u32 2147483648, %v5702_v16  ;;  %vm2858_vm12 = vweird.f32 %v5931_v36  ;;  %v2856_v51 = vadd.f32 %v5931_v36, %v2855_v43 }
 0x45f   :  { %7668 = vst [vmem:[#allocation129_spill] sm:$0xff] %v6044_v11  ;;  %v1922_v23 = vmul.f32 %v7669_v58, %v1921_v15  ;;  %v2151_v34 = vmul.f32 %v5984_v14, %v2150_v55  ;;  %v1923_v41 = vmul.f32 %v7670_v4, %v1921_v15  ;;  %v6064_v20 = vmul.f32 %v5977_v61, %v2790_v9 }
 0x460   :  { %2919 = vmatpush.xpose.msrb.mxu2 %v5686_v42  ;;  %2939 = vmatpush.xpose.msrb.mxu3 %v5715_v3  ;;  %v6066_v1 = vor.u32 1.1754944e-38, %v2799_v0  ;;  %v2861_v56 = vand.u32 2147483647, %v5766_v63  ;;  %v2863_v48 = vand.u32 2147483648, %v5766_v63  ;;  %v2806_v43 = vsub.f32 1.0, %v2805_v37  ;;  %v6078_v0 = vpop.eup %3581 }
 0x461   :  { %v6054_v46 = vpop.xlane.xlu2 %1704  ;;  %2884 = vmatpush.xpose.msrb.mxu0 %v1922_v23  ;;  %vm2857_vm5 = vweird.f32 %v5766_v63  ;;  %v2821_v55 = vmul.f32 %v6042_v40, %v5874_v7  ;;  %2904 = vmatpush.xpose.msrb.mxu1 %v1923_v41  ;;  %7672 = vst [vmem:[#allocation118_spill] sm:$0xff] %v6078_v0  ;;  %v6080_v9 = vor.u32 1.1754944e-38, %v2815_v10  ;;  %v2159_v63 = vand.u32 2147483648, %v5788_v29 }
 0x462   :  { %3585 = vrcp.f32 %v6054_v46  ;;  %7671 = vst [vmem:[#allocation117_spill] sm:$0xff] %v6066_v1  ;;  %vm6084_vm6 = vmor %vm2857_vm5, %vm2858_vm12  ;;  %v2157_v37 = vand.u32 2147483647, %v5788_v29  ;;  %v2152_v10 = vadd.f32 %v5984_v14, %v2151_v34  ;;  %vm2154_vm7 = vweird.f32 %v5984_v14 }
 0x463   :  { %3587 = vrcp.f32 %v5974_v45  ;;  %v6091_v15 = vpop.eup %3583  ;;  %v2860_v58 = vsel %vm6084_vm6, %v5931_v36, %v2856_v51  ;;  %vm2862_vm11 = vcmp.eq.f32.partialorder %v2861_v56, 8.507059e+37  ;;  %v2864_v23 = vor.u32 1.1754944e-38, %v2863_v48 }
 0x464   :  { %v6074_v3 = vpop.xlane.xlu1 %1707  ;;  %v6076_v42 = vpop.xlane.xlu0 %1701  ;;  %2920 = vmatpush.xpose.msrb.mxu2 %v5545_v49  ;;  %2940 = vmatpush.xpose.msrb.mxu3 %v5548_v54  ;;  %v2831_v4 = vand.u32 2147483648, %v5874_v7  ;;  %v2703_v41 = vand.u32 2147483648, %v5935_v50  ;;  %v6106_v49 = vmul.f32 %v6025_v25, %v2806_v43  ;;  %vm2153_vm13 = vweird.f32 %v5788_v29 }
 0x465   :  { %3589 = vrcp.f32 %v6074_v3  ;;  %v2822_v54 = vsub.f32 1.0, %v2821_v55  ;;  %v2847_v34 = vand.u32 2147483648, %v5972_v13  ;;  %v2160_v57 = vor.u32 1.1754944e-38, %v2159_v63  ;;  %vm6118_vm14 = vmor %vm2153_vm13, %vm2154_vm7  ;;  %v7687_v63 = vld [vmem:[#allocation144_spill] sm:$0xff] }
 0x466   :  { %3591 = vrcp.f32 %v6076_v42  ;;  %v2693_v36 = vmul.f32 %v6078_v0, %v5935_v50  ;;  %v2837_v51 = vmul.f32 %v6091_v15, %v5972_v13  ;;  %v2865_v43 = vsel %vm2862_vm11, %v2864_v23, %v2860_v58  ;;  %v7683_v50 = vld [vmem:[#allocation71_spill] sm:$0xff] }
 0x467   :  { %v2687_v55 = vand.u32 2147483648, %v5974_v45  ;;  %v2156_v26 = vsel %vm6118_vm14, %v5984_v14, %v2152_v10  ;;  %vm6131_vm15 = vcmp.eq.f32.partialorder %v2157_v37, 8.507059e+37  ;;  %v6137_v58 = vor.u32 1.1754944e-38, %v2831_v4 }
 0x468   :  { %v6103_v53 = vpop.eup %3585  ;;  %2921 = vmatpush.xpose.msrb.mxu2 %v5551_v6  ;;  %2941 = vmatpush.xpose.msrb.mxu3 %v5558_v22  ;;  %v6139_v23 = vor.u32 1.1754944e-38, %v2703_v41  ;;  %v2463_v8 = vand.u32 2147483648, %v6001_v35  ;;  %v6147_v48 = vmul.f32 %v6042_v40, %v2822_v54  ;;  %v6149_v14 = vor.u32 1.1754944e-38, %v2847_v34 }
 0x469   :  { %v6114_v56 = vpop.xlane.xlu2 %1659  ;;  %v6122_v29 = vpop.eup %3587  ;;  %v2117_v6 = vmul.f32 %v6103_v53, %v6054_v46  ;;  %v6158_v41 = vmul.f32 %v4914_v28, %v2865_v43  ;;  %v2838_v47 = vsub.f32 1.0, %v2837_v51  ;;  %v2161_v54 = vsel %vm6131_vm15, %v2160_v57, %v2156_v26 }
 0x46a   :  { %3593 = vrcp.f32 %v6114_v56  ;;  %7679 = vst [vmem:[#allocation108_spill] sm:$0xff] %v6139_v23  ;;  %v2694_v23 = vsub.f32 1.0, %v2693_v36  ;;  %v6163_v52 = vor.u32 1.1754944e-38, %v2687_v55  ;;  %v6169_v30 = vmul.f32 %v7683_v50, %v2865_v43  ;;  %v7685_v50 = vld [vmem:[#allocation143_spill] sm:$0xff] }
 0x46b   :  { %v6135_v39 = vpop.eup %3589  ;;  %v6173_v28 = vmul.f32 %v6122_v29, %v5974_v45  ;;  %v6175_v36 = vor.u32 1.1754944e-38, %v2463_v8  ;;  %v2118_v51 = vsub.f32 1.0, %v2117_v6  ;;  %v2162_v43 = vmul.f32 %v7685_v50, %v2161_v54  ;;  %v7689_v50 = vld [vmem:[#allocation63_spill] sm:$0xff] }
 0x46c   :  { %v6144_v22 = vpop.eup %3591  ;;  %v2133_v37 = vmul.f32 %v6135_v39, %v6074_v3  ;;  %v6153_v10 = vpop.xlane.xlu1 %1662  ;;  %7680 = vst [vmem:[#allocation109_spill] sm:$0xff] %v6163_v52  ;;  %2922 = vmatpush.xpose.msrb.mxu2 %v7681_v60  ;;  %2942 = vmatpush.xpose.msrb.mxu3 %v7682_v38  ;;  %v6186_v26 = vmul.f32 %v6078_v0, %v2694_v23  ;;  %v6193_v52 = vld.sshfl [vmem:[#allocation1 + $0x8] sm:$0xff pattern:$0x75316420]  ;;  %vm2138_vm0 = vweird.f32 %v6135_v39  ;;  %vm2137_vm2 = vweird.f32 %v6074_v3 }
 0x46d   :  { %v6155_v4 = vpop.xlane.xlu0 %1656  ;;  %3595 = vrcp.f32 %v6153_v10  ;;  %7684 = vst [vmem:[#allocation66_spill] sm:$0xff] %v6175_v36  ;;  %v2101_v57 = vmul.f32 %v6144_v22, %v6076_v42  ;;  %v2839_v8 = vmul.f32 %v6091_v15, %v2838_v47  ;;  %v2163_v6 = vmul.f32 %v7687_v63, %v2161_v54  ;;  %v7690_v47 = vld [vmem:[#allocation9_spill] sm:$0xff]  ;;  %vm6221_vm4 = vmor %vm2137_vm2, %vm2138_vm0  ;;  %v7694_v54 = vld [vmem:[#allocation32_spill] sm:$0xff] }
 0x46e   :  { %3597 = vrcp.f32 %v6001_v35  ;;  %v2134_v34 = vsub.f32 1.0, %v2133_v37  ;;  %7686 = vst [vmem:[#allocation99_spill] sm:$0xff] %v6186_v26  ;;  %v6191_v37 = vld.sshfl [vmem:[#allocation1] sm:$0xff pattern:$0x75316420]  ;;  %v2143_v36 = vand.u32 2147483648, %v6074_v3  ;;  %v2119_v63 = vmul.f32 %v6103_v53, %v2118_v51 }
 0x46f   :  { %3599 = vrcp.f32 %v6012_v12  ;;  %2953 = vst [vmem:[#allocation1] ss:$2 sm:$0xff] %v7690_v47  ;;  %v2102_v0 = vsub.f32 1.0, %v2101_v57  ;;  %v2141_v47 = vand.u32 2147483647, %v6074_v3  ;;  %vm2121_vm3 = vweird.f32 %v6054_v46  ;;  %v7693_v3 = vld [vmem:[#allocation33_spill] sm:$0xff] }
 0x470   :  { %v6179_v55 = vpop.eup %3593  ;;  %v2135_v38 = vmul.f32 %v6135_v39, %v2134_v34  ;;  %3601 = vrcp.f32 %v6014_v19  ;;  %v7688_v34 = vld [vmem:[#allocation114_spill] sm:$0xff]  ;;  %2943 = vmatpush.xpose.msrb.mxu3 %v7689_v50  ;;  %v2125_v57 = vand.u32 2147483647, %v6054_v46  ;;  %v6227_v24 = vadd.f32 %v6091_v15, %v2839_v8 }
 0x471   :  { %3603 = vrcp.f32 %v6155_v4  ;;  %2923 = vmatpush.xpose.msrb.mxu2 %v7688_v34  ;;  %v1877_v26 = vmul.f32 %v6179_v55, %v6114_v56  ;;  %v2127_v34 = vand.u32 2147483648, %v6054_v46  ;;  %v2144_v11 = vor.u32 1.1754944e-38, %v2143_v36 }
 0x472   :  { %v2136_v23 = vadd.f32 %v6135_v39, %v2135_v38  ;;  %vm2842_vm8 = vweird.f32 %v6091_v15  ;;  %v2103_v8 = vmul.f32 %v6144_v22, %v2102_v0  ;;  %v2120_v36 = vadd.f32 %v6103_v53, %v2119_v63 }
 0x473   :  { %v6202_v60 = vpop.eup %3595  ;;  %v1878_v1 = vsub.f32 1.0, %v1877_v26  ;;  %vm2122_vm9 = vweird.f32 %v6103_v53  ;;  %vm2841_vm10 = vweird.f32 %v5972_v13  ;;  %vm2142_vm12 = vcmp.eq.f32.partialorder %v2141_v47, 8.507059e+37 }
 0x474   :  { %v6208_v45 = vpop.eup %3597  ;;  %v1893_v38 = vmul.f32 %v6202_v60, %v6153_v10  ;;  %2944 = vmatpush.xpose.msrb.mxu3 %v7694_v54  ;;  %v2140_v62 = vsel %vm6221_vm4, %v6135_v39, %v2136_v23  ;;  %v2128_v54 = vor.u32 1.1754944e-38, %v2127_v34  ;;  %vm1898_vm5 = vweird.f32 %v6202_v60  ;;  %vm6258_vm11 = vmor %vm2121_vm3, %vm2122_vm9  ;;  %v6276_v47 = vpop.xlane.xlu1 %1806  ;;  %v7699_v34 = vld [vmem:[#allocation110_spill] sm:$0xff] }
 0x475   :  { %v6214_v50 = vpop.xlane.xlu0 %1653  ;;  %v6229_v17 = vpop.eup %3599  ;;  %2924 = vmatpush.xpose.msrb.mxu2 %v7693_v3  ;;  %vm2105_vm6 = vweird.f32 %v6076_v42  ;;  %v2111_v39 = vand.u32 2147483648, %v6076_v42  ;;  %v1903_v0 = vand.u32 2147483648, %v6153_v10  ;;  %v2145_v26 = vsel %vm2142_vm12, %v2144_v11, %v2140_v62  ;;  %vm6313_vm12 = vmor %vm2841_vm10, %vm2842_vm8 }
 0x476   :  { %v1894_v59 = vsub.f32 1.0, %v1893_v38  ;;  %3605 = vrcp.f32 %v6214_v50  ;;  %v6238_v18 = vpop.eup %3601  ;;  %vm1897_vm7 = vweird.f32 %v6153_v10  ;;  %v1901_v63 = vand.u32 2147483647, %v6153_v10 }
 0x477   :  { %v6243_v38 = vpop.eup %3603  ;;  %vm2106_vm13 = vweird.f32 %v6144_v22  ;;  %v1879_v62 = vmul.f32 %v6179_v55, %v1878_v1  ;;  %vm6266_vm14 = vmor %vm1897_vm7, %vm1898_vm5  ;;  %v2124_v10 = vsel %vm6258_vm11, %v6103_v53, %v2120_v36  ;;  %v2104_v46 = vadd.f32 %v6144_v22, %v2103_v8  ;;  %v7700_v1 = vld [vmem:[#allocation47_spill] sm:$0xff] }
 0x478   :  { %v1895_v3 = vmul.f32 %v6202_v60, %v1894_v59  ;;  %2945 = vmatpush.xpose.msrb.mxu3 %v2163_v6  ;;  %v1861_v11 = vmul.f32 %v6243_v38, %v6155_v4  ;;  %v2146_v51 = vmul.f32 %v7699_v34, %v2145_v26  ;;  %vm2126_vm15 = vcmp.eq.f32.partialorder %v2125_v57, 8.507059e+37  ;;  %vm6293_vm3 = vmor %vm2105_vm6, %vm2106_vm13 }
 0x479   :  { %2925 = vmatpush.xpose.msrb.mxu2 %v2162_v43  ;;  %v1887_v32 = vand.u32 2147483648, %v6114_v56  ;;  %v1904_v5 = vor.u32 1.1754944e-38, %v1903_v0  ;;  %v1885_v53 = vand.u32 2147483647, %v6114_v56  ;;  %v2109_v8 = vand.u32 2147483647, %v6076_v42  ;;  %v6305_v42 = vpop.xlane.xlu2 %1803 }
 0x47a   :  { %v1896_v23 = vadd.f32 %v6202_v60, %v1895_v3  ;;  %v2147_v3 = vmul.f32 %v7700_v1, %v2145_v26  ;;  %vm1902_vm0 = vcmp.eq.f32.partialorder %v1901_v63, 8.507059e+37  ;;  %v2129_v59 = vsel %vm2126_vm15, %v2128_v54, %v2124_v10  ;;  %v7703_v54 = vld [vmem:[#allocation69_spill] sm:$0xff]  ;;  %v7704_v10 = vld [vmem:[#allocation40_spill] sm:$0xff]  ;;  %v7705_v1 = vld [vmem:[#allocation138_spill] sm:$0xff] }
 0x47b   :  { %vm1882_vm2 = vweird.f32 %v6179_v55  ;;  %v1862_v57 = vsub.f32 1.0, %v1861_v11  ;;  %v1880_v26 = vadd.f32 %v6179_v55, %v1879_v62  ;;  %v2112_v63 = vor.u32 1.1754944e-38, %v2111_v39 }
 0x47c   :  { %v6274_v6 = vpop.eup %3605  ;;  %v1900_v33 = vsel %vm6266_vm14, %v6202_v60, %v1896_v23  ;;  %2946 = vmatpush.xpose.msrb.mxu3 %v2147_v3  ;;  %v2108_v23 = vsel %vm6293_vm3, %v6144_v22, %v2104_v46  ;;  %vm1881_vm4 = vweird.f32 %v6114_v56  ;;  %v2130_v11 = vmul.f32 %v7705_v1, %v2129_v59  ;;  %v7710_v60 = vld [vmem:[#allocation93_spill] sm:$0xff] }
 0x47d   :  { %v1845_v36 = vmul.f32 %v6274_v6, %v6214_v50  ;;  %2926 = vmatpush.xpose.msrb.mxu2 %v2146_v51  ;;  %v1905_v0 = vsel %vm1902_vm0, %v1904_v5, %v1900_v33  ;;  %v2845_v51 = vand.u32 2147483647, %v5972_v13  ;;  %v7706_v5 = vld [vmem:[#allocation141_spill] sm:$0xff]  ;;  %vm2110_vm9 = vcmp.eq.f32.partialorder %v2109_v8, 8.507059e+37  ;;  %vm1883_vm5 = vmor %vm1881_vm4, %vm1882_vm2 }
 0x47e   :  { %v1906_v43 = vmul.f32 %v7703_v54, %v1905_v0  ;;  %v1907_v34 = vmul.f32 %v7704_v10, %v1905_v0  ;;  %v2131_v33 = vmul.f32 %v7706_v5, %v2129_v59  ;;  %v1888_v39 = vor.u32 1.1754944e-38, %v1887_v32  ;;  %v7711_v0 = vld [vmem:[#allocation94_spill] sm:$0xff]  ;;  %v7716_v5 = vld [vmem:[#allocation85_spill] sm:$0xff] }
 0x47f   :  { %v1846_v62 = vsub.f32 1.0, %v1845_v36  ;;  %v2113_v56 = vsel %vm2110_vm9, %v2112_v63, %v2108_v23  ;;  %v2844_v46 = vsel %vm6313_vm12, %v6091_v15, %v6227_v24  ;;  %v7709_v3 = vand.u32 2147483648, %v6012_v12  ;;  %v7712_v63 = vld [vmem:[#allocation55_spill] sm:$0xff]  ;;  %v7713_v10 = vld [vmem:[#allocation82_spill] sm:$0xff] }
 0x480   :  { %2885 = vmatpush.xpose.msrb.mxu0 %v1906_v43  ;;  %2905 = vmatpush.xpose.msrb.mxu1 %v1907_v34  ;;  %v1863_v8 = vmul.f32 %v6243_v38, %v1862_v57  ;;  %v1884_v32 = vsel %vm1883_vm5, %v6179_v55, %v1880_v26  ;;  %vm1886_vm8 = vcmp.eq.f32.partialorder %v1885_v53, 8.507059e+37  ;;  %vm2825_vm10 = vweird.f32 %v5874_v7  ;;  %v6343_v26 = vpop.xlane.xlu1 %1761 }
 0x481   :  { %v6325_v13 = vor.u32 1.1754944e-38, %v7709_v3  ;;  %2927 = vmatpush.xpose.msrb.mxu2 %v2130_v11  ;;  %2947 = vmatpush.xpose.msrb.mxu3 %v2131_v33  ;;  %v6332_v36 = vmul.f32 %v6208_v45, %v6001_v35  ;;  %v1871_v59 = vand.u32 2147483648, %v6155_v4  ;;  %v1889_v24 = vsel %vm1886_vm8, %v1888_v39, %v1884_v32  ;;  %v7718_v3 = vld [vmem:[#allocation86_spill] sm:$0xff] }
 0x482   :  { %vm2846_vm6 = vcmp.eq.f32.partialorder %v2845_v51, 8.507059e+37  ;;  %v6337_v15 = vmul.f32 %v6229_v17, %v6012_v12  ;;  %v2114_v57 = vmul.f32 %v7710_v60, %v2113_v56  ;;  %v2115_v23 = vmul.f32 %v7711_v0, %v2113_v56  ;;  %v6386_v56 = vpop.xlane.xlu2 %1800 }
 0x483   :  { %v2849_v55 = vsel %vm2846_vm6, %v6149_v14, %v2844_v46  ;;  %v1847_v53 = vmul.f32 %v6274_v6, %v1846_v62  ;;  %v1890_v54 = vmul.f32 %v7712_v63, %v1889_v24  ;;  %v6348_v43 = vadd.f32 %v6042_v40, %v6147_v48 }
 0x484   :  { %vm2826_vm7 = vweird.f32 %v6042_v40  ;;  %vm2809_vm11 = vweird.f32 %v5702_v16  ;;  %vm1865_vm13 = vweird.f32 %v6155_v4  ;;  %v1891_v34 = vmul.f32 %v7713_v10, %v1889_v24  ;;  %v7722_v24 = vld [vmem:[#allocation80_spill] sm:$0xff] }
 0x485   :  { %2928 = vmatpush.xpose.msrb.mxu2 %v2114_v57  ;;  %2948 = vmatpush.xpose.msrb.mxu3 %v2115_v23  ;;  %v1864_v14 = vadd.f32 %v6243_v38, %v1863_v8  ;;  %vm1866_vm14 = vweird.f32 %v6243_v38  ;;  %v6358_v51 = vmul.f32 %v6238_v18, %v6014_v19  ;;  %v1872_v48 = vor.u32 1.1754944e-38, %v1871_v59  ;;  %v7721_v59 = vld [vmem:[#allocation79_spill] sm:$0xff]  ;;  %vm6408_vm12 = vmor %vm2825_vm10, %vm2826_vm7 }
 0x486   :  { %2886 = vmatpush.xpose.msrb.mxu0 %v1890_v54  ;;  %vm6361_vm15 = vmor %vm1865_vm13, %vm1866_vm14  ;;  %v1869_v11 = vand.u32 2147483647, %v6155_v4  ;;  %v2850_v33 = vmul.f32 %v7716_v5, %v2849_v55  ;;  %3607 = vrcp.f32 %v6305_v42  ;;  %vm1849_vm0 = vweird.f32 %v6214_v50  ;;  %2906 = vmatpush.xpose.msrb.mxu1 %v1891_v34  ;;  %v6426_v34 = vpop.xlane.xlu0 %1752 }
 0x487   :  { %v1855_v22 = vand.u32 2147483648, %v6214_v50  ;;  %vm2793_vm2 = vweird.f32 %v5664_v21  ;;  %v1848_v4 = vadd.f32 %v6274_v6, %v1847_v53  ;;  %vm1850_vm4 = vweird.f32 %v6274_v6 }
 0x488   :  { %2929 = vmatmul.f32.vlgmr.msrb.gmra.mxu2 %v6191_v37  ;;  %vm1870_vm3 = vcmp.eq.f32.partialorder %v1869_v11, 8.507059e+37  ;;  %2949 = vmatmul.f32.vlgmr.msrb.gmra.mxu3 %v6193_v52  ;;  %v1853_v39 = vand.u32 2147483647, %v6214_v50  ;;  %v7717_v62 = vsub.f32 1.0, %v6173_v28  ;;  %v2851_v8 = vmul.f32 %v7718_v3, %v2849_v55  ;;  %vm6391_vm9 = vmor %vm1849_vm0, %vm1850_vm4 }
 0x489   :  { %2998 = vmatpush.xpose.msra.mxu2 %v6158_v41  ;;  %3018 = vmatpush.xpose.msra.mxu3 %v6169_v30  ;;  %v1868_v41 = vsel %vm6361_vm15, %v6243_v38, %v1864_v14  ;;  %v2454_v38 = vsub.f32 1.0, %v6332_v36  ;;  %3609 = vrcp.f32 %v6276_v47  ;;  %v1852_v36 = vsel %vm6391_vm9, %v6274_v6, %v1848_v4  ;;  %v6428_v14 = vpop.xlane.xlu1 %1758 }
 0x48a   :  { %v6383_v30 = vmul.f32 %v6122_v29, %v7717_v62  ;;  %v1873_v46 = vsel %vm1870_vm3, %v1872_v48, %v1868_v41  ;;  %v2470_v57 = vsub.f32 1.0, %v6337_v15  ;;  %v2438_v0 = vsub.f32 1.0, %v6358_v51  ;;  %v7729_v41 = vld [vmem:[#allocation103_spill] sm:$0xff]  ;;  %v7758_v51 = vld [vmem:[#allocation140_spill] sm:$0xff] }
 0x48b   :  { %v1874_v28 = vmul.f32 %v7721_v59, %v1873_v46  ;;  %v1875_v60 = vmul.f32 %v7722_v24, %v1873_v46  ;;  %v2655_v50 = vand.u32 2147483648, %v6305_v42  ;;  %v1856_v23 = vor.u32 1.1754944e-38, %v1855_v22  ;;  %v7732_v46 = vld [vmem:[#allocation59_spill] sm:$0xff] }
 0x48c   :  { %vm2777_vm5 = vweird.f32 %v5450_v2  ;;  %vm1854_vm8 = vcmp.eq.f32.partialorder %v1853_v39, 8.507059e+37  ;;  %v2828_v6 = vsel %vm6408_vm12, %v6042_v40, %v6348_v43  ;;  %v2829_v15 = vand.u32 2147483647, %v5874_v7  ;;  %v6420_v63 = vpop.eup %3607  ;;  %v7725_v40 = vld [vmem:[#allocation56_spill] sm:$0xff]  ;;  %v7726_v43 = vld [vmem:[#allocation29_spill] sm:$0xff] }
 0x48d   :  { %2999 = vmatpush.xpose.msra.mxu2 %v2850_v33  ;;  %3019 = vmatpush.xpose.msra.mxu3 %v2851_v8  ;;  %v2808_v53 = vadd.f32 %v6025_v25, %v6106_v49  ;;  %v2671_v54 = vand.u32 2147483648, %v6276_v47  ;;  %3611 = vrcp.f32 %v6386_v56  ;;  %v1857_v10 = vsel %vm1854_vm8, %v1856_v23, %v1852_v36  ;;  %v7730_v39 = vld [vmem:[#allocation104_spill] sm:$0xff]  ;;  %v7744_v49 = vld [vmem:[#allocation30_spill] sm:$0xff] }
 0x48e   :  { %2887 = vmatpush.xpose.msrb.mxu0 %v1874_v28  ;;  %2907 = vmatpush.xpose.msrb.mxu1 %v1875_v60  ;;  %vm2810_vm10 = vweird.f32 %v6025_v25  ;;  %3613 = vrcp.f32 %v6343_v26  ;;  %v1858_v7 = vmul.f32 %v7725_v40, %v1857_v10  ;;  %v1859_v48 = vmul.f32 %v7726_v43, %v1857_v10  ;;  %v7740_v40 = vld [vmem:[#allocation142_spill] sm:$0xff] }
 0x48f   :  { %vm2830_vm6 = vcmp.eq.f32.partialorder %v2829_v15, 8.507059e+37  ;;  %vm6434_vm7 = vmor %vm2809_vm11, %vm2810_vm10  ;;  %v2813_v5 = vand.u32 2147483647, %v5702_v16  ;;  %v2792_v33 = vadd.f32 %v5977_v61, %v6064_v20  ;;  %v6445_v22 = vpop.eup %3609  ;;  %vm2761_vm13 = vweird.f32 %v5461_v31  ;;  %v7731_v20 = vld [vmem:[#allocation64_spill] sm:$0xff] }
 0x490   :  { %v2833_v1 = vsel %vm2830_vm6, %v6137_v58, %v2828_v6  ;;  %v2812_v11 = vsel %vm6434_vm7, %v6025_v25, %v2808_v53  ;;  %vm2794_vm11 = vweird.f32 %v5977_v61  ;;  %v2797_v58 = vand.u32 2147483647, %v5664_v21  ;;  %v7735_v21 = vld [vmem:[#allocation57_spill] sm:$0xff]  ;;  %v7738_v6 = vld [vmem:[#allocation70_spill] sm:$0xff] }
 0x491   :  { %v2834_v4 = vmul.f32 %v7729_v41, %v2833_v1  ;;  %v2835_v62 = vmul.f32 %v7730_v39, %v2833_v1  ;;  %v6454_v16 = vmul.f32 %v6420_v63, %v6305_v42  ;;  %v2639_v25 = vand.u32 2147483648, %v6386_v56  ;;  %vm6462_vm15 = vmor %vm2793_vm2, %vm2794_vm11  ;;  %v6534_v41 = vpop.xlane.xlu1 %1755 }
 0x492   :  { %2888 = vmatpush.xpose.msrb.mxu0 %v1858_v7  ;;  %2908 = vmatpush.xpose.msrb.mxu1 %v1859_v48  ;;  %3615 = vrcp.f32 %v6426_v34  ;;  %vm2814_vm14 = vcmp.eq.f32.partialorder %v2813_v5, 8.507059e+37  ;;  %v2796_v32 = vsel %vm6462_vm15, %v5977_v61, %v2792_v33  ;;  %v2776_v59 = vadd.f32 %v5959_v27, %v6050_v44  ;;  %v6488_v44 = vpop.xlane.xlu2 %1797  ;;  %v7741_v7 = vld [vmem:[#allocation117_spill] sm:$0xff]  ;;  %v7746_v5 = vld [vmem:[#allocation28_spill] sm:$0xff] }
 0x493   :  { %3000 = vmatpush.xpose.msra.mxu2 %v2834_v4  ;;  %3020 = vmatpush.xpose.msra.mxu3 %v2835_v62  ;;  %v2817_v8 = vsel %vm2814_vm14, %v6080_v9, %v2812_v11  ;;  %vm2778_vm0 = vweird.f32 %v5959_v27  ;;  %v6473_v28 = vpop.eup %3611  ;;  %vm2745_vm2 = vweird.f32 %v7735_v21  ;;  %v6477_v24 = vmul.f32 %v6208_v45, %v2454_v38  ;;  %v7737_v38 = vld [vmem:[#allocation95_spill] sm:$0xff]  ;;  %v7745_v11 = vld [vmem:[#allocation120_spill] sm:$0xff]  ;;  %v7747_v4 = vld [vmem:[#allocation42_spill] sm:$0xff] }
 0x494   :  { %v6480_v60 = vmul.f32 %v6229_v17, %v2470_v57  ;;  %v7736_v9 = vand.u32 2147483648, %v6014_v19  ;;  %v2661_v61 = vmul.f32 %v6445_v22, %v6276_v47  ;;  %v6492_v23 = vpop.eup %3613  ;;  %v2818_v55 = vmul.f32 %v7737_v38, %v2817_v8  ;;  %vm6515_vm4 = vmor %vm2777_vm5, %vm2778_vm0  ;;  %v7748_v62 = vld [vmem:[#allocation49_spill] sm:$0xff] }
 0x495   :  { %2889 = vmatmul.f32.vlgmr.msrb.gmra.mxu0 %v6191_v37  ;;  %2909 = vmatmul.f32.vlgmr.msrb.gmra.mxu1 %v6193_v52  ;;  %v2819_v57 = vmul.f32 %v7738_v6, %v2817_v8  ;;  %vm2798_vm3 = vcmp.eq.f32.partialorder %v2797_v58, 8.507059e+37  ;;  %v2781_v15 = vand.u32 2147483647, %v5450_v2  ;;  %v6500_v53 = vmul.f32 %v6238_v18, %v2438_v0  ;;  %v7739_v52 = vld [vmem:[#allocation25_spill] sm:$0xff]  ;;  %v7754_v8 = vld [vmem:[#allocation107_spill] sm:$0xff] }
 0x496   :  { %2958 = vmatpush.xpose.msra.mxu0 %v7731_v20  ;;  %2978 = vmatpush.xpose.msra.mxu1 %v7732_v46  ;;  %v6484_v36 = vor.u32 1.1754944e-38, %v7736_v9  ;;  %v6504_v10 = vor.u32 1.1754944e-38, %v2655_v50  ;;  %v6506_v37 = vor.u32 1.1754944e-38, %v2671_v54  ;;  %v2801_v43 = vsel %vm2798_vm3, %v7741_v7, %v2796_v32  ;;  %v7751_v20 = vld [vmem:[#allocation129_spill] sm:$0xff]  ;;  %v7757_v7 = vld [vmem:[#allocation139_spill] sm:$0xff] }
 0x497   :  { %v2646_v0 = vsub.f32 1.0, %v6454_v16  ;;  %v6520_v50 = vor.u32 1.1754944e-38, %v2639_v25  ;;  %3617 = vrcp.f32 %v6488_v44  ;;  %3001 = vmatpush.xpose.msra.mxu2 %v2818_v55  ;;  %3021 = vmatpush.xpose.msra.mxu3 %v2819_v57  ;;  %v2780_v54 = vsel %vm6515_vm4, %v5959_v27, %v2776_v59  ;;  %v7749_v16 = vld [vmem:[#allocation58_spill] sm:$0xff]  ;;  %v7750_v25 = vld [vmem:[#allocation105_spill] sm:$0xff] }
 0x498   :  { %v6526_v48 = vpop.eup %3615  ;;  %vm2729_vm9 = vweird.f32 %v7744_v49  ;;  %v2662_v2 = vsub.f32 1.0, %v2661_v61  ;;  %v2629_v1 = vmul.f32 %v6473_v28, %v6386_v56  ;;  %v2760_v33 = vadd.f32 %v7746_v5, %v7745_v11  ;;  %v7755_v32 = vld [vmem:[#allocation121_spill] sm:$0xff]  ;;  %v7763_v11 = vld [vmem:[#allocation39_spill] sm:$0xff] }
 0x499   :  { %vm2762_vm12 = vweird.f32 %v7746_v5  ;;  %v2802_v39 = vmul.f32 %v7747_v4, %v2801_v43  ;;  %v2803_v58 = vmul.f32 %v7748_v62, %v2801_v43  ;;  %vm2782_vm5 = vcmp.eq.f32.partialorder %v2781_v15, 8.507059e+37  ;;  %v7756_v55 = vld [vmem:[#allocation61_spill] sm:$0xff]  ;;  %v7764_v4 = vld [vmem:[#allocation54_spill] sm:$0xff] }
 0x49a   :  { %2959 = vmatpush.xpose.msra.mxu0 %v7739_v52  ;;  %2979 = vmatpush.xpose.msra.mxu1 %v7740_v40  ;;  %v2765_v27 = vand.u32 2147483647, %v5461_v31  ;;  %3619 = vrcp.f32 %v6428_v14  ;;  %v2785_v46 = vsel %vm2782_vm5, %v7751_v20, %v2780_v54  ;;  %vm6545_vm8 = vmor %vm2761_vm13, %vm2762_vm12  ;;  %v2744_v59 = vadd.f32 %v7755_v32, %v7754_v8  ;;  %v7766_v8 = vld [vmem:[#allocation122_spill] sm:$0xff] }
 0x49b   :  { %vm2746_vm10 = vweird.f32 %v7755_v32  ;;  %v2421_v9 = vmul.f32 %v6492_v23, %v6343_v26  ;;  %v2431_v61 = vand.u32 2147483648, %v6343_v26  ;;  %v2373_v38 = vmul.f32 %v6526_v48, %v6426_v34  ;;  %3002 = vmatpush.xpose.msra.mxu2 %v2802_v39  ;;  %3022 = vmatpush.xpose.msra.mxu3 %v2803_v58  ;;  %v7765_v39 = vld [vmem:[#allocation34_spill] sm:$0xff] }
 0x49c   :  { %v2764_v31 = vsel %vm6545_vm8, %v7746_v5, %v2760_v33  ;;  %vm2713_vm6 = vweird.f32 %v7756_v55  ;;  %v6562_v6 = vmul.f32 %v6420_v63, %v2646_v0  ;;  %v6565_v57 = vmul.f32 %v6445_v22, %v2662_v2  ;;  %vm6577_vm13 = vmor %vm2745_vm2, %vm2746_vm10  ;;  %v7761_v2 = vld [vmem:[#allocation8_spill] sm:$0xff] }
 0x49d   :  { %v2630_v15 = vsub.f32 1.0, %v2629_v1  ;;  %v2749_v52 = vand.u32 2147483647, %v7735_v21  ;;  %v6568_v40 = vpop.eup %3617  ;;  %3621 = vrcp.f32 %v6534_v41  ;;  %v2786_v43 = vmul.f32 %v7757_v7, %v2785_v46  ;;  %v7762_v1 = vld [vmem:[#allocation112_spill] sm:$0xff] }
 0x49e   :  { %2960 = vmatpush.xpose.msra.mxu0 %v7749_v16  ;;  %2980 = vmatpush.xpose.msra.mxu1 %v7750_v25  ;;  %v2787_v54 = vmul.f32 %v7758_v51, %v2785_v46  ;;  %vm2766_vm7 = vcmp.eq.f32.partialorder %v2765_v27, 8.507059e+37  ;;  %v2748_v33 = vsel %vm6577_vm13, %v7755_v32, %v2744_v59  ;;  %v2728_v62 = vadd.f32 %v7765_v39, %v7764_v4  ;;  %v7767_v59 = vld [vmem:[#allocation24_spill] sm:$0xff]  ;;  %v7772_v51 = vld [vmem:[#allocation113_spill] sm:$0xff] }
 0x49f   :  { %v2769_v5 = vsel %vm2766_vm7, %v7763_v11, %v2764_v31  ;;  %vm2730_vm11 = vweird.f32 %v7765_v39  ;;  %vm2473_vm14 = vweird.f32 %v6012_v12  ;;  %v2422_v21 = vsub.f32 1.0, %v2421_v9  ;;  %3003 = vmatpush.xpose.msra.mxu2 %v2786_v43  ;;  %v7769_v31 = vld [vmem:[#allocation126_spill] sm:$0xff]  ;;  %v7777_v43 = vld [vmem:[#allocation127_spill] sm:$0xff] }
 0x4a0   :  { %v6591_v58 = vor.u32 1.1754944e-38, %v2431_v61  ;;  %v2374_v27 = vsub.f32 1.0, %v2373_v38  ;;  %v2415_v16 = vand.u32 2147483648, %v6428_v14  ;;  %3023 = vmatpush.xpose.msra.mxu3 %v2787_v54  ;;  %v6594_v25 = vpop.eup %3619  ;;  %v2613_v20 = vmul.f32 %v6568_v40, %v6488_v44  ;;  %v7768_v61 = vld [vmem:[#allocation81_spill] sm:$0xff]  ;;  %vm6609_vm2 = vmor %vm2729_vm9, %vm2730_vm11  ;;  %v7773_v54 = vld [vmem:[#allocation115_spill] sm:$0xff] }
 0x4a1   :  { %v2621_v46 = vand.u32 2147483647, %v6488_v44  ;;  %vm2750_vm15 = vcmp.eq.f32.partialorder %v2749_v52, 8.507059e+37  ;;  %v2733_v3 = vand.u32 2147483647, %v7744_v49  ;;  %vm2697_vm0 = vweird.f32 %v7766_v8 }
 0x4a2   :  { %2961 = vmatpush.xpose.msra.mxu0 %v7761_v2  ;;  %2981 = vmatpush.xpose.msra.mxu1 %v7762_v1  ;;  %v2623_v32 = vand.u32 2147483648, %v6488_v44  ;;  %v2770_v9 = vmul.f32 %v7767_v59, %v2769_v5  ;;  %v2771_v38 = vmul.f32 %v7768_v61, %v2769_v5  ;;  %v2753_v7 = vsel %vm2750_vm15, %v7769_v31, %v2748_v33  ;;  %v7774_v2 = vld [vmem:[#allocation53_spill] sm:$0xff]  ;;  %v7775_v1 = vld [vmem:[#allocation62_spill] sm:$0xff]  ;;  %v7776_v59 = vld [vmem:[#allocation44_spill] sm:$0xff] }
 0x4a3   :  { %v6614_v52 = vmul.f32 %v6473_v28, %v2630_v15  ;;  %v2732_v0 = vsel %vm6609_vm2, %v7765_v39, %v2728_v62  ;;  %v2712_v11 = vadd.f32 %v7775_v1, %v7774_v2  ;;  %vm2714_vm3 = vweird.f32 %v7775_v1  ;;  %v6624_v49 = vpop.eup %3621  ;;  %v6635_v39 = vpop.xlane.xlu1 %1749  ;;  %v7784_v2 = vld [vmem:[#allocation99_spill] sm:$0xff] }
 0x4a4   :  { %vm2457_vm4 = vweird.f32 %v6001_v35  ;;  %v6628_v15 = vmul.f32 %v6492_v23, %v2422_v21  ;;  %v2375_v5 = vmul.f32 %v6526_v48, %v2374_v27  ;;  %v2405_v33 = vmul.f32 %v6594_v25, %v6428_v14  ;;  %3004 = vmatpush.xpose.msra.mxu2 %v2770_v9  ;;  %3024 = vmatpush.xpose.msra.mxu3 %v2771_v38  ;;  %v7778_v21 = vld [vmem:[#allocation131_spill] sm:$0xff]  ;;  %vm6646_vm5 = vmor %vm2713_vm6, %vm2714_vm3  ;;  %v7782_v9 = vld [vmem:[#allocation116_spill] sm:$0xff] }
 0x4a5   :  { %v6633_v4 = vor.u32 1.1754944e-38, %v2415_v16  ;;  %v2614_v62 = vsub.f32 1.0, %v2613_v20  ;;  %v2754_v61 = vmul.f32 %v7776_v59, %v2753_v7  ;;  %vm2734_vm9 = vcmp.eq.f32.partialorder %v2733_v3, 8.507059e+37  ;;  %v7779_v27 = vld [vmem:[#allocation35_spill] sm:$0xff]  ;;  %v7785_v59 = vld [vmem:[#allocation118_spill] sm:$0xff] }
 0x4a6   :  { %2962 = vmatpush.xpose.msra.mxu0 %v7772_v51  ;;  %2982 = vmatpush.xpose.msra.mxu1 %v7773_v54  ;;  %v2717_v31 = vand.u32 2147483647, %v7756_v55  ;;  %vm2681_vm12 = vweird.f32 %v7777_v43  ;;  %v2755_v51 = vmul.f32 %v7778_v21, %v2753_v7  ;;  %v2737_v54 = vsel %vm2734_vm9, %v7779_v27, %v2732_v0  ;;  %v7783_v38 = vld [vmem:[#allocation123_spill] sm:$0xff]  ;;  %v7786_v27 = vld [vmem:[#allocation16_spill] sm:$0xff] }
 0x4a7   :  { %v2472_v20 = vadd.f32 %v6229_v17, %v6480_v60  ;;  %vm2474_vm8 = vweird.f32 %v6229_v17  ;;  %v2389_v3 = vmul.f32 %v6624_v49, %v6534_v41  ;;  %3623 = vrcp.f32 %v6635_v39 }
 0x4a8   :  { %v2716_v55 = vsel %vm6646_vm5, %v7775_v1, %v2712_v11  ;;  %v2477_v7 = vand.u32 2147483647, %v6012_v12  ;;  %vm2441_vm10 = vweird.f32 %v6014_v19  ;;  %v6664_v60 = vadd.f32 %v6526_v48, %v2375_v5  ;;  %3005 = vmatpush.xpose.msra.mxu2 %v2754_v61  ;;  %3025 = vmatpush.xpose.msra.mxu3 %v2755_v51  ;;  %v7787_v1 = vld [vmem:[#allocation130_spill] sm:$0xff]  ;;  %vm6676_vm11 = vmor %vm2473_vm14, %vm2474_vm8  ;;  %v7790_v61 = vld [vmem:[#allocation119_spill] sm:$0xff] }
 0x4a9   :  { %v2406_v0 = vsub.f32 1.0, %v2405_v33  ;;  %v2696_v21 = vadd.f32 %v7785_v59, %v7784_v2  ;;  %vm2698_vm6 = vweird.f32 %v7785_v59  ;;  %vm2665_vm7 = vweird.f32 %v6276_v47  ;;  %v7792_v2 = vld [vmem:[#allocation125_spill] sm:$0xff] }
 0x4aa   :  { %2963 = vmatpush.xpose.msra.mxu0 %v7782_v9  ;;  %2983 = vmatpush.xpose.msra.mxu1 %v7783_v38  ;;  %v2738_v16 = vmul.f32 %v7786_v27, %v2737_v54  ;;  %v2739_v11 = vmul.f32 %v7787_v1, %v2737_v54  ;;  %vm2718_vm13 = vcmp.eq.f32.partialorder %v2717_v31, 8.507059e+37  ;;  %v2701_v33 = vand.u32 2147483647, %v7766_v8  ;;  %v7791_v38 = vld [vmem:[#allocation124_spill] sm:$0xff]  ;;  %vm6697_vm2 = vmor %vm2697_vm0, %vm2698_vm6 }
 0x4ab   :  { %v2721_v51 = vsel %vm2718_vm13, %v7790_v61, %v2716_v55  ;;  %v2476_v9 = vsel %vm6676_vm11, %v6229_v17, %v2472_v20  ;;  %v2456_v54 = vadd.f32 %v6208_v45, %v6477_v24  ;;  %vm2458_vm15 = vweird.f32 %v6208_v45  ;;  %v6711_v8 = vld.sshfl [vmem:[#allocation1] sm:$0xff pattern:$0x75316420]  ;;  %v6713_v55 = vld.sshfl [vmem:[#allocation1 + $0x8] sm:$0xff pattern:$0x75316420] }
 0x4ac   :  { %v6689_v31 = vmul.f32 %v6568_v40, %v2614_v62  ;;  %v2390_v12 = vsub.f32 1.0, %v2389_v3  ;;  %vm2478_vm14 = vcmp.eq.f32.partialorder %v2477_v7, 8.507059e+37  ;;  %v2461_v24 = vand.u32 2147483647, %v6001_v35  ;;  %3006 = vmatpush.xpose.msra.mxu2 %v2738_v16  ;;  %3026 = vmatpush.xpose.msra.mxu3 %v2739_v11  ;;  %v7796_v16 = vld [vmem:[#allocation13_spill] sm:$0xff]  ;;  %vm6725_vm5 = vmor %vm2457_vm4, %vm2458_vm15  ;;  %v7801_v61 = vld [vmem:[#allocation128_spill] sm:$0xff] }
 0x4ad   :  { %v6703_v20 = vmul.f32 %v6594_v25, %v2406_v0  ;;  %v2700_v62 = vsel %vm6697_vm2, %v7785_v59, %v2696_v21  ;;  %v2680_v3 = vadd.f32 %v6122_v29, %v6383_v30  ;;  %vm2682_vm3 = vweird.f32 %v6122_v29  ;;  %v6715_v7 = vpop.eup %3623  ;;  %v7795_v0 = vld [vmem:[#allocation12_spill] sm:$0xff]  ;;  %v7814_v30 = vld [vmem:[#allocation109_spill] sm:$0xff] }
 0x4ae   :  { %2964 = vmatpush.xpose.msra.mxu0 %v7791_v38  ;;  %2984 = vmatpush.xpose.msra.mxu1 %v7792_v2  ;;  %vm2425_vm0 = vweird.f32 %v6343_v26  ;;  %v2722_v27 = vmul.f32 %v7795_v0, %v2721_v51  ;;  %v2723_v1 = vmul.f32 %v7796_v16, %v2721_v51  ;;  %v2481_v11 = vsel %vm2478_vm14, %v6325_v13, %v2476_v9  ;;  %v7799_v59 = vld [vmem:[#allocation68_spill] sm:$0xff]  ;;  %vm6748_vm4 = vmor %vm2681_vm12, %vm2682_vm3  ;;  %v7805_v38 = vld [vmem:[#allocation134_spill] sm:$0xff] }
 0x4af   :  { %vm2702_vm9 = vcmp.eq.f32.partialorder %v2701_v33, 8.507059e+37  ;;  %3042 = vst [vmem:[#allocation1] ss:$2 sm:$0xff] %v7799_v59  ;;  %vm2649_vm8 = vweird.f32 %v6305_v42  ;;  %v2460_v21 = vsel %vm6725_vm5, %v6208_v45, %v2456_v54  ;;  %v2685_v5 = vand.u32 2147483647, %v7777_v43  ;;  %v7800_v33 = vld [vmem:[#allocation106_spill] sm:$0xff] }
 0x4b0   :  { %v2440_v13 = vadd.f32 %v6238_v18, %v6500_v53  ;;  %vm2442_vm6 = vweird.f32 %v6238_v18  ;;  %v6739_v35 = vmul.f32 %v6624_v49, %v2390_v12  ;;  %v7802_v51 = vld [vmem:[#allocation108_spill] sm:$0xff]  ;;  %v2664_v53 = vadd.f32 %v6445_v22, %v6565_v57  ;;  %3007 = vmatpush.xpose.msra.mxu2 %v2722_v27  ;;  %3027 = vmatpush.xpose.msra.mxu3 %v2723_v1  ;;  %v7806_v57 = vld [vmem:[#allocation135_spill] sm:$0xff]  ;;  %v7811_v16 = vld [vmem:[#allocation98_spill] sm:$0xff] }
 0x4b1   :  { %v2705_v9 = vsel %vm2702_vm9, %v7802_v51, %v2700_v62  ;;  %vm2666_vm13 = vweird.f32 %v6445_v22  ;;  %v6757_v54 = vmul.f32 %v6715_v7, %v6635_v39  ;;  %vm2462_vm11 = vcmp.eq.f32.partialorder %v2461_v24, 8.507059e+37  ;;  %v7807_v62 = vld [vmem:[#allocation66_spill] sm:$0xff]  ;;  %vm6771_vm15 = vmor %vm2441_vm10, %vm2442_vm6  ;;  %v7818_v45 = vld [vmem:[#allocation43_spill] sm:$0xff] }
 0x4b2   :  { %2965 = vmatpush.xpose.msra.mxu0 %v7800_v33  ;;  %2985 = vmatpush.xpose.msra.mxu1 %v7801_v61  ;;  %v2684_v43 = vsel %vm6748_vm4, %v6122_v29, %v2680_v3  ;;  %v2445_v12 = vand.u32 2147483647, %v6014_v19  ;;  %vm2409_vm12 = vweird.f32 %v6428_v14  ;;  %v2482_v2 = vmul.f32 %v7805_v38, %v2481_v11  ;;  %v7810_v3 = vld [vmem:[#allocation96_spill] sm:$0xff]  ;;  %vm6786_vm10 = vmor %vm2665_vm7, %vm2666_vm13  ;;  %v7816_v33 = vld [vmem:[#allocation137_spill] sm:$0xff] }
 0x4b3   :  { %v2483_v17 = vmul.f32 %v7806_v57, %v2481_v11  ;;  %v2465_v0 = vsel %vm2462_vm11, %v7807_v62, %v2460_v21  ;;  %v2669_v29 = vand.u32 2147483647, %v6276_v47  ;;  %vm2633_vm14 = vweird.f32 %v6386_v56  ;;  %v7817_v51 = vld [vmem:[#allocation22_spill] sm:$0xff]  ;;  %v7824_v57 = vld [vmem:[#allocation133_spill] sm:$0xff]  ;;  %v7826_v24 = vld [vmem:[#allocation15_spill] sm:$0xff] }
 0x4b4   :  { %v2706_v27 = vmul.f32 %v7810_v3, %v2705_v9  ;;  %v2707_v1 = vmul.f32 %v7811_v16, %v2705_v9  ;;  %vm2686_vm2 = vcmp.eq.f32.partialorder %v2685_v5, 8.507059e+37  ;;  %v2444_v11 = vsel %vm6771_vm15, %v6238_v18, %v2440_v13  ;;  %v7815_v18 = vld [vmem:[#allocation136_spill] sm:$0xff]  ;;  %v7832_v19 = vld [vmem:[#allocation111_spill] sm:$0xff] }
 0x4b5   :  { %v2689_v59 = vsel %vm2686_vm2, %v7814_v30, %v2684_v43  ;;  %v2668_v21 = vsel %vm6786_vm10, %v6445_v22, %v2664_v53  ;;  %v2424_v5 = vadd.f32 %v6492_v23, %v6628_v15  ;;  %vm2426_vm3 = vweird.f32 %v6492_v23 }
 0x4b6   :  { %2966 = vmatpush.xpose.msra.mxu0 %v2482_v2  ;;  %2986 = vmatpush.xpose.msra.mxu1 %v2483_v17  ;;  %vm2618_vm9 = vweird.f32 %v6568_v40  ;;  %v2466_v47 = vmul.f32 %v7815_v18, %v2465_v0  ;;  %vm2446_vm7 = vcmp.eq.f32.partialorder %v2445_v12, 8.507059e+37  ;;  %v2648_v13 = vadd.f32 %v6420_v63, %v6562_v6  ;;  %vm6813_vm13 = vmor %vm2425_vm0, %vm2426_vm3  ;;  %v7844_v6 = vld [vmem:[#allocation31_spill] sm:$0xff] }
 0x4b7   :  { %3008 = vmatpush.xpose.msra.mxu2 %v2706_v27  ;;  %3028 = vmatpush.xpose.msra.mxu3 %v2707_v1  ;;  %vm2650_vm5 = vweird.f32 %v6420_v63  ;;  %v2467_v61 = vmul.f32 %v7816_v33, %v2465_v0  ;;  %v2449_v22 = vsel %vm2446_vm7, %v6484_v36, %v2444_v11  ;;  %vm2670_vm6 = vcmp.eq.f32.partialorder %v2669_v29, 8.507059e+37  ;;  %v7831_v1 = vld [vmem:[#allocation65_spill] sm:$0xff] }
 0x4b8   :  { %v2429_v15 = vand.u32 2147483647, %v6343_v26  ;;  %vm2617_vm4 = vweird.f32 %v6488_v44  ;;  %v2690_v9 = vmul.f32 %v7817_v51, %v2689_v59  ;;  %v2691_v53 = vmul.f32 %v7818_v45, %v2689_v59  ;;  %vm6826_vm11 = vmor %vm2649_vm8, %vm2650_vm5  ;;  %v7833_v59 = vld [vmem:[#allocation97_spill] sm:$0xff]  ;;  %v7840_v45 = vld [vmem:[#allocation26_spill] sm:$0xff] }
 0x4b9   :  { %v2673_v43 = vsel %vm2670_vm6, %v6506_v37, %v2668_v21  ;;  %v2653_v36 = vand.u32 2147483647, %v6305_v42  ;;  %v2358_v12 = vsub.f32 1.0, %v6757_v54  ;;  %v2428_v38 = vsel %vm6813_vm13, %v6492_v23, %v2424_v5  ;;  %v7823_v54 = vld [vmem:[#allocation50_spill] sm:$0xff] }
 0x4ba   :  { %2967 = vmatpush.xpose.msra.mxu0 %v2466_v47  ;;  %2987 = vmatpush.xpose.msra.mxu1 %v2467_v61  ;;  %v2408_v37 = vadd.f32 %v6594_v25, %v6703_v20  ;;  %vm2410_vm0 = vweird.f32 %v6594_v25  ;;  %v2450_v2 = vmul.f32 %v7823_v54, %v2449_v22  ;;  %v2652_v23 = vsel %vm6826_vm11, %v6420_v63, %v2648_v13  ;;  %v7825_v20 = vld [vmem:[#allocation73_spill] sm:$0xff]  ;;  %v7851_v63 = vld [vmem:[#allocation48_spill] sm:$0xff] }
 0x4bb   :  { %3009 = vmatpush.xpose.msra.mxu2 %v2690_v9  ;;  %3029 = vmatpush.xpose.msra.mxu3 %v2691_v53  ;;  %v2632_v42 = vadd.f32 %v6473_v28, %v6614_v52  ;;  %vm2634_vm8 = vweird.f32 %v6473_v28  ;;  %vm2377_vm15 = vweird.f32 %v6426_v34  ;;  %v2451_v17 = vmul.f32 %v7824_v57, %v2449_v22  ;;  %vm6850_vm3 = vmor %vm2409_vm12, %vm2410_vm0  ;;  %v7839_v9 = vld [vmem:[#allocation23_spill] sm:$0xff] }
 0x4bc   :  { %v2674_v62 = vmul.f32 %v7825_v20, %v2673_v43  ;;  %vm2430_vm2 = vcmp.eq.f32.partialorder %v2429_v15, 8.507059e+37  ;;  %v2413_v0 = vand.u32 2147483647, %v6428_v14  ;;  %v2675_v29 = vmul.f32 %v7826_v24, %v2673_v43  ;;  %vm6863_vm7 = vmor %vm2633_vm14, %vm2634_vm8  ;;  %v7850_v24 = vld [vmem:[#allocation77_spill] sm:$0xff]  ;;  %v7853_v14 = vld [vmem:[#allocation11_spill] sm:$0xff] }
 0x4bd   :  { %v2433_v3 = vsel %vm2430_vm2, %v6591_v58, %v2428_v38  ;;  %vm2654_vm10 = vcmp.eq.f32.partialorder %v2653_v36, 8.507059e+37  ;;  %v2637_v52 = vand.u32 2147483647, %v6386_v56  ;;  %v2412_v16 = vsel %vm6850_vm3, %v6594_v25, %v2408_v37  ;;  %vm6894_vm0 = vmor %vm2617_vm4, %vm2618_vm9  ;;  %v7845_v37 = vld [vmem:[#allocation78_spill] sm:$0xff] }
 0x4be   :  { %2968 = vmatpush.xpose.msra.mxu0 %v2450_v2  ;;  %2988 = vmatpush.xpose.msra.mxu1 %v2451_v17  ;;  %v2657_v27 = vsel %vm2654_vm10, %v6504_v10, %v2652_v23  ;;  %v2392_v58 = vadd.f32 %v6624_v49, %v6739_v35  ;;  %vm2394_vm12 = vweird.f32 %v6624_v49  ;;  %v2616_v10 = vadd.f32 %v6568_v40, %v6689_v31  ;;  %v7834_v31 = vld [vmem:[#allocation27_spill] sm:$0xff]  ;;  %v7846_v2 = vld [vmem:[#allocation72_spill] sm:$0xff] }
 0x4bf   :  { %vm2393_vm5 = vweird.f32 %v6534_v41  ;;  %v2399_v25 = vand.u32 2147483648, %v6534_v41  ;;  %3010 = vmatpush.xpose.msra.mxu2 %v2674_v62  ;;  %3030 = vmatpush.xpose.msra.mxu3 %v2675_v29  ;;  %v2636_v56 = vsel %vm6863_vm7, %v6473_v28, %v2632_v42  ;;  %v2434_v11 = vmul.f32 %v7831_v1, %v2433_v3  ;;  %v7847_v42 = vld [vmem:[#allocation60_spill] sm:$0xff]  ;;  %v7848_v17 = vld [vmem:[#allocation67_spill] sm:$0xff] }
 0x4c0   :  { %v2435_v30 = vmul.f32 %v7832_v19, %v2433_v3  ;;  %vm2414_vm14 = vcmp.eq.f32.partialorder %v2413_v0, 8.507059e+37  ;;  %v2397_v35 = vand.u32 2147483647, %v6534_v41  ;;  %v2658_v21 = vmul.f32 %v7833_v59, %v2657_v27  ;;  %vm6885_vm13 = vmor %vm2393_vm5, %vm2394_vm12  ;;  %v7849_v0 = vld [vmem:[#allocation84_spill] sm:$0xff]  ;;  %v7856_v28 = vld [vmem:[#allocation19_spill] sm:$0xff] }
 0x4c1   :  { %v2659_v5 = vmul.f32 %v7834_v31, %v2657_v27  ;;  %v2417_v18 = vsel %vm2414_vm14, %v6633_v4, %v2412_v16  ;;  %vm2638_vm6 = vcmp.eq.f32.partialorder %v2637_v52, 8.507059e+37  ;;  %vm2378_vm11 = vweird.f32 %v6526_v48  ;;  %v7852_v27 = vld [vmem:[#allocation83_spill] sm:$0xff]  ;;  %v3044_v19 = vld.sshfl [vmem:[#allocation1 + $0x8] sm:$0xff pattern:$0x75316420] }
 0x4c2   :  { %v2359_v41 = vmul.f32 %v6715_v7, %v2358_v12  ;;  %2969 = vmatpush.xpose.msra.mxu0 %v2434_v11  ;;  %2989 = vmatpush.xpose.msra.mxu1 %v2435_v30  ;;  %v2641_v4 = vsel %vm2638_vm6, %v6520_v50, %v2636_v56  ;;  %v2396_v13 = vsel %vm6885_vm13, %v6624_v49, %v2392_v58  ;;  %v2381_v33 = vand.u32 2147483647, %v6426_v34  ;;  %vm6916_vm4 = vmor %vm2377_vm15, %vm2378_vm11  ;;  %v7854_v56 = vld [vmem:[#allocation10_spill] sm:$0xff] }
 0x4c3   :  { %v2383_v61 = vand.u32 2147483648, %v6426_v34  ;;  %v2400_v22 = vor.u32 1.1754944e-38, %v2399_v25  ;;  %3011 = vmatpush.xpose.msra.mxu2 %v2658_v21  ;;  %3031 = vmatpush.xpose.msra.mxu3 %v2659_v5  ;;  %v2620_v15 = vsel %vm6894_vm0, %v6568_v40, %v2616_v10  ;;  %v2624_v51 = vor.u32 1.1754944e-38, %v2623_v32  ;;  %v7843_v40 = vld [vmem:[#allocation102_spill] sm:$0xff] }
 0x4c4   :  { %v2418_v50 = vmul.f32 %v7839_v9, %v2417_v18  ;;  %v2419_v53 = vmul.f32 %v7840_v45, %v2417_v18  ;;  %vm2398_vm9 = vcmp.eq.f32.partialorder %v2397_v35, 8.507059e+37  ;;  %vm2622_vm8 = vcmp.eq.f32.partialorder %v2621_v46, 8.507059e+37  ;;  %v3043_v21 = vld.sshfl [vmem:[#allocation1] sm:$0xff pattern:$0x75316420]  ;;  %v7855_v18 = vld [vmem:[#allocation9_spill] sm:$0xff] }
 0x4c5   :  { %v2642_v43 = vmul.f32 %v7843_v40, %v2641_v4  ;;  %v2643_v32 = vmul.f32 %v7844_v6, %v2641_v4  ;;  %v2401_v36 = vsel %vm2398_vm9, %v2400_v22, %v2396_v13  ;;  %v2360_v12 = vadd.f32 %v6715_v7, %v2359_v41 }
 0x4c6   :  { %vm2362_vm2 = vweird.f32 %v6715_v7  ;;  %2970 = vmatpush.xpose.msra.mxu0 %v2418_v50  ;;  %2990 = vmatpush.xpose.msra.mxu1 %v2419_v53  ;;  %v2625_v38 = vsel %vm2622_vm8, %v2624_v51, %v2620_v15  ;;  %v2380_v34 = vsel %vm6916_vm4, %v6526_v48, %v6664_v60  ;;  %vm2382_vm15 = vcmp.eq.f32.partialorder %v2381_v33, 8.507059e+37  ;;  %v7857_v33 = vld [vmem:[#allocation18_spill] sm:$0xff] }
 0x4c7   :  { %v2384_v44 = vor.u32 1.1754944e-38, %v2383_v61  ;;  %v2367_v46 = vand.u32 2147483648, %v6635_v39  ;;  %3012 = vmatpush.xpose.msra.mxu2 %v2642_v43  ;;  %3032 = vmatpush.xpose.msra.mxu3 %v2643_v32  ;;  %vm2361_vm10 = vweird.f32 %v6635_v39  ;;  %v2365_v26 = vand.u32 2147483647, %v6635_v39 }
 0x4c8   :  { %v2402_v54 = vmul.f32 %v7845_v37, %v2401_v36  ;;  %v2403_v23 = vmul.f32 %v7846_v2, %v2401_v36  ;;  %vm2363_vm3 = vmor %vm2361_vm10, %vm2362_vm2  ;;  %v2626_v57 = vmul.f32 %v7847_v42, %v2625_v38  ;;  %v2627_v20 = vmul.f32 %v7848_v17, %v2625_v38 }
 0x4c9   :  { %v2385_v48 = vsel %vm2382_vm15, %v2384_v44, %v2380_v34  ;;  %v2364_v60 = vsel %vm2363_vm3, %v6715_v7, %v2360_v12  ;;  %v2368_v62 = vor.u32 1.1754944e-38, %v2367_v46  ;;  %vm2366_vm7 = vcmp.eq.f32.partialorder %v2365_v26, 8.507059e+37 }
 0x4ca   :  { %2971 = vmatpush.xpose.msra.mxu0 %v2402_v54  ;;  %2991 = vmatpush.xpose.msra.mxu1 %v2403_v23  ;;  %v2386_v39 = vmul.f32 %v7849_v0, %v2385_v48  ;;  %v2387_v29 = vmul.f32 %v7850_v24, %v2385_v48  ;;  %v3039_v47 = vmul.f32 2.0, %v7855_v18 }
 0x4cb   :  { %3013 = vmatpush.xpose.msra.mxu2 %v2626_v57  ;;  %3033 = vmatpush.xpose.msra.mxu3 %v2627_v20  ;;  %v2369_v3 = vsel %vm2366_vm7, %v2368_v62, %v2364_v60 }
 0x4cc   :  { %v2370_v52 = vmul.f32 %v7851_v63, %v2369_v3  ;;  %v2371_v16 = vmul.f32 %v7852_v27, %v2369_v3  ;;  %3046 = vst [vmem:[#allocation1 + $0x10] ss:$2 sm:$0xff] %v3039_v47 }
 0x4ce   :  { %3014 = vmatmul.f32.vlgmr.msra.gmra.mxu2 %v6711_v8  ;;  %2972 = vmatpush.xpose.msra.mxu0 %v2386_v39 }
 0x4cf   :  { %2992 = vmatpush.xpose.msra.mxu1 %v2387_v29  ;;  %3034 = vmatmul.f32.vlgmr.msra.gmra.mxu3 %v6713_v55 }
 0x4d2   :  { %2973 = vmatpush.xpose.msra.mxu0 %v2370_v52 }
 0x4d3   :  { %2993 = vmatpush.xpose.msra.mxu1 %v2371_v16  ;;  %v3048_v22 = vld.sshfl [vmem:[#allocation1 + $0x18] sm:$0xff pattern:$0x75316420]  ;;  %v3047_v9 = vld.sshfl [vmem:[#allocation1 + $0x10] sm:$0xff pattern:$0x75316420] }
 0x4d5   :  { %2974 = vmatmul.f32.vlgmr.msra.gmra.mxu0 %v6711_v8 }
 0x4d6   :  { %2994 = vmatmul.f32.vlgmr.msra.gmra.mxu1 %v6713_v55 }
 0x50b   :  { %v2930_v7 = vpop.f32.mrf.mxu2  ;;  %v2950_v25 = vpop.f32.mrf.mxu3 }
 0x50c   :  { %v2931_v58 = vadd.f32 %v2930_v7, %v7853_v14 }
 0x50e   :  { %v2951_v11 = vadd.f32 %v2950_v25, %v2931_v58 }
 0x510   :  { %v3054_v35 = vadd.f32 %v3044_v19, %v2951_v11 }
 0x512   :  { %v2890_v10 = vpop.f32.mrf.mxu0  ;;  %v2910_v30 = vpop.f32.mrf.mxu1  ;;  %v3061_v31 = vrot.slane %v3054_v35, 4 }
 0x513   :  { %v2891_v1 = vadd.f32 %v2890_v10, %v7854_v56 }
 0x515   :  { %v2911_v59 = vadd.f32 %v2910_v30, %v2891_v1 }
 0x517   :  { %v3053_v5 = vadd.f32 %v3043_v21, %v2911_v59 }
 0x519   :  { %v3063_v8 = vsel %vm185_vm1, %v3053_v5, %v3061_v31 }
 0x51a   :  { %3067 = vst [vmem:[#allocation5] sm:$0xff] %v3063_v8 }
 0x551   :  { %v3015_v55 = vpop.f32.mrf.mxu2 }
 0x552   :  { %v3016_v41 = vadd.f32 %v3015_v55, %v7856_v28  ;;  %v2975_v4 = vpop.f32.mrf.mxu0  ;;  %v3035_v13 = vpop.f32.mrf.mxu3 }
 0x553   :  { %v2976_v61 = vadd.f32 %v2975_v4, %v7857_v33  ;;  %v2995_v15 = vpop.f32.mrf.mxu1 }
 0x554   :  { %v3036_v51 = vadd.f32 %v3035_v13, %v3016_v41 }
 0x555   :  { %v2996_v50 = vadd.f32 %v2995_v15, %v2976_v61 }
 0x556   :  { %v3056_v45 = vadd.f32 %v3048_v22, %v3036_v51 }
 0x557   :  { %v3055_v53 = vadd.f32 %v3047_v9, %v2996_v50 }
 0x558   :  { %v3062_v49 = vrot.slane %v3056_v45, 4 }
 0x55a   :  { %v3064_v40 = vsel %vm185_vm1, %v3055_v53, %v3062_v49 }
 0x55b   :  { %3068 = vst [vmem:[#allocation5 + $0x8] sm:$0xff] %v3064_v40 }
 0x55c   :  { %3081 = dma.vmem_to_hbm [thread:$0]  %s3074_s13, 256, %s3076_s16, [#allocation4], %s3678_s11, %s3678_s11, %s3679_s12  }
 0x55d   :  { %3675 = dma.done.wait [#allocation4], 256  }
 0x55e   :  { %3676 = vsyncadd [#allocation4], 4294967040 }
 0x55f   :  { %3086 = vsyncpa [#allocation3], 1 }
 0x560   :  { %3087 = vsyncpa [#allocation4], 1 }

</bundles_post_ra>
